<compile_context>
chip_gen: v6e
topology: v6e:2x2x1
jax: 0.10.0
libtpu: 0.0.40
codegen_flags: <defaults>
</compile_context>

<pallas_src>
import math

import jax
import jax.numpy as jnp
from jax.experimental import pallas as pl
from jax.experimental.pallas import tpu as pltpu

EPS = 1e-5
MXU_DTYPE = jnp.bfloat16   # bf16 MXU inputs, f32 accumulation


# -----------------------------------------------------------------------------
# Numeric helpers (usable inside Pallas kernels and in XLA glue)
# -----------------------------------------------------------------------------
def _gelu(x):
    # TODO(synk): tanh-approximate GELU (PyTorch default is exact erf).
    return jax.nn.gelu(x, approximate=True)


def _ln(x, g, b):
    mu = jnp.mean(x, axis=-1, keepdims=True)
    var = jnp.mean(jnp.square(x - mu), axis=-1, keepdims=True)
    return (x - mu) * jax.lax.rsqrt(var + EPS) * g + b


def _dot(a, b):
    # bf16 MXU inputs (weights are pre-cast outside the kernel), f32 accumulate.
    return jnp.dot(a.astype(MXU_DTYPE), b.astype(MXU_DTYPE),
                   preferred_element_type=jnp.float32)


def _conv_window(h, w_flat, bias):
    """'same'-padded stride-1 1-D conv as ONE grouped MXU dot.

    h: [L, Cin] f32; w_flat: [K*Cin, Cout] bf16 (tap-major); bias: [1, Cout] f32.
    The K shifted views are concatenated along lanes so the MXU contraction
    depth is K*Cin instead of Cin.
    TODO(synk): at production L the long S4 conv (K ~ L) should stream tap
    groups over a grid axis / fori_loop instead of building the full window.
    """
    L, cin = h.shape
    K = w_flat.shape[0] // cin
    pad = (K - 1) // 2
    zeros = jnp.zeros((pad, cin), h.dtype)
    hp = jnp.concatenate([zeros, h, zeros], axis=0)                    # [L+K-1, Cin]
    win = jnp.concatenate([hp[k:k + L, :] for k in range(K)], axis=1)  # [L, K*Cin]
    return jnp.dot(win.astype(MXU_DTYPE), w_flat,
                   preferred_element_type=jnp.float32) + bias


# -----------------------------------------------------------------------------
# Weight prep (outside the kernels): flatten taps + cast to bf16
# -----------------------------------------------------------------------------
def _flat_w(w):          # [K, Cin, Cout] -> [K*Cin, Cout] bf16
    k, ci, co = w.shape
    return w.reshape(k * ci, co).astype(MXU_DTYPE)


def _flat_w_stack(w):    # [N, K, Cin, Cout] -> [N, K*Cin, Cout] bf16
    n, k, ci, co = w.shape
    return w.reshape(n, k * ci, co).astype(MXU_DTYPE)


def _vmem_budget(operand_bytes):
    # double-buffered operands + f32 activation temporaries; clamp so the request
    # is safe on v5e/v6e (128 MiB physical) and v7x (64 MiB physical).
    return int(min(48 * 1024 * 1024, max(16 * 1024 * 1024, 6 * operand_bytes)))


def _nbytes(a):
    return int(a.size) * int(a.dtype.itemsize)


# -----------------------------------------------------------------------------
# Pallas kernel 1: stack-level input projection (EnhancedConvBlock, k=7)
# Conv -> GELU -> LayerNorm, NCL in / NCL out, gridded over batch.
# -----------------------------------------------------------------------------
def input_conv_block(x_ncl, p):
    # TODO(synk): EnhancedConvBlock internals unavailable; Conv -> GELU -> LayerNorm.
    B, Cin, L = x_ncl.shape
    K, _, Cout = p["w"].shape
    w_flat = _flat_w(p["w"])

    def kernel(x_ref, w_ref, b_ref, g_ref, bt_ref, o_ref):
        x_lc = jnp.transpose(x_ref[0].astype(jnp.float32))     # [L, Cin]
        y = _conv_window(x_lc, w_ref[...], b_ref[...])
        y = _ln(_gelu(y), g_ref[...], bt_ref[...])
        o_ref[0] = jnp.transpose(y).astype(o_ref.dtype)        # lane-dense NCL store

    full = lambda a: pl.BlockSpec(a.shape, lambda b, nd=a.ndim: (0,) * nd)
    args = (x_ncl, w_flat, p["b"], p["ln_g"], p["ln_b"])
    flops = 2 * B * L * K * Cin * Cout
    bytes_accessed = sum(_nbytes(a) for a in args) + B * Cout * L * 4

    return pl.pallas_call(
        kernel,
        out_shape=jax.ShapeDtypeStruct((B, Cout, L), x_ncl.dtype),
        grid=(B,),
        in_specs=[pl.BlockSpec((1, Cin, L), lambda b: (b, 0, 0)),
                  full(w_flat), full(p["b"]), full(p["ln_g"]), full(p["ln_b"])],
        out_specs=pl.BlockSpec((1, Cout, L), lambda b: (b, 0, 0)),
        compiler_params=pltpu.CompilerParams(
            dimension_semantics=("parallel",),
            vmem_limit_bytes=_vmem_budget(bytes_accessed)),
        cost_estimate=pl.CostEstimate(flops=int(flops),
                                      transcendentals=int(B * L * Cout),
                                      bytes_accessed=int(bytes_accessed)),
    )(*args)


# -----------------------------------------------------------------------------
# Pallas kernel 2: one fused kernel per EnhancedEncoderBlock level
# -----------------------------------------------------------------------------
def _make_level_kernel(has_proj, global_residual, n_conv, n_s4, Lds):
    """Fused per-batch-element encoder level, everything resident in VMEM.

    [optional 1x1 in-proj] -> (conv3 -> GELU -> LN) x N -> strided conv3
    downsample -> LN -> GELU -> +PE -> n_s4 x (LN -> long conv -> GELU ->
    Linear, residual add) -> FiLM -> [optional stride-2 1x1 global residual]
    -> final LN -> lane-dense NCL store.
    """

    def kernel(*args):
        pick = args[-1]                 # VMEM scratch [L, Cout] f32 (strided picks)
        o_ref = args[-2]
        it = iter(args[:-2])
        x_ref, g_ref, bt_ref = next(it), next(it), next(it)
        if has_proj:
            pw_ref, pb_ref = next(it), next(it)
        cw_ref, cb_ref, cg_ref, cbt_ref = next(it), next(it), next(it), next(it)
        dw_ref, db_ref, dg_ref, dbt_ref = next(it), next(it), next(it), next(it)
        pe_ref = next(it)
        s4g_ref, s4b_ref = next(it), next(it)
        s4kw_ref, s4kb_ref, s4ow_ref, s4ob_ref = next(it), next(it), next(it), next(it)
        if global_residual:
            rw_ref, rb_ref = next(it), next(it)
        fg_ref, fbt_ref = next(it), next(it)

        f32 = jnp.float32
        x_lc = jnp.transpose(x_ref[0].astype(f32))            # [L, Cin]

        # optional 1x1 input projection (exact; applied pre-padding)
        if has_proj:
            h = _dot(x_lc, pw_ref[...]) + pb_ref[...]
        else:
            h = x_lc

        # conv blocks: Conv(k=3, 'same') -> GELU -> LayerNorm
        # TODO(synk): EnhancedConvBlock internals unavailable; Conv->GELU->LN.
        for i in range(n_conv):
            y = _conv_window(h, cw_ref[i], cb_ref[i])
            h = _ln(_gelu(y), cg_ref[i], cbt_ref[i])

        # downsample: Conv(k=3, s=2, p=1) -> LayerNorm -> GELU, then +pos.enc.
        # stride-2 = stride-1 'same' conv + strided row pick (rows 0,2,4,...),
        # which matches Conv1d(k=3, s=2, p=1) exactly.
        # TODO(synk): DownsampleBlock internals unavailable; conv->LN->GELU.
        y = _conv_window(h, dw_ref[...], db_ref[...])          # [L, C]
        pick[...] = y
        y = pick[pl.ds(0, Lds, stride=2), :]                   # [Lds, C]
        h = _gelu(_ln(y, dg_ref[...], dbt_ref[...]))
        h = h + pe_ref[...]                                    # sinusoidal PE

        # S4-style layers with residual: x = x + s4(x)
        # TODO(synk): EnhancedS4Layer internals unavailable; approximated as
        # LN -> long bidirectional 'same' conv with channel mixing -> GELU -> Linear.
        for j in range(n_s4):
            hn = _ln(h, s4g_ref[j], s4b_ref[j])
            y = _gelu(_conv_window(hn, s4kw_ref[j], s4kb_ref[j]))
            y = _dot(y, s4ow_ref[j]) + s4ob_ref[j]
            h = h + y

        # FiLM modulation: x * (1 + ls*gamma) + ls*beta (conditioning MLP in XLA).
        # TODO(synk): AdaptiveFiLMWithDropout internals unavailable; CFG path at
        # guidance scale 1.0 (conditional identity path), eval-mode dropout.
        h = h * (1.0 + g_ref[0]) + bt_ref[0]

        # global residual: 1x1 stride-2 conv of the raw level input; 1x1 matmul
        # first, then the same strided-row pick (identical result, no extra layout).
        if global_residual:
            r_full = _dot(x_lc, rw_ref[...]) + rb_ref[...]     # [L, C]
            pick[...] = r_full
            h = h + pick[pl.ds(0, Lds, stride=2), :]

        h = _ln(h, fg_ref[...], fbt_ref[...])
        o_ref[0] = jnp.transpose(h).astype(o_ref.dtype)        # lane-dense NCL store

    return kernel


def encoder_level(x_ncl, g_eff, b_eff, lp):
    """x_ncl: [B, Cin, L]; g_eff/b_eff: [B, Cout] effective FiLM gamma/beta."""
    B, Cin, L = x_ncl.shape
    Lds, Cout = lp["pe"].shape
    has_proj = "proj_w" in lp
    global_residual = "res_w" in lp
    n_conv = int(lp["conv_w"].shape[0])
    n_s4 = int(lp["s4_kw"].shape[0])
    k_conv = int(lp["conv_w"].shape[1])
    k_down = int(lp["down_w"].shape[0])
    k_s4 = int(lp["s4_kw"].shape[1])

    kernel = _make_level_kernel(has_proj, global_residual, n_conv, n_s4, Lds)

    args = [x_ncl, g_eff[:, None, :], b_eff[:, None, :]]
    specs = [
        pl.BlockSpec((1, Cin, L), lambda b: (b, 0, 0)),
        pl.BlockSpec((1, 1, Cout), lambda b: (b, 0, 0)),
        pl.BlockSpec((1, 1, Cout), lambda b: (b, 0, 0)),
    ]

    def add(a):
        args.append(a)
        specs.append(pl.BlockSpec(a.shape, lambda b, nd=a.ndim: (0,) * nd))

    if has_proj:
        add(lp["proj_w"].astype(MXU_DTYPE)); add(lp["proj_b"])
    add(_flat_w_stack(lp["conv_w"])); add(lp["conv_b"])
    add(lp["conv_ln_g"]); add(lp["conv_ln_b"])
    add(_flat_w(lp["down_w"])); add(lp["down_b"])
    add(lp["down_ln_g"]); add(lp["down_ln_b"])
    add(lp["pe"])
    add(lp["s4_ln_g"]); add(lp["s4_ln_b"])
    add(_flat_w_stack(lp["s4_kw"])); add(lp["s4_kb"])
    add(lp["s4_ow"].astype(MXU_DTYPE)); add(lp["s4_ob"])
    if global_residual:
        add(lp["res_w"].astype(MXU_DTYPE)); add(lp["res_b"])
    add(lp["final_ln_g"]); add(lp["final_ln_b"])

    flops_per_b = (
        (2 * L * Cin * Cout if has_proj else 0)
        + n_conv * 2 * L * (k_conv * Cout) * Cout
        + 2 * L * (k_down * Cout) * Cout
        + n_s4 * (2 * Lds * (k_s4 * Cout) * Cout + 2 * Lds * Cout * Cout)
        + (2 * L * Cin * Cout if global_residual else 0))
    trans_per_b = L * Cout * (n_conv + 1) + Lds * Cout * n_s4
    bytes_accessed = sum(_nbytes(a) for a in args) + B * Cout * Lds * 4

    return pl.pallas_call(
        kernel,
        out_shape=jax.ShapeDtypeStruct((B, Cout, Lds), x_ncl.dtype),
        grid=(B,),
        in_specs=specs,
        out_specs=pl.BlockSpec((1, Cout, Lds), lambda b: (b, 0, 0)),
        scratch_shapes=[pltpu.VMEM((L, Cout), jnp.float32)],
        compiler_params=pltpu.CompilerParams(
            dimension_semantics=("parallel",),
            vmem_limit_bytes=_vmem_budget(bytes_accessed)),
        cost_estimate=pl.CostEstimate(flops=int(B * flops_per_b),
                                      transcendentals=int(B * trans_per_b),
                                      bytes_accessed=int(bytes_accessed)),
    )(*args)


# -----------------------------------------------------------------------------
# Tiny conditioning MLPs: plain XLA (sub-KiB tensors, not worth a Pallas launch)
# -----------------------------------------------------------------------------
def _static_embedding(static_params, se):
    h = _gelu(static_params @ se["w1"] + se["b1"])
    h = _ln(h, se["ln_g"], se["ln_b"])                 # Dropout(eval) = identity
    return h @ se["w2"] + se["b2"]


def _film_gamma_beta(static_emb, lp):
    hc = _gelu(static_emb @ lp["film_w1"] + lp["film_b1"])
    gb = hc @ lp["film_w2"] + lp["film_b2"]
    C = lp["film_ls"].shape[0]
    gamma, beta = gb[:, :C], gb[:, C:]
    return gamma * lp["film_ls"][None, :], beta * lp["film_ls"][None, :]


# -----------------------------------------------------------------------------
# Parameter initialization (deterministic, synthetic).  Leaves are ALL arrays so
# the pytree passes straight through jax.jit; structure is encoded by key
# presence/absence and static shapes.
# -----------------------------------------------------------------------------
class KeyGen:
    def __init__(self, key):
        self.key = key

    def __call__(self):
        self.key, sub = jax.random.split(self.key)
        return sub


def _dense(kg, fi, fo):
    w = jax.random.normal(kg(), (fi, fo), jnp.float32) * (1.0 / math.sqrt(fi))
    return w, jnp.zeros((fo,), jnp.float32)


def _conv(kg, K, ci, co):
    w = jax.random.normal(kg(), (K, ci, co), jnp.float32) * (1.0 / math.sqrt(K * ci))
    return w, jnp.zeros((co,), jnp.float32)


def sinusoidal_pe(L, d):
    pos = jnp.arange(L, dtype=jnp.float32)[:, None]
    i = jnp.arange(d)[None, :]
    div = jnp.power(10000.0, (2 * (i // 2)).astype(jnp.float32) / d)
    ang = pos / div
    return jnp.where(i % 2 == 0, jnp.sin(ang), jnp.cos(ang)).astype(jnp.float32)


def init_params(key, input_channels, base_channels, static_dim, seq_len,
                n_levels=2, channel_multiplier=2.0, num_s4_layers=2, num_conv_layers=2):
    kg = KeyGen(key)
    sd2 = static_dim * 2
    p = {}

    w1, b1 = _dense(kg, static_dim, sd2)
    w2, b2 = _dense(kg, sd2, sd2)
    p["static_emb"] = dict(w1=w1, b1=b1, ln_g=jnp.ones((sd2,)), ln_b=jnp.zeros((sd2,)),
                           w2=w2, b2=b2)

    w, b = _conv(kg, 7, input_channels, base_channels)
    p["in_proj"] = dict(w=w, b=b.reshape(1, base_channels),
                        ln_g=jnp.ones((1, base_channels)),
                        ln_b=jnp.zeros((1, base_channels)))

    channels = [int(base_channels * channel_multiplier ** i) for i in range(n_levels)]
    levels = []
    for i in range(n_levels):
        cin = base_channels if i == 0 else channels[i - 1]
        cout = channels[i]
        lin = seq_len // (2 ** i)
        assert lin % 2 == 0, "sequence length must remain even at every level"
        lds = lin // 2
        lvl = {}

        if cin != cout:
            w, b = _conv(kg, 1, cin, cout)
            lvl["proj_w"] = w[0]
            lvl["proj_b"] = b.reshape(1, cout)

        cw, cb, cg, cbt = [], [], [], []
        for _ in range(num_conv_layers):
            w, b = _conv(kg, 3, cout, cout)
            cw.append(w); cb.append(b.reshape(1, cout))
            cg.append(jnp.ones((1, cout))); cbt.append(jnp.zeros((1, cout)))
        lvl["conv_w"] = jnp.stack(cw)
        lvl["conv_b"] = jnp.stack(cb)
        lvl["conv_ln_g"] = jnp.stack(cg)
        lvl["conv_ln_b"] = jnp.stack(cbt)

        w, b = _conv(kg, 3, cout, cout)
        lvl["down_w"] = w
        lvl["down_b"] = b.reshape(1, cout)
        lvl["down_ln_g"] = jnp.ones((1, cout))
        lvl["down_ln_b"] = jnp.zeros((1, cout))

        lvl["pe"] = sinusoidal_pe(lds, cout)

        k_s4 = lds - 1 if lds % 2 == 0 else lds
        sg, sb, skw, skb, sow, sob = [], [], [], [], [], []
        for _ in range(num_s4_layers):
            kw, kb = _conv(kg, k_s4, cout, cout)
            ow, ob = _dense(kg, cout, cout)
            sg.append(jnp.ones((1, cout))); sb.append(jnp.zeros((1, cout)))
            skw.append(kw); skb.append(kb.reshape(1, cout))
            sow.append(ow); sob.append(ob.reshape(1, cout))
        lvl["s4_ln_g"] = jnp.stack(sg); lvl["s4_ln_b"] = jnp.stack(sb)
        lvl["s4_kw"] = jnp.stack(skw); lvl["s4_kb"] = jnp.stack(skb)
        lvl["s4_ow"] = jnp.stack(sow); lvl["s4_ob"] = jnp.stack(sob)

        fw1, fb1 = _dense(kg, sd2, sd2)
        fw2, fb2 = _dense(kg, sd2, 2 * cout)
        lvl["film_w1"] = fw1; lvl["film_b1"] = fb1
        lvl["film_w2"] = fw2; lvl["film_b2"] = fb2
        lvl["film_ls"] = 0.1 * jnp.ones((cout,))

        if cin == cout:                       # global residual path exists
            rw, rb = _conv(kg, 1, cin, cout)
            lvl["res_w"] = rw[0]
            lvl["res_b"] = rb.reshape(1, cout)

        lvl["final_ln_g"] = jnp.ones((1, cout))
        lvl["final_ln_b"] = jnp.zeros((1, cout))
        levels.append(lvl)

    p["levels"] = levels
    return p


# -----------------------------------------------------------------------------
# Forward pass (mirrors MultiScaleEncoderStack.forward); all tensors stay NCL.
# -----------------------------------------------------------------------------
def multi_scale_encoder_stack(x_ncl, static_params, params,
                              cfg_guidance_scale=1.0, force_uncond=False):
    # TODO(synk): cfg_guidance_scale / force_uncond are no-ops on the conditional
    # path (guidance scale 1.0, eval mode).
    del cfg_guidance_scale, force_uncond

    static_emb = _static_embedding(static_params, params["static_emb"])
    x = input_conv_block(x_ncl, params["in_proj"])            # NCL in / NCL out

    skip_connections, encoder_outputs = [], []
    for lp in params["levels"]:
        skip_connections.append(x)
        g_eff, b_eff = _film_gamma_beta(static_emb, lp)
        x = encoder_level(x, g_eff, b_eff, lp)                 # NCL in / NCL out
        encoder_outputs.append(x)

    return x, skip_connections, static_emb, encoder_outputs


# -----------------------------------------------------------------------------
# Main
# -----------------------------------------------------------------------------
if __name__ == "__main__":
    B = 2
    input_channels = 4
    base_channels = 8
    static_dim = 6
    seq_len = 16
    n_levels = 2   # small config (module default is 4)

    key = jax.random.PRNGKey(0)
    kx, ks, kp = jax.random.split(key, 3)
    x = jax.random.normal(kx, (B, input_channels, seq_len), jnp.float32)
    static_params = jax.random.normal(ks, (B, static_dim), jnp.float32)

    params = init_params(kp, input_channels, base_channels, static_dim, seq_len,
                         n_levels=n_levels, channel_multiplier=2.0, num_s4_layers=2)

    fwd = jax.jit(multi_scale_encoder_stack)
    out, skips, static_emb, enc_outs = fwd(x, static_params, params)
    jax.block_until_ready((out, skips, static_emb, enc_outs))

    # final encoding [B, C_last, seq_len / 2^n_levels]
    assert out.shape == (B, int(base_channels * 2 ** (n_levels - 1)),
                         seq_len // (2 ** n_levels))
    assert static_emb.shape == (B, static_dim * 2)
    assert len(skips) == n_levels and len(enc_outs) == n_levels
    assert skips[0].shape == (B, base_channels, seq_len)
    assert enc_outs[0].shape == (B, base_channels, seq_len // 2)
    assert all(jnp.all(jnp.isfinite(o)) for o in [out, static_emb] + enc_outs)

    print("KERNEL_OK")
</pallas_src>

<mosaic_0001>
module attributes {stable_mosaic.version = 11 : i64} {
  func.func @kernel(%arg0: i32, %arg1: memref<1x4x16xf32, #tpu.memory_space<vmem>>, %arg2: memref<28x8xbf16, #tpu.memory_space<vmem>>, %arg3: memref<1x8xf32, #tpu.memory_space<vmem>>, %arg4: memref<1x8xf32, #tpu.memory_space<vmem>>, %arg5: memref<1x8xf32, #tpu.memory_space<vmem>>, %arg6: memref<1x8x16xf32, #tpu.memory_space<vmem>>) attributes {dimension_semantics = [#tpu.dimension_semantics<parallel>], iteration_bounds = array<i64: 2>, scalar_prefetch = 0 : i64, scratch_operands = 0 : i64, tpu.core_type = #tpu.core_type<tc>, window_params = [{transform_indices = @transform_0, window_bounds = array<i64: 1, 4, 16>}, {pipeline_mode = #tpu.pipeline_mode<synchronous>, transform_indices = @transform_1, window_bounds = array<i64: 28, 8>}, {pipeline_mode = #tpu.pipeline_mode<synchronous>, transform_indices = @transform_2, window_bounds = array<i64: 1, 8>}, {pipeline_mode = #tpu.pipeline_mode<synchronous>, transform_indices = @transform_3, window_bounds = array<i64: 1, 8>}, {pipeline_mode = #tpu.pipeline_mode<synchronous>, transform_indices = @transform_4, window_bounds = array<i64: 1, 8>}, {transform_indices = @transform_5, window_bounds = array<i64: 1, 8, 16>}]} {
    %c0 = arith.constant 0 : index
    %c0_0 = arith.constant 0 : index
    %c0_1 = arith.constant 0 : index
    %0 = vector.load %arg1[%c0, %c0_0, %c0_1] : memref<1x4x16xf32, #tpu.memory_space<vmem>>, vector<1x4x16xf32>
    %1 = vector.shape_cast %0 : vector<1x4x16xf32> to vector<4x16xf32>
    %2 = tpu.transpose %1, [1, 0] : vector<4x16xf32> -> vector<16x4xf32>
    %c0_2 = arith.constant 0 : index
    %c0_3 = arith.constant 0 : index
    %3 = vector.load %arg2[%c0_2, %c0_3] : memref<28x8xbf16, #tpu.memory_space<vmem>>, vector<28x8xbf16>
    %c0_4 = arith.constant 0 : index
    %c0_5 = arith.constant 0 : index
    %4 = vector.load %arg3[%c0_4, %c0_5] : memref<1x8xf32, #tpu.memory_space<vmem>>, vector<1x8xf32>
    %cst = arith.constant 0.000000e+00 : f32
    %5 = vector.broadcast %cst : f32 to vector<3x4xf32>
    %6 = tpu.concatenate %5, %2, %5 in 0 : vector<3x4xf32>, vector<16x4xf32>, vector<3x4xf32> -> vector<22x4xf32>
    %7 = vector.extract_strided_slice %6 {offsets = [0, 0], sizes = [16, 4], strides = [1, 1]} : vector<22x4xf32> to vector<16x4xf32>
    %8 = vector.extract_strided_slice %6 {offsets = [1, 0], sizes = [16, 4], strides = [1, 1]} : vector<22x4xf32> to vector<16x4xf32>
    %9 = vector.extract_strided_slice %6 {offsets = [2, 0], sizes = [16, 4], strides = [1, 1]} : vector<22x4xf32> to vector<16x4xf32>
    %10 = vector.extract_strided_slice %6 {offsets = [3, 0], sizes = [16, 4], strides = [1, 1]} : vector<22x4xf32> to vector<16x4xf32>
    %11 = vector.extract_strided_slice %6 {offsets = [4, 0], sizes = [16, 4], strides = [1, 1]} : vector<22x4xf32> to vector<16x4xf32>
    %12 = vector.extract_strided_slice %6 {offsets = [5, 0], sizes = [16, 4], strides = [1, 1]} : vector<22x4xf32> to vector<16x4xf32>
    %13 = vector.extract_strided_slice %6 {offsets = [6, 0], sizes = [16, 4], strides = [1, 1]} : vector<22x4xf32> to vector<16x4xf32>
    %14 = tpu.concatenate %7, %8, %9, %10, %11, %12, %13 in 1 : vector<16x4xf32>, vector<16x4xf32>, vector<16x4xf32>, vector<16x4xf32>, vector<16x4xf32>, vector<16x4xf32>, vector<16x4xf32> -> vector<16x28xf32>
    %15 = arith.truncf %14 : vector<16x28xf32> to vector<16x28xbf16>
    %cst_6 = arith.constant dense<0.000000e+00> : vector<16x8xf32>
    %16 = tpu.matmul %15, %3, %cst_6 {dimension_numbers = #tpu.dot_dimension_numbers<[1], [0], [0], [1], [0, 0, 1, 1], [], []>} : vector<16x28xbf16>, vector<28x8xbf16>, vector<16x8xf32> -> vector<16x8xf32>
    %17 = vector.broadcast %4 : vector<1x8xf32> to vector<16x8xf32>
    %18 = arith.addf %16, %17 : vector<16x8xf32>
    %19 = arith.mulf %18, %18 : vector<16x8xf32>
    %20 = arith.mulf %18, %19 : vector<16x8xf32>
    %cst_7 = arith.constant 4.471500e-02 : f32
    %21 = vector.broadcast %cst_7 : f32 to vector<16x8xf32>
    %22 = arith.mulf %21, %20 : vector<16x8xf32>
    %23 = arith.addf %18, %22 : vector<16x8xf32>
    %cst_8 = arith.constant 0.797884583 : f32
    %24 = vector.broadcast %cst_8 : f32 to vector<16x8xf32>
    %25 = arith.mulf %24, %23 : vector<16x8xf32>
    %26 = math.tanh %25 : vector<16x8xf32>
    %cst_9 = arith.constant 1.000000e+00 : f32
    %27 = vector.broadcast %cst_9 : f32 to vector<16x8xf32>
    %28 = arith.addf %27, %26 : vector<16x8xf32>
    %cst_10 = arith.constant 5.000000e-01 : f32
    %29 = vector.broadcast %cst_10 : f32 to vector<16x8xf32>
    %30 = arith.mulf %29, %28 : vector<16x8xf32>
    %31 = arith.mulf %18, %30 : vector<16x8xf32>
    %c0_11 = arith.constant 0 : index
    %c0_12 = arith.constant 0 : index
    %32 = vector.load %arg4[%c0_11, %c0_12] : memref<1x8xf32, #tpu.memory_space<vmem>>, vector<1x8xf32>
    %c0_13 = arith.constant 0 : index
    %c0_14 = arith.constant 0 : index
    %33 = vector.load %arg5[%c0_13, %c0_14] : memref<1x8xf32, #tpu.memory_space<vmem>>, vector<1x8xf32>
    %cst_15 = arith.constant dense<0.000000e+00> : vector<16xf32>
    %34 = vector.multi_reduction <add>, %31, %cst_15 [1] : vector<16x8xf32> to vector<16xf32>
    %35 = vector.shape_cast %34 : vector<16xf32> to vector<16x1xf32>
    %cst_16 = arith.constant 8.000000e+00 : f32
    %36 = vector.broadcast %cst_16 : f32 to vector<16x1xf32>
    %37 = arith.divf %35, %36 : vector<16x1xf32>
    %38 = vector.broadcast %37 : vector<16x1xf32> to vector<16x8xf32>
    %39 = arith.subf %31, %38 : vector<16x8xf32>
    %40 = arith.mulf %39, %39 : vector<16x8xf32>
    %cst_17 = arith.constant dense<0.000000e+00> : vector<16xf32>
    %41 = vector.multi_reduction <add>, %40, %cst_17 [1] : vector<16x8xf32> to vector<16xf32>
    %42 = vector.shape_cast %41 : vector<16xf32> to vector<16x1xf32>
    %cst_18 = arith.constant 8.000000e+00 : f32
    %43 = vector.broadcast %cst_18 : f32 to vector<16x1xf32>
    %44 = arith.divf %42, %43 : vector<16x1xf32>
    %45 = vector.broadcast %37 : vector<16x1xf32> to vector<16x8xf32>
    %46 = arith.subf %31, %45 : vector<16x8xf32>
    %cst_19 = arith.constant 9.99999974E-6 : f32
    %47 = vector.broadcast %cst_19 : f32 to vector<16x1xf32>
    %48 = arith.addf %44, %47 : vector<16x1xf32>
    %49 = math.rsqrt %48 : vector<16x1xf32>
    %50 = vector.broadcast %49 : vector<16x1xf32> to vector<16x8xf32>
    %51 = arith.mulf %46, %50 : vector<16x8xf32>
    %52 = vector.broadcast %32 : vector<1x8xf32> to vector<16x8xf32>
    %53 = arith.mulf %51, %52 : vector<16x8xf32>
    %54 = vector.broadcast %33 : vector<1x8xf32> to vector<16x8xf32>
    %55 = arith.addf %53, %54 : vector<16x8xf32>
    %56 = tpu.transpose %55, [1, 0] : vector<16x8xf32> -> vector<8x16xf32>
    %c0_20 = arith.constant 0 : index
    %c0_21 = arith.constant 0 : index
    %c0_22 = arith.constant 0 : index
    %57 = vector.load %arg6[%c0_20, %c0_21, %c0_22] : memref<1x8x16xf32, #tpu.memory_space<vmem>>, vector<1x8x16xf32>
    %58 = vector.shape_cast %57 : vector<1x8x16xf32> to vector<8x16xf32>
    %59 = vector.shape_cast %56 : vector<8x16xf32> to vector<1x8x16xf32>
    tpu.vector_store %arg6[%c0_20, %c0_21, %c0_22], %59 {strides = array<i32>} : memref<1x8x16xf32, #tpu.memory_space<vmem>>, vector<1x8x16xf32>,
    return
  }
  func.func @transform_0(%arg0: i32) -> (i32, i32, i32) {
    %c0_i32 = arith.constant 0 : i32
    %c0_i32_0 = arith.constant 0 : i32
    %c0_i32_1 = arith.constant 0 : i32
    return %arg0, %c0_i32, %c0_i32_0 : i32, i32, i32
  }
  func.func @transform_1(%arg0: i32) -> (i32, i32) {
    %c0_i32 = arith.constant 0 : i32
    %c0_i32_0 = arith.constant 0 : i32
    %c0_i32_1 = arith.constant 0 : i32
    return %c0_i32, %c0_i32_0 : i32, i32
  }
  func.func @transform_2(%arg0: i32) -> (i32, i32) {
    %c0_i32 = arith.constant 0 : i32
    %c0_i32_0 = arith.constant 0 : i32
    %c0_i32_1 = arith.constant 0 : i32
    return %c0_i32, %c0_i32_0 : i32, i32
  }
  func.func @transform_3(%arg0: i32) -> (i32, i32) {
    %c0_i32 = arith.constant 0 : i32
    %c0_i32_0 = arith.constant 0 : i32
    %c0_i32_1 = arith.constant 0 : i32
    return %c0_i32, %c0_i32_0 : i32, i32
  }
  func.func @transform_4(%arg0: i32) -> (i32, i32) {
    %c0_i32 = arith.constant 0 : i32
    %c0_i32_0 = arith.constant 0 : i32
    %c0_i32_1 = arith.constant 0 : i32
    return %c0_i32, %c0_i32_0 : i32, i32
  }
  func.func @transform_5(%arg0: i32) -> (i32, i32, i32) {
    %c0_i32 = arith.constant 0 : i32
    %c0_i32_0 = arith.constant 0 : i32
    %c0_i32_1 = arith.constant 0 : i32
    return %arg0, %c0_i32, %c0_i32_0 : i32, i32, i32
  }
}

module attributes {stable_mosaic.version = 11 : i64} {
  func.func @kernel(%arg0: i32, %arg1: memref<1x8x16xf32, #tpu.memory_space<vmem>>, %arg2: memref<1x1x8xf32, #tpu.memory_space<vmem>>, %arg3: memref<1x1x8xf32, #tpu.memory_space<vmem>>, %arg4: memref<2x24x8xbf16, #tpu.memory_space<vmem>>, %arg5: memref<2x1x8xf32, #tpu.memory_space<vmem>>, %arg6: memref<2x1x8xf32, #tpu.memory_space<vmem>>, %arg7: memref<2x1x8xf32, #tpu.memory_space<vmem>>, %arg8: memref<24x8xbf16, #tpu.memory_space<vmem>>, %arg9: memref<1x8xf32, #tpu.memory_space<vmem>>, %arg10: memref<1x8xf32, #tpu.memory_space<vmem>>, %arg11: memref<1x8xf32, #tpu.memory_space<vmem>>, %arg12: memref<8x8xf32, #tpu.memory_space<vmem>>, %arg13: memref<2x1x8xf32, #tpu.memory_space<vmem>>, %arg14: memref<2x1x8xf32, #tpu.memory_space<vmem>>, %arg15: memref<2x56x8xbf16, #tpu.memory_space<vmem>>, %arg16: memref<2x1x8xf32, #tpu.memory_space<vmem>>, %arg17: memref<2x8x8xbf16, #tpu.memory_space<vmem>>, %arg18: memref<2x1x8xf32, #tpu.memory_space<vmem>>, %arg19: memref<8x8xbf16, #tpu.memory_space<vmem>>, %arg20: memref<1x8xf32, #tpu.memory_space<vmem>>, %arg21: memref<1x8xf32, #tpu.memory_space<vmem>>, %arg22: memref<1x8xf32, #tpu.memory_space<vmem>>, %arg23: memref<1x8x8xf32, #tpu.memory_space<vmem>>, %arg24: memref<16x8xf32, #tpu.memory_space<vmem>>) attributes {dimension_semantics = [#tpu.dimension_semantics<parallel>], iteration_bounds = array<i64: 2>, scalar_prefetch = 0 : i64, scratch_operands = 1 : i64, tpu.core_type = #tpu.core_type<tc>, window_params = [{transform_indices = @transform_0, window_bounds = array<i64: 1, 8, 16>}, {transform_indices = @transform_1, window_bounds = array<i64: 1, 1, 8>}, {transform_indices = @transform_2, window_bounds = array<i64: 1, 1, 8>}, {pipeline_mode = #tpu.pipeline_mode<synchronous>, transform_indices = @transform_3, window_bounds = array<i64: 2, 24, 8>}, {pipeline_mode = #tpu.pipeline_mode<synchronous>, transform_indices = @transform_4, window_bounds = array<i64: 2, 1, 8>}, {pipeline_mode = #tpu.pipeline_mode<synchronous>, transform_indices = @transform_5, window_bounds = array<i64: 2, 1, 8>}, {pipeline_mode = #tpu.pipeline_mode<synchronous>, transform_indices = @transform_6, window_bounds = array<i64: 2, 1, 8>}, {pipeline_mode = #tpu.pipeline_mode<synchronous>, transform_indices = @transform_7, window_bounds = array<i64: 24, 8>}, {pipeline_mode = #tpu.pipeline_mode<synchronous>, transform_indices = @transform_8, window_bounds = array<i64: 1, 8>}, {pipeline_mode = #tpu.pipeline_mode<synchronous>, transform_indices = @transform_9, window_bounds = array<i64: 1, 8>}, {pipeline_mode = #tpu.pipeline_mode<synchronous>, transform_indices = @transform_10, window_bounds = array<i64: 1, 8>}, {pipeline_mode = #tpu.pipeline_mode<synchronous>, transform_indices = @transform_11, window_bounds = array<i64: 8, 8>}, {pipeline_mode = #tpu.pipeline_mode<synchronous>, transform_indices = @transform_12, window_bounds = array<i64: 2, 1, 8>}, {pipeline_mode = #tpu.pipeline_mode<synchronous>, transform_indices = @transform_13, window_bounds = array<i64: 2, 1, 8>}, {pipeline_mode = #tpu.pipeline_mode<synchronous>, transform_indices = @transform_14, window_bounds = array<i64: 2, 56, 8>}, {pipeline_mode = #tpu.pipeline_mode<synchronous>, transform_indices = @transform_15, window_bounds = array<i64: 2, 1, 8>}, {pipeline_mode = #tpu.pipeline_mode<synchronous>, transform_indices = @transform_16, window_bounds = array<i64: 2, 8, 8>}, {pipeline_mode = #tpu.pipeline_mode<synchronous>, transform_indices = @transform_17, window_bounds = array<i64: 2, 1, 8>}, {pipeline_mode = #tpu.pipeline_mode<synchronous>, transform_indices = @transform_18, window_bounds = array<i64: 8, 8>}, {pipeline_mode = #tpu.pipeline_mode<synchronous>, transform_indices = @transform_19, window_bounds = array<i64: 1, 8>}, {pipeline_mode = #tpu.pipeline_mode<synchronous>, transform_indices = @transform_20, window_bounds = array<i64: 1, 8>}, {pipeline_mode = #tpu.pipeline_mode<synchronous>, transform_indices = @transform_21, window_bounds = array<i64: 1, 8>}, {transform_indices = @transform_22, window_bounds = array<i64: 1, 8, 8>}]} {
    %c0 = arith.constant 0 : index
    %c0_0 = arith.constant 0 : index
    %c0_1 = arith.constant 0 : index
    %0 = vector.load %arg1[%c0, %c0_0, %c0_1] : memref<1x8x16xf32, #tpu.memory_space<vmem>>, vector<1x8x16xf32>
    %1 = vector.shape_cast %0 : vector<1x8x16xf32> to vector<8x16xf32>
    %2 = tpu.transpose %1, [1, 0] : vector<8x16xf32> -> vector<16x8xf32>
    %c0_2 = arith.constant 0 : index
    %c0_3 = arith.constant 0 : index
    %c0_4 = arith.constant 0 : index
    %3 = vector.load %arg4[%c0_2, %c0_3, %c0_4] : memref<2x24x8xbf16, #tpu.memory_space<vmem>>, vector<1x24x8xbf16>
    %4 = vector.shape_cast %3 : vector<1x24x8xbf16> to vector<24x8xbf16>
    %c0_5 = arith.constant 0 : index
    %c0_6 = arith.constant 0 : index
    %c0_7 = arith.constant 0 : index
    %5 = vector.load %arg5[%c0_5, %c0_6, %c0_7] : memref<2x1x8xf32, #tpu.memory_space<vmem>>, vector<1x1x8xf32>
    %6 = vector.shape_cast %5 : vector<1x1x8xf32> to vector<1x8xf32>
    %cst = arith.constant 0.000000e+00 : f32
    %7 = vector.broadcast %cst : f32 to vector<1x8xf32>
    %8 = tpu.concatenate %7, %2, %7 in 0 : vector<1x8xf32>, vector<16x8xf32>, vector<1x8xf32> -> vector<18x8xf32>
    %9 = vector.extract_strided_slice %8 {offsets = [0, 0], sizes = [16, 8], strides = [1, 1]} : vector<18x8xf32> to vector<16x8xf32>
    %10 = vector.extract_strided_slice %8 {offsets = [1, 0], sizes = [16, 8], strides = [1, 1]} : vector<18x8xf32> to vector<16x8xf32>
    %11 = vector.extract_strided_slice %8 {offsets = [2, 0], sizes = [16, 8], strides = [1, 1]} : vector<18x8xf32> to vector<16x8xf32>
    %12 = tpu.concatenate %9, %10, %11 in 1 : vector<16x8xf32>, vector<16x8xf32>, vector<16x8xf32> -> vector<16x24xf32>
    %13 = arith.truncf %12 : vector<16x24xf32> to vector<16x24xbf16>
    %cst_8 = arith.constant dense<0.000000e+00> : vector<16x8xf32>
    %14 = tpu.matmul %13, %4, %cst_8 {dimension_numbers = #tpu.dot_dimension_numbers<[1], [0], [0], [1], [0, 0, 1, 1], [], []>} : vector<16x24xbf16>, vector<24x8xbf16>, vector<16x8xf32> -> vector<16x8xf32>
    %15 = vector.broadcast %6 : vector<1x8xf32> to vector<16x8xf32>
    %16 = arith.addf %14, %15 : vector<16x8xf32>
    %17 = arith.mulf %16, %16 : vector<16x8xf32>
    %18 = arith.mulf %16, %17 : vector<16x8xf32>
    %cst_9 = arith.constant 4.471500e-02 : f32
    %19 = vector.broadcast %cst_9 : f32 to vector<16x8xf32>
    %20 = arith.mulf %19, %18 : vector<16x8xf32>
    %21 = arith.addf %16, %20 : vector<16x8xf32>
    %cst_10 = arith.constant 0.797884583 : f32
    %22 = vector.broadcast %cst_10 : f32 to vector<16x8xf32>
    %23 = arith.mulf %22, %21 : vector<16x8xf32>
    %24 = math.tanh %23 : vector<16x8xf32>
    %cst_11 = arith.constant 1.000000e+00 : f32
    %25 = vector.broadcast %cst_11 : f32 to vector<16x8xf32>
    %26 = arith.addf %25, %24 : vector<16x8xf32>
    %cst_12 = arith.constant 5.000000e-01 : f32
    %27 = vector.broadcast %cst_12 : f32 to vector<16x8xf32>
    %28 = arith.mulf %27, %26 : vector<16x8xf32>
    %29 = arith.mulf %16, %28 : vector<16x8xf32>
    %c0_13 = arith.constant 0 : index
    %c0_14 = arith.constant 0 : index
    %c0_15 = arith.constant 0 : index
    %30 = vector.load %arg6[%c0_13, %c0_14, %c0_15] : memref<2x1x8xf32, #tpu.memory_space<vmem>>, vector<1x1x8xf32>
    %31 = vector.shape_cast %30 : vector<1x1x8xf32> to vector<1x8xf32>
    %c0_16 = arith.constant 0 : index
    %c0_17 = arith.constant 0 : index
    %c0_18 = arith.constant 0 : index
    %32 = vector.load %arg7[%c0_16, %c0_17, %c0_18] : memref<2x1x8xf32, #tpu.memory_space<vmem>>, vector<1x1x8xf32>
    %33 = vector.shape_cast %32 : vector<1x1x8xf32> to vector<1x8xf32>
    %cst_19 = arith.constant dense<0.000000e+00> : vector<16xf32>
    %34 = vector.multi_reduction <add>, %29, %cst_19 [1] : vector<16x8xf32> to vector<16xf32>
    %35 = vector.shape_cast %34 : vector<16xf32> to vector<16x1xf32>
    %cst_20 = arith.constant 8.000000e+00 : f32
    %36 = vector.broadcast %cst_20 : f32 to vector<16x1xf32>
    %37 = arith.divf %35, %36 : vector<16x1xf32>
    %38 = vector.broadcast %37 : vector<16x1xf32> to vector<16x8xf32>
    %39 = arith.subf %29, %38 : vector<16x8xf32>
    %40 = arith.mulf %39, %39 : vector<16x8xf32>
    %cst_21 = arith.constant dense<0.000000e+00> : vector<16xf32>
    %41 = vector.multi_reduction <add>, %40, %cst_21 [1] : vector<16x8xf32> to vector<16xf32>
    %42 = vector.shape_cast %41 : vector<16xf32> to vector<16x1xf32>
    %cst_22 = arith.constant 8.000000e+00 : f32
    %43 = vector.broadcast %cst_22 : f32 to vector<16x1xf32>
    %44 = arith.divf %42, %43 : vector<16x1xf32>
    %45 = vector.broadcast %37 : vector<16x1xf32> to vector<16x8xf32>
    %46 = arith.subf %29, %45 : vector<16x8xf32>
    %cst_23 = arith.constant 9.99999974E-6 : f32
    %47 = vector.broadcast %cst_23 : f32 to vector<16x1xf32>
    %48 = arith.addf %44, %47 : vector<16x1xf32>
    %49 = math.rsqrt %48 : vector<16x1xf32>
    %50 = vector.broadcast %49 : vector<16x1xf32> to vector<16x8xf32>
    %51 = arith.mulf %46, %50 : vector<16x8xf32>
    %52 = vector.broadcast %31 : vector<1x8xf32> to vector<16x8xf32>
    %53 = arith.mulf %51, %52 : vector<16x8xf32>
    %54 = vector.broadcast %33 : vector<1x8xf32> to vector<16x8xf32>
    %55 = arith.addf %53, %54 : vector<16x8xf32>
    %c1 = arith.constant 1 : index
    %c0_24 = arith.constant 0 : index
    %c0_25 = arith.constant 0 : index
    %56 = vector.load %arg4[%c1, %c0_24, %c0_25] : memref<2x24x8xbf16, #tpu.memory_space<vmem>>, vector<1x24x8xbf16>
    %57 = vector.shape_cast %56 : vector<1x24x8xbf16> to vector<24x8xbf16>
    %c1_26 = arith.constant 1 : index
    %c0_27 = arith.constant 0 : index
    %c0_28 = arith.constant 0 : index
    %58 = vector.load %arg5[%c1_26, %c0_27, %c0_28] : memref<2x1x8xf32, #tpu.memory_space<vmem>>, vector<1x1x8xf32>
    %59 = vector.shape_cast %58 : vector<1x1x8xf32> to vector<1x8xf32>
    %cst_29 = arith.constant 0.000000e+00 : f32
    %60 = vector.broadcast %cst_29 : f32 to vector<1x8xf32>
    %61 = tpu.concatenate %60, %55, %60 in 0 : vector<1x8xf32>, vector<16x8xf32>, vector<1x8xf32> -> vector<18x8xf32>
    %62 = vector.extract_strided_slice %61 {offsets = [0, 0], sizes = [16, 8], strides = [1, 1]} : vector<18x8xf32> to vector<16x8xf32>
    %63 = vector.extract_strided_slice %61 {offsets = [1, 0], sizes = [16, 8], strides = [1, 1]} : vector<18x8xf32> to vector<16x8xf32>
    %64 = vector.extract_strided_slice %61 {offsets = [2, 0], sizes = [16, 8], strides = [1, 1]} : vector<18x8xf32> to vector<16x8xf32>
    %65 = tpu.concatenate %62, %63, %64 in 1 : vector<16x8xf32>, vector<16x8xf32>, vector<16x8xf32> -> vector<16x24xf32>
    %66 = arith.truncf %65 : vector<16x24xf32> to vector<16x24xbf16>
    %cst_30 = arith.constant dense<0.000000e+00> : vector<16x8xf32>
    %67 = tpu.matmul %66, %57, %cst_30 {dimension_numbers = #tpu.dot_dimension_numbers<[1], [0], [0], [1], [0, 0, 1, 1], [], []>} : vector<16x24xbf16>, vector<24x8xbf16>, vector<16x8xf32> -> vector<16x8xf32>
    %68 = vector.broadcast %59 : vector<1x8xf32> to vector<16x8xf32>
    %69 = arith.addf %67, %68 : vector<16x8xf32>
    %70 = arith.mulf %69, %69 : vector<16x8xf32>
    %71 = arith.mulf %69, %70 : vector<16x8xf32>
    %cst_31 = arith.constant 4.471500e-02 : f32
    %72 = vector.broadcast %cst_31 : f32 to vector<16x8xf32>
    %73 = arith.mulf %72, %71 : vector<16x8xf32>
    %74 = arith.addf %69, %73 : vector<16x8xf32>
    %cst_32 = arith.constant 0.797884583 : f32
    %75 = vector.broadcast %cst_32 : f32 to vector<16x8xf32>
    %76 = arith.mulf %75, %74 : vector<16x8xf32>
    %77 = math.tanh %76 : vector<16x8xf32>
    %cst_33 = arith.constant 1.000000e+00 : f32
    %78 = vector.broadcast %cst_33 : f32 to vector<16x8xf32>
    %79 = arith.addf %78, %77 : vector<16x8xf32>
    %cst_34 = arith.constant 5.000000e-01 : f32
    %80 = vector.broadcast %cst_34 : f32 to vector<16x8xf32>
    %81 = arith.mulf %80, %79 : vector<16x8xf32>
    %82 = arith.mulf %69, %81 : vector<16x8xf32>
    %c1_35 = arith.constant 1 : index
    %c0_36 = arith.constant 0 : index
    %c0_37 = arith.constant 0 : index
    %83 = vector.load %arg6[%c1_35, %c0_36, %c0_37] : memref<2x1x8xf32, #tpu.memory_space<vmem>>, vector<1x1x8xf32>
    %84 = vector.shape_cast %83 : vector<1x1x8xf32> to vector<1x8xf32>
    %c1_38 = arith.constant 1 : index
    %c0_39 = arith.constant 0 : index
    %c0_40 = arith.constant 0 : index
    %85 = vector.load %arg7[%c1_38, %c0_39, %c0_40] : memref<2x1x8xf32, #tpu.memory_space<vmem>>, vector<1x1x8xf32>
    %86 = vector.shape_cast %85 : vector<1x1x8xf32> to vector<1x8xf32>
    %cst_41 = arith.constant dense<0.000000e+00> : vector<16xf32>
    %87 = vector.multi_reduction <add>, %82, %cst_41 [1] : vector<16x8xf32> to vector<16xf32>
    %88 = vector.shape_cast %87 : vector<16xf32> to vector<16x1xf32>
    %cst_42 = arith.constant 8.000000e+00 : f32
    %89 = vector.broadcast %cst_42 : f32 to vector<16x1xf32>
    %90 = arith.divf %88, %89 : vector<16x1xf32>
    %91 = vector.broadcast %90 : vector<16x1xf32> to vector<16x8xf32>
    %92 = arith.subf %82, %91 : vector<16x8xf32>
    %93 = arith.mulf %92, %92 : vector<16x8xf32>
    %cst_43 = arith.constant dense<0.000000e+00> : vector<16xf32>
    %94 = vector.multi_reduction <add>, %93, %cst_43 [1] : vector<16x8xf32> to vector<16xf32>
    %95 = vector.shape_cast %94 : vector<16xf32> to vector<16x1xf32>
    %cst_44 = arith.constant 8.000000e+00 : f32
    %96 = vector.broadcast %cst_44 : f32 to vector<16x1xf32>
    %97 = arith.divf %95, %96 : vector<16x1xf32>
    %98 = vector.broadcast %90 : vector<16x1xf32> to vector<16x8xf32>
    %99 = arith.subf %82, %98 : vector<16x8xf32>
    %cst_45 = arith.constant 9.99999974E-6 : f32
    %100 = vector.broadcast %cst_45 : f32 to vector<16x1xf32>
    %101 = arith.addf %97, %100 : vector<16x1xf32>
    %102 = math.rsqrt %101 : vector<16x1xf32>
    %103 = vector.broadcast %102 : vector<16x1xf32> to vector<16x8xf32>
    %104 = arith.mulf %99, %103 : vector<16x8xf32>
    %105 = vector.broadcast %84 : vector<1x8xf32> to vector<16x8xf32>
    %106 = arith.mulf %104, %105 : vector<16x8xf32>
    %107 = vector.broadcast %86 : vector<1x8xf32> to vector<16x8xf32>
    %108 = arith.addf %106, %107 : vector<16x8xf32>
    %c0_46 = arith.constant 0 : index
    %c0_47 = arith.constant 0 : index
    %109 = vector.load %arg8[%c0_46, %c0_47] : memref<24x8xbf16, #tpu.memory_space<vmem>>, vector<24x8xbf16>
    %c0_48 = arith.constant 0 : index
    %c0_49 = arith.constant 0 : index
    %110 = vector.load %arg9[%c0_48, %c0_49] : memref<1x8xf32, #tpu.memory_space<vmem>>, vector<1x8xf32>
    %cst_50 = arith.constant 0.000000e+00 : f32
    %111 = vector.broadcast %cst_50 : f32 to vector<1x8xf32>
    %112 = tpu.concatenate %111, %108, %111 in 0 : vector<1x8xf32>, vector<16x8xf32>, vector<1x8xf32> -> vector<18x8xf32>
    %113 = vector.extract_strided_slice %112 {offsets = [0, 0], sizes = [16, 8], strides = [1, 1]} : vector<18x8xf32> to vector<16x8xf32>
    %114 = vector.extract_strided_slice %112 {offsets = [1, 0], sizes = [16, 8], strides = [1, 1]} : vector<18x8xf32> to vector<16x8xf32>
    %115 = vector.extract_strided_slice %112 {offsets = [2, 0], sizes = [16, 8], strides = [1, 1]} : vector<18x8xf32> to vector<16x8xf32>
    %116 = tpu.concatenate %113, %114, %115 in 1 : vector<16x8xf32>, vector<16x8xf32>, vector<16x8xf32> -> vector<16x24xf32>
    %117 = arith.truncf %116 : vector<16x24xf32> to vector<16x24xbf16>
    %cst_51 = arith.constant dense<0.000000e+00> : vector<16x8xf32>
    %118 = tpu.matmul %117, %109, %cst_51 {dimension_numbers = #tpu.dot_dimension_numbers<[1], [0], [0], [1], [0, 0, 1, 1], [], []>} : vector<16x24xbf16>, vector<24x8xbf16>, vector<16x8xf32> -> vector<16x8xf32>
    %119 = vector.broadcast %110 : vector<1x8xf32> to vector<16x8xf32>
    %120 = arith.addf %118, %119 : vector<16x8xf32>
    %c0_52 = arith.constant 0 : index
    %c0_53 = arith.constant 0 : index
    %121 = vector.load %arg24[%c0_52, %c0_53] : memref<16x8xf32, #tpu.memory_space<vmem>>, vector<16x8xf32>
    tpu.vector_store %arg24[%c0_52, %c0_53], %120 {strides = array<i32>} : memref<16x8xf32, #tpu.memory_space<vmem>>, vector<16x8xf32>,
    %c0_54 = arith.constant 0 : index
    %c0_55 = arith.constant 0 : index
    %122 = tpu.strided_load %arg24[%c0_54, %c0_55] {strides = array<i32: 2, 1>} : memref<16x8xf32, #tpu.memory_space<vmem>>, vector<8x8xf32>
    %c0_56 = arith.constant 0 : index
    %c0_57 = arith.constant 0 : index
    %123 = vector.load %arg10[%c0_56, %c0_57] : memref<1x8xf32, #tpu.memory_space<vmem>>, vector<1x8xf32>
    %c0_58 = arith.constant 0 : index
    %c0_59 = arith.constant 0 : index
    %124 = vector.load %arg11[%c0_58, %c0_59] : memref<1x8xf32, #tpu.memory_space<vmem>>, vector<1x8xf32>
    %cst_60 = arith.constant dense<0.000000e+00> : vector<8xf32>
    %125 = vector.multi_reduction <add>, %122, %cst_60 [1] : vector<8x8xf32> to vector<8xf32>
    %126 = vector.shape_cast %125 : vector<8xf32> to vector<8x1xf32>
    %cst_61 = arith.constant 8.000000e+00 : f32
    %127 = vector.broadcast %cst_61 : f32 to vector<8x1xf32>
    %128 = arith.divf %126, %127 : vector<8x1xf32>
    %129 = vector.broadcast %128 : vector<8x1xf32> to vector<8x8xf32>
    %130 = arith.subf %122, %129 : vector<8x8xf32>
    %131 = arith.mulf %130, %130 : vector<8x8xf32>
    %cst_62 = arith.constant dense<0.000000e+00> : vector<8xf32>
    %132 = vector.multi_reduction <add>, %131, %cst_62 [1] : vector<8x8xf32> to vector<8xf32>
    %133 = vector.shape_cast %132 : vector<8xf32> to vector<8x1xf32>
    %cst_63 = arith.constant 8.000000e+00 : f32
    %134 = vector.broadcast %cst_63 : f32 to vector<8x1xf32>
    %135 = arith.divf %133, %134 : vector<8x1xf32>
    %136 = vector.broadcast %128 : vector<8x1xf32> to vector<8x8xf32>
    %137 = arith.subf %122, %136 : vector<8x8xf32>
    %cst_64 = arith.constant 9.99999974E-6 : f32
    %138 = vector.broadcast %cst_64 : f32 to vector<8x1xf32>
    %139 = arith.addf %135, %138 : vector<8x1xf32>
    %140 = math.rsqrt %139 : vector<8x1xf32>
    %141 = vector.broadcast %140 : vector<8x1xf32> to vector<8x8xf32>
    %142 = arith.mulf %137, %141 : vector<8x8xf32>
    %143 = vector.broadcast %123 : vector<1x8xf32> to vector<8x8xf32>
    %144 = arith.mulf %142, %143 : vector<8x8xf32>
    %145 = vector.broadcast %124 : vector<1x8xf32> to vector<8x8xf32>
    %146 = arith.addf %144, %145 : vector<8x8xf32>
    %147 = arith.mulf %146, %146 : vector<8x8xf32>
    %148 = arith.mulf %146, %147 : vector<8x8xf32>
    %cst_65 = arith.constant 4.471500e-02 : f32
    %149 = vector.broadcast %cst_65 : f32 to vector<8x8xf32>
    %150 = arith.mulf %149, %148 : vector<8x8xf32>
    %151 = arith.addf %146, %150 : vector<8x8xf32>
    %cst_66 = arith.constant 0.797884583 : f32
    %152 = vector.broadcast %cst_66 : f32 to vector<8x8xf32>
    %153 = arith.mulf %152, %151 : vector<8x8xf32>
    %154 = math.tanh %153 : vector<8x8xf32>
    %cst_67 = arith.constant 1.000000e+00 : f32
    %155 = vector.broadcast %cst_67 : f32 to vector<8x8xf32>
    %156 = arith.addf %155, %154 : vector<8x8xf32>
    %cst_68 = arith.constant 5.000000e-01 : f32
    %157 = vector.broadcast %cst_68 : f32 to vector<8x8xf32>
    %158 = arith.mulf %157, %156 : vector<8x8xf32>
    %159 = arith.mulf %146, %158 : vector<8x8xf32>
    %c0_69 = arith.constant 0 : index
    %c0_70 = arith.constant 0 : index
    %160 = vector.load %arg12[%c0_69, %c0_70] : memref<8x8xf32, #tpu.memory_space<vmem>>, vector<8x8xf32>
    %161 = arith.addf %159, %160 : vector<8x8xf32>
    %c0_71 = arith.constant 0 : index
    %c0_72 = arith.constant 0 : index
    %c0_73 = arith.constant 0 : index
    %162 = vector.load %arg13[%c0_71, %c0_72, %c0_73] : memref<2x1x8xf32, #tpu.memory_space<vmem>>, vector<1x1x8xf32>
    %163 = vector.shape_cast %162 : vector<1x1x8xf32> to vector<1x8xf32>
    %c0_74 = arith.constant 0 : index
    %c0_75 = arith.constant 0 : index
    %c0_76 = arith.constant 0 : index
    %164 = vector.load %arg14[%c0_74, %c0_75, %c0_76] : memref<2x1x8xf32, #tpu.memory_space<vmem>>, vector<1x1x8xf32>
    %165 = vector.shape_cast %164 : vector<1x1x8xf32> to vector<1x8xf32>
    %cst_77 = arith.constant dense<0.000000e+00> : vector<8xf32>
    %166 = vector.multi_reduction <add>, %161, %cst_77 [1] : vector<8x8xf32> to vector<8xf32>
    %167 = vector.shape_cast %166 : vector<8xf32> to vector<8x1xf32>
    %cst_78 = arith.constant 8.000000e+00 : f32
    %168 = vector.broadcast %cst_78 : f32 to vector<8x1xf32>
    %169 = arith.divf %167, %168 : vector<8x1xf32>
    %170 = vector.broadcast %169 : vector<8x1xf32> to vector<8x8xf32>
    %171 = arith.subf %161, %170 : vector<8x8xf32>
    %172 = arith.mulf %171, %171 : vector<8x8xf32>
    %cst_79 = arith.constant dense<0.000000e+00> : vector<8xf32>
    %173 = vector.multi_reduction <add>, %172, %cst_79 [1] : vector<8x8xf32> to vector<8xf32>
    %174 = vector.shape_cast %173 : vector<8xf32> to vector<8x1xf32>
    %cst_80 = arith.constant 8.000000e+00 : f32
    %175 = vector.broadcast %cst_80 : f32 to vector<8x1xf32>
    %176 = arith.divf %174, %175 : vector<8x1xf32>
    %177 = vector.broadcast %169 : vector<8x1xf32> to vector<8x8xf32>
    %178 = arith.subf %161, %177 : vector<8x8xf32>
    %cst_81 = arith.constant 9.99999974E-6 : f32
    %179 = vector.broadcast %cst_81 : f32 to vector<8x1xf32>
    %180 = arith.addf %176, %179 : vector<8x1xf32>
    %181 = math.rsqrt %180 : vector<8x1xf32>
    %182 = vector.broadcast %181 : vector<8x1xf32> to vector<8x8xf32>
    %183 = arith.mulf %178, %182 : vector<8x8xf32>
    %184 = vector.broadcast %163 : vector<1x8xf32> to vector<8x8xf32>
    %185 = arith.mulf %183, %184 : vector<8x8xf32>
    %186 = vector.broadcast %165 : vector<1x8xf32> to vector<8x8xf32>
    %187 = arith.addf %185, %186 : vector<8x8xf32>
    %c0_82 = arith.constant 0 : index
    %c0_83 = arith.constant 0 : index
    %c0_84 = arith.constant 0 : index
    %188 = vector.load %arg15[%c0_82, %c0_83, %c0_84] : memref<2x56x8xbf16, #tpu.memory_space<vmem>>, vector<1x56x8xbf16>
    %189 = vector.shape_cast %188 : vector<1x56x8xbf16> to vector<56x8xbf16>
    %c0_85 = arith.constant 0 : index
    %c0_86 = arith.constant 0 : index
    %c0_87 = arith.constant 0 : index
    %190 = vector.load %arg16[%c0_85, %c0_86, %c0_87] : memref<2x1x8xf32, #tpu.memory_space<vmem>>, vector<1x1x8xf32>
    %191 = vector.shape_cast %190 : vector<1x1x8xf32> to vector<1x8xf32>
    %cst_88 = arith.constant 0.000000e+00 : f32
    %192 = vector.broadcast %cst_88 : f32 to vector<3x8xf32>
    %193 = tpu.concatenate %192, %187, %192 in 0 : vector<3x8xf32>, vector<8x8xf32>, vector<3x8xf32> -> vector<14x8xf32>
    %194 = vector.extract_strided_slice %193 {offsets = [0, 0], sizes = [8, 8], strides = [1, 1]} : vector<14x8xf32> to vector<8x8xf32>
    %195 = vector.extract_strided_slice %193 {offsets = [1, 0], sizes = [8, 8], strides = [1, 1]} : vector<14x8xf32> to vector<8x8xf32>
    %196 = vector.extract_strided_slice %193 {offsets = [2, 0], sizes = [8, 8], strides = [1, 1]} : vector<14x8xf32> to vector<8x8xf32>
    %197 = vector.extract_strided_slice %193 {offsets = [3, 0], sizes = [8, 8], strides = [1, 1]} : vector<14x8xf32> to vector<8x8xf32>
    %198 = vector.extract_strided_slice %193 {offsets = [4, 0], sizes = [8, 8], strides = [1, 1]} : vector<14x8xf32> to vector<8x8xf32>
    %199 = vector.extract_strided_slice %193 {offsets = [5, 0], sizes = [8, 8], strides = [1, 1]} : vector<14x8xf32> to vector<8x8xf32>
    %200 = vector.extract_strided_slice %193 {offsets = [6, 0], sizes = [8, 8], strides = [1, 1]} : vector<14x8xf32> to vector<8x8xf32>
    %201 = tpu.concatenate %194, %195, %196, %197, %198, %199, %200 in 1 : vector<8x8xf32>, vector<8x8xf32>, vector<8x8xf32>, vector<8x8xf32>, vector<8x8xf32>, vector<8x8xf32>, vector<8x8xf32> -> vector<8x56xf32>
    %202 = arith.truncf %201 : vector<8x56xf32> to vector<8x56xbf16>
    %cst_89 = arith.constant dense<0.000000e+00> : vector<8x8xf32>
    %203 = tpu.matmul %202, %189, %cst_89 {dimension_numbers = #tpu.dot_dimension_numbers<[1], [0], [0], [1], [0, 0, 1, 1], [], []>} : vector<8x56xbf16>, vector<56x8xbf16>, vector<8x8xf32> -> vector<8x8xf32>
    %204 = vector.broadcast %191 : vector<1x8xf32> to vector<8x8xf32>
    %205 = arith.addf %203, %204 : vector<8x8xf32>
    %206 = arith.mulf %205, %205 : vector<8x8xf32>
    %207 = arith.mulf %205, %206 : vector<8x8xf32>
    %cst_90 = arith.constant 4.471500e-02 : f32
    %208 = vector.broadcast %cst_90 : f32 to vector<8x8xf32>
    %209 = arith.mulf %208, %207 : vector<8x8xf32>
    %210 = arith.addf %205, %209 : vector<8x8xf32>
    %cst_91 = arith.constant 0.797884583 : f32
    %211 = vector.broadcast %cst_91 : f32 to vector<8x8xf32>
    %212 = arith.mulf %211, %210 : vector<8x8xf32>
    %213 = math.tanh %212 : vector<8x8xf32>
    %cst_92 = arith.constant 1.000000e+00 : f32
    %214 = vector.broadcast %cst_92 : f32 to vector<8x8xf32>
    %215 = arith.addf %214, %213 : vector<8x8xf32>
    %cst_93 = arith.constant 5.000000e-01 : f32
    %216 = vector.broadcast %cst_93 : f32 to vector<8x8xf32>
    %217 = arith.mulf %216, %215 : vector<8x8xf32>
    %218 = arith.mulf %205, %217 : vector<8x8xf32>
    %c0_94 = arith.constant 0 : index
    %c0_95 = arith.constant 0 : index
    %c0_96 = arith.constant 0 : index
    %219 = vector.load %arg17[%c0_94, %c0_95, %c0_96] : memref<2x8x8xbf16, #tpu.memory_space<vmem>>, vector<1x8x8xbf16>
    %220 = vector.shape_cast %219 : vector<1x8x8xbf16> to vector<8x8xbf16>
    %221 = arith.truncf %218 : vector<8x8xf32> to vector<8x8xbf16>
    %cst_97 = arith.constant dense<0.000000e+00> : vector<8x8xf32>
    %222 = tpu.matmul %221, %220, %cst_97 {dimension_numbers = #tpu.dot_dimension_numbers<[1], [0], [0], [1], [0, 0, 1, 1], [], []>} : vector<8x8xbf16>, vector<8x8xbf16>, vector<8x8xf32> -> vector<8x8xf32>
    %c0_98 = arith.constant 0 : index
    %c0_99 = arith.constant 0 : index
    %c0_100 = arith.constant 0 : index
    %223 = vector.load %arg18[%c0_98, %c0_99, %c0_100] : memref<2x1x8xf32, #tpu.memory_space<vmem>>, vector<1x1x8xf32>
    %224 = vector.shape_cast %223 : vector<1x1x8xf32> to vector<1x8xf32>
    %225 = vector.broadcast %224 : vector<1x8xf32> to vector<8x8xf32>
    %226 = arith.addf %222, %225 : vector<8x8xf32>
    %227 = arith.addf %161, %226 : vector<8x8xf32>
    %c1_101 = arith.constant 1 : index
    %c0_102 = arith.constant 0 : index
    %c0_103 = arith.constant 0 : index
    %228 = vector.load %arg13[%c1_101, %c0_102, %c0_103] : memref<2x1x8xf32, #tpu.memory_space<vmem>>, vector<1x1x8xf32>
    %229 = vector.shape_cast %228 : vector<1x1x8xf32> to vector<1x8xf32>
    %c1_104 = arith.constant 1 : index
    %c0_105 = arith.constant 0 : index
    %c0_106 = arith.constant 0 : index
    %230 = vector.load %arg14[%c1_104, %c0_105, %c0_106] : memref<2x1x8xf32, #tpu.memory_space<vmem>>, vector<1x1x8xf32>
    %231 = vector.shape_cast %230 : vector<1x1x8xf32> to vector<1x8xf32>
    %cst_107 = arith.constant dense<0.000000e+00> : vector<8xf32>
    %232 = vector.multi_reduction <add>, %227, %cst_107 [1] : vector<8x8xf32> to vector<8xf32>
    %233 = vector.shape_cast %232 : vector<8xf32> to vector<8x1xf32>
    %cst_108 = arith.constant 8.000000e+00 : f32
    %234 = vector.broadcast %cst_108 : f32 to vector<8x1xf32>
    %235 = arith.divf %233, %234 : vector<8x1xf32>
    %236 = vector.broadcast %235 : vector<8x1xf32> to vector<8x8xf32>
    %237 = arith.subf %227, %236 : vector<8x8xf32>
    %238 = arith.mulf %237, %237 : vector<8x8xf32>
    %cst_109 = arith.constant dense<0.000000e+00> : vector<8xf32>
    %239 = vector.multi_reduction <add>, %238, %cst_109 [1] : vector<8x8xf32> to vector<8xf32>
    %240 = vector.shape_cast %239 : vector<8xf32> to vector<8x1xf32>
    %cst_110 = arith.constant 8.000000e+00 : f32
    %241 = vector.broadcast %cst_110 : f32 to vector<8x1xf32>
    %242 = arith.divf %240, %241 : vector<8x1xf32>
    %243 = vector.broadcast %235 : vector<8x1xf32> to vector<8x8xf32>
    %244 = arith.subf %227, %243 : vector<8x8xf32>
    %cst_111 = arith.constant 9.99999974E-6 : f32
    %245 = vector.broadcast %cst_111 : f32 to vector<8x1xf32>
    %246 = arith.addf %242, %245 : vector<8x1xf32>
    %247 = math.rsqrt %246 : vector<8x1xf32>
    %248 = vector.broadcast %247 : vector<8x1xf32> to vector<8x8xf32>
    %249 = arith.mulf %244, %248 : vector<8x8xf32>
    %250 = vector.broadcast %229 : vector<1x8xf32> to vector<8x8xf32>
    %251 = arith.mulf %249, %250 : vector<8x8xf32>
    %252 = vector.broadcast %231 : vector<1x8xf32> to vector<8x8xf32>
    %253 = arith.addf %251, %252 : vector<8x8xf32>
    %c1_112 = arith.constant 1 : index
    %c0_113 = arith.constant 0 : index
    %c0_114 = arith.constant 0 : index
    %254 = vector.load %arg15[%c1_112, %c0_113, %c0_114] : memref<2x56x8xbf16, #tpu.memory_space<vmem>>, vector<1x56x8xbf16>
    %255 = vector.shape_cast %254 : vector<1x56x8xbf16> to vector<56x8xbf16>
    %c1_115 = arith.constant 1 : index
    %c0_116 = arith.constant 0 : index
    %c0_117 = arith.constant 0 : index
    %256 = vector.load %arg16[%c1_115, %c0_116, %c0_117] : memref<2x1x8xf32, #tpu.memory_space<vmem>>, vector<1x1x8xf32>
    %257 = vector.shape_cast %256 : vector<1x1x8xf32> to vector<1x8xf32>
    %cst_118 = arith.constant 0.000000e+00 : f32
    %258 = vector.broadcast %cst_118 : f32 to vector<3x8xf32>
    %259 = tpu.concatenate %258, %253, %258 in 0 : vector<3x8xf32>, vector<8x8xf32>, vector<3x8xf32> -> vector<14x8xf32>
    %260 = vector.extract_strided_slice %259 {offsets = [0, 0], sizes = [8, 8], strides = [1, 1]} : vector<14x8xf32> to vector<8x8xf32>
    %261 = vector.extract_strided_slice %259 {offsets = [1, 0], sizes = [8, 8], strides = [1, 1]} : vector<14x8xf32> to vector<8x8xf32>
    %262 = vector.extract_strided_slice %259 {offsets = [2, 0], sizes = [8, 8], strides = [1, 1]} : vector<14x8xf32> to vector<8x8xf32>
    %263 = vector.extract_strided_slice %259 {offsets = [3, 0], sizes = [8, 8], strides = [1, 1]} : vector<14x8xf32> to vector<8x8xf32>
    %264 = vector.extract_strided_slice %259 {offsets = [4, 0], sizes = [8, 8], strides = [1, 1]} : vector<14x8xf32> to vector<8x8xf32>
    %265 = vector.extract_strided_slice %259 {offsets = [5, 0], sizes = [8, 8], strides = [1, 1]} : vector<14x8xf32> to vector<8x8xf32>
    %266 = vector.extract_strided_slice %259 {offsets = [6, 0], sizes = [8, 8], strides = [1, 1]} : vector<14x8xf32> to vector<8x8xf32>
    %267 = tpu.concatenate %260, %261, %262, %263, %264, %265, %266 in 1 : vector<8x8xf32>, vector<8x8xf32>, vector<8x8xf32>, vector<8x8xf32>, vector<8x8xf32>, vector<8x8xf32>, vector<8x8xf32> -> vector<8x56xf32>
    %268 = arith.truncf %267 : vector<8x56xf32> to vector<8x56xbf16>
    %cst_119 = arith.constant dense<0.000000e+00> : vector<8x8xf32>
    %269 = tpu.matmul %268, %255, %cst_119 {dimension_numbers = #tpu.dot_dimension_numbers<[1], [0], [0], [1], [0, 0, 1, 1], [], []>} : vector<8x56xbf16>, vector<56x8xbf16>, vector<8x8xf32> -> vector<8x8xf32>
    %270 = vector.broadcast %257 : vector<1x8xf32> to vector<8x8xf32>
    %271 = arith.addf %269, %270 : vector<8x8xf32>
    %272 = arith.mulf %271, %271 : vector<8x8xf32>
    %273 = arith.mulf %271, %272 : vector<8x8xf32>
    %cst_120 = arith.constant 4.471500e-02 : f32
    %274 = vector.broadcast %cst_120 : f32 to vector<8x8xf32>
    %275 = arith.mulf %274, %273 : vector<8x8xf32>
    %276 = arith.addf %271, %275 : vector<8x8xf32>
    %cst_121 = arith.constant 0.797884583 : f32
    %277 = vector.broadcast %cst_121 : f32 to vector<8x8xf32>
    %278 = arith.mulf %277, %276 : vector<8x8xf32>
    %279 = math.tanh %278 : vector<8x8xf32>
    %cst_122 = arith.constant 1.000000e+00 : f32
    %280 = vector.broadcast %cst_122 : f32 to vector<8x8xf32>
    %281 = arith.addf %280, %279 : vector<8x8xf32>
    %cst_123 = arith.constant 5.000000e-01 : f32
    %282 = vector.broadcast %cst_123 : f32 to vector<8x8xf32>
    %283 = arith.mulf %282, %281 : vector<8x8xf32>
    %284 = arith.mulf %271, %283 : vector<8x8xf32>
    %c1_124 = arith.constant 1 : index
    %c0_125 = arith.constant 0 : index
    %c0_126 = arith.constant 0 : index
    %285 = vector.load %arg17[%c1_124, %c0_125, %c0_126] : memref<2x8x8xbf16, #tpu.memory_space<vmem>>, vector<1x8x8xbf16>
    %286 = vector.shape_cast %285 : vector<1x8x8xbf16> to vector<8x8xbf16>
    %287 = arith.truncf %284 : vector<8x8xf32> to vector<8x8xbf16>
    %cst_127 = arith.constant dense<0.000000e+00> : vector<8x8xf32>
    %288 = tpu.matmul %287, %286, %cst_127 {dimension_numbers = #tpu.dot_dimension_numbers<[1], [0], [0], [1], [0, 0, 1, 1], [], []>} : vector<8x8xbf16>, vector<8x8xbf16>, vector<8x8xf32> -> vector<8x8xf32>
    %c1_128 = arith.constant 1 : index
    %c0_129 = arith.constant 0 : index
    %c0_130 = arith.constant 0 : index
    %289 = vector.load %arg18[%c1_128, %c0_129, %c0_130] : memref<2x1x8xf32, #tpu.memory_space<vmem>>, vector<1x1x8xf32>
    %290 = vector.shape_cast %289 : vector<1x1x8xf32> to vector<1x8xf32>
    %291 = vector.broadcast %290 : vector<1x8xf32> to vector<8x8xf32>
    %292 = arith.addf %288, %291 : vector<8x8xf32>
    %293 = arith.addf %227, %292 : vector<8x8xf32>
    %c0_131 = arith.constant 0 : index
    %c0_132 = arith.constant 0 : index
    %c0_133 = arith.constant 0 : index
    %294 = vector.load %arg2[%c0_131, %c0_132, %c0_133] : memref<1x1x8xf32, #tpu.memory_space<vmem>>, vector<1x1x8xf32>
    %295 = vector.shape_cast %294 : vector<1x1x8xf32> to vector<1x8xf32>
    %cst_134 = arith.constant 1.000000e+00 : f32
    %296 = vector.broadcast %cst_134 : f32 to vector<1x8xf32>
    %297 = arith.addf %296, %295 : vector<1x8xf32>
    %298 = vector.broadcast %297 : vector<1x8xf32> to vector<8x8xf32>
    %299 = arith.mulf %293, %298 : vector<8x8xf32>
    %c0_135 = arith.constant 0 : index
    %c0_136 = arith.constant 0 : index
    %c0_137 = arith.constant 0 : index
    %300 = vector.load %arg3[%c0_135, %c0_136, %c0_137] : memref<1x1x8xf32, #tpu.memory_space<vmem>>, vector<1x1x8xf32>
    %301 = vector.shape_cast %300 : vector<1x1x8xf32> to vector<1x8xf32>
    %302 = vector.broadcast %301 : vector<1x8xf32> to vector<8x8xf32>
    %303 = arith.addf %299, %302 : vector<8x8xf32>
    %c0_138 = arith.constant 0 : index
    %c0_139 = arith.constant 0 : index
    %304 = vector.load %arg19[%c0_138, %c0_139] : memref<8x8xbf16, #tpu.memory_space<vmem>>, vector<8x8xbf16>
    %305 = arith.truncf %2 : vector<16x8xf32> to vector<16x8xbf16>
    %cst_140 = arith.constant dense<0.000000e+00> : vector<16x8xf32>
    %306 = tpu.matmul %305, %304, %cst_140 {dimension_numbers = #tpu.dot_dimension_numbers<[1], [0], [0], [1], [0, 0, 1, 1], [], []>} : vector<16x8xbf16>, vector<8x8xbf16>, vector<16x8xf32> -> vector<16x8xf32>
    %c0_141 = arith.constant 0 : index
    %c0_142 = arith.constant 0 : index
    %307 = vector.load %arg20[%c0_141, %c0_142] : memref<1x8xf32, #tpu.memory_space<vmem>>, vector<1x8xf32>
    %308 = vector.broadcast %307 : vector<1x8xf32> to vector<16x8xf32>
    %309 = arith.addf %306, %308 : vector<16x8xf32>
    %c0_143 = arith.constant 0 : index
    %c0_144 = arith.constant 0 : index
    %310 = vector.load %arg24[%c0_143, %c0_144] : memref<16x8xf32, #tpu.memory_space<vmem>>, vector<16x8xf32>
    tpu.vector_store %arg24[%c0_143, %c0_144], %309 {strides = array<i32>} : memref<16x8xf32, #tpu.memory_space<vmem>>, vector<16x8xf32>,
    %c0_145 = arith.constant 0 : index
    %c0_146 = arith.constant 0 : index
    %311 = tpu.strided_load %arg24[%c0_145, %c0_146] {strides = array<i32: 2, 1>} : memref<16x8xf32, #tpu.memory_space<vmem>>, vector<8x8xf32>
    %312 = arith.addf %303, %311 : vector<8x8xf32>
    %c0_147 = arith.constant 0 : index
    %c0_148 = arith.constant 0 : index
    %313 = vector.load %arg21[%c0_147, %c0_148] : memref<1x8xf32, #tpu.memory_space<vmem>>, vector<1x8xf32>
    %c0_149 = arith.constant 0 : index
    %c0_150 = arith.constant 0 : index
    %314 = vector.load %arg22[%c0_149, %c0_150] : memref<1x8xf32, #tpu.memory_space<vmem>>, vector<1x8xf32>
    %cst_151 = arith.constant dense<0.000000e+00> : vector<8xf32>
    %315 = vector.multi_reduction <add>, %312, %cst_151 [1] : vector<8x8xf32> to vector<8xf32>
    %316 = vector.shape_cast %315 : vector<8xf32> to vector<8x1xf32>
    %cst_152 = arith.constant 8.000000e+00 : f32
    %317 = vector.broadcast %cst_152 : f32 to vector<8x1xf32>
    %318 = arith.divf %316, %317 : vector<8x1xf32>
    %319 = vector.broadcast %318 : vector<8x1xf32> to vector<8x8xf32>
    %320 = arith.subf %312, %319 : vector<8x8xf32>
    %321 = arith.mulf %320, %320 : vector<8x8xf32>
    %cst_153 = arith.constant dense<0.000000e+00> : vector<8xf32>
    %322 = vector.multi_reduction <add>, %321, %cst_153 [1] : vector<8x8xf32> to vector<8xf32>
    %323 = vector.shape_cast %322 : vector<8xf32> to vector<8x1xf32>
    %cst_154 = arith.constant 8.000000e+00 : f32
    %324 = vector.broadcast %cst_154 : f32 to vector<8x1xf32>
    %325 = arith.divf %323, %324 : vector<8x1xf32>
    %326 = vector.broadcast %318 : vector<8x1xf32> to vector<8x8xf32>
    %327 = arith.subf %312, %326 : vector<8x8xf32>
    %cst_155 = arith.constant 9.99999974E-6 : f32
    %328 = vector.broadcast %cst_155 : f32 to vector<8x1xf32>
    %329 = arith.addf %325, %328 : vector<8x1xf32>
    %330 = math.rsqrt %329 : vector<8x1xf32>
    %331 = vector.broadcast %330 : vector<8x1xf32> to vector<8x8xf32>
    %332 = arith.mulf %327, %331 : vector<8x8xf32>
    %333 = vector.broadcast %313 : vector<1x8xf32> to vector<8x8xf32>
    %334 = arith.mulf %332, %333 : vector<8x8xf32>
    %335 = vector.broadcast %314 : vector<1x8xf32> to vector<8x8xf32>
    %336 = arith.addf %334, %335 : vector<8x8xf32>
    %337 = tpu.transpose %336, [1, 0] : vector<8x8xf32> -> vector<8x8xf32>
    %c0_156 = arith.constant 0 : index
    %c0_157 = arith.constant 0 : index
    %c0_158 = arith.constant 0 : index
    %338 = vector.load %arg23[%c0_156, %c0_157, %c0_158] : memref<1x8x8xf32, #tpu.memory_space<vmem>>, vector<1x8x8xf32>
    %339 = vector.shape_cast %338 : vector<1x8x8xf32> to vector<8x8xf32>
    %340 = vector.shape_cast %337 : vector<8x8xf32> to vector<1x8x8xf32>
    tpu.vector_store %arg23[%c0_156, %c0_157, %c0_158], %340 {strides = array<i32>} : memref<1x8x8xf32, #tpu.memory_space<vmem>>, vector<1x8x8xf32>,
    return
  }
  func.func @transform_0(%arg0: i32) -> (i32, i32, i32) {
    %c0_i32 = arith.constant 0 : i32
    %c0_i32_0 = arith.constant 0 : i32
    %c0_i32_1 = arith.constant 0 : i32
    return %arg0, %c0_i32, %c0_i32_0 : i32, i32, i32
  }
  func.func @transform_1(%arg0: i32) -> (i32, i32, i32) {
    %c0_i32 = arith.constant 0 : i32
    %c0_i32_0 = arith.constant 0 : i32
    %c0_i32_1 = arith.constant 0 : i32
    return %arg0, %c0_i32, %c0_i32_0 : i32, i32, i32
  }
  func.func @transform_2(%arg0: i32) -> (i32, i32, i32) {
    %c0_i32 = arith.constant 0 : i32
    %c0_i32_0 = arith.constant 0 : i32
    %c0_i32_1 = arith.constant 0 : i32
    return %arg0, %c0_i32, %c0_i32_0 : i32, i32, i32
  }
  func.func @transform_3(%arg0: i32) -> (i32, i32, i32) {
    %c0_i32 = arith.constant 0 : i32
    %c0_i32_0 = arith.constant 0 : i32
    %c0_i32_1 = arith.constant 0 : i32
    %c0_i32_2 = arith.constant 0 : i32
    return %c0_i32, %c0_i32_0, %c0_i32_1 : i32, i32, i32
  }
  func.func @transform_4(%arg0: i32) -> (i32, i32, i32) {
    %c0_i32 = arith.constant 0 : i32
    %c0_i32_0 = arith.constant 0 : i32
    %c0_i32_1 = arith.constant 0 : i32
    %c0_i32_2 = arith.constant 0 : i32
    return %c0_i32, %c0_i32_0, %c0_i32_1 : i32, i32, i32
  }
  func.func @transform_5(%arg0: i32) -> (i32, i32, i32) {
    %c0_i32 = arith.constant 0 : i32
    %c0_i32_0 = arith.constant 0 : i32
    %c0_i32_1 = arith.constant 0 : i32
    %c0_i32_2 = arith.constant 0 : i32
    return %c0_i32, %c0_i32_0, %c0_i32_1 : i32, i32, i32
  }
  func.func @transform_6(%arg0: i32) -> (i32, i32, i32) {
    %c0_i32 = arith.constant 0 : i32
    %c0_i32_0 = arith.constant 0 : i32
    %c0_i32_1 = arith.constant 0 : i32
    %c0_i32_2 = arith.constant 0 : i32
    return %c0_i32, %c0_i32_0, %c0_i32_1 : i32, i32, i32
  }
  func.func @transform_7(%arg0: i32) -> (i32, i32) {
    %c0_i32 = arith.constant 0 : i32
    %c0_i32_0 = arith.constant 0 : i32
    %c0_i32_1 = arith.constant 0 : i32
    return %c0_i32, %c0_i32_0 : i32, i32
  }
  func.func @transform_8(%arg0: i32) -> (i32, i32) {
    %c0_i32 = arith.constant 0 : i32
    %c0_i32_0 = arith.constant 0 : i32
    %c0_i32_1 = arith.constant 0 : i32
    return %c0_i32, %c0_i32_0 : i32, i32
  }
  func.func @transform_9(%arg0: i32) -> (i32, i32) {
    %c0_i32 = arith.constant 0 : i32
    %c0_i32_0 = arith.constant 0 : i32
    %c0_i32_1 = arith.constant 0 : i32
    return %c0_i32, %c0_i32_0 : i32, i32
  }
  func.func @transform_10(%arg0: i32) -> (i32, i32) {
    %c0_i32 = arith.constant 0 : i32
    %c0_i32_0 = arith.constant 0 : i32
    %c0_i32_1 = arith.constant 0 : i32
    return %c0_i32, %c0_i32_0 : i32, i32
  }
  func.func @transform_11(%arg0: i32) -> (i32, i32) {
    %c0_i32 = arith.constant 0 : i32
    %c0_i32_0 = arith.constant 0 : i32
    %c0_i32_1 = arith.constant 0 : i32
    return %c0_i32, %c0_i32_0 : i32, i32
  }
  func.func @transform_12(%arg0: i32) -> (i32, i32, i32) {
    %c0_i32 = arith.constant 0 : i32
    %c0_i32_0 = arith.constant 0 : i32
    %c0_i32_1 = arith.constant 0 : i32
    %c0_i32_2 = arith.constant 0 : i32
    return %c0_i32, %c0_i32_0, %c0_i32_1 : i32, i32, i32
  }
  func.func @transform_13(%arg0: i32) -> (i32, i32, i32) {
    %c0_i32 = arith.constant 0 : i32
    %c0_i32_0 = arith.constant 0 : i32
    %c0_i32_1 = arith.constant 0 : i32
    %c0_i32_2 = arith.constant 0 : i32
    return %c0_i32, %c0_i32_0, %c0_i32_1 : i32, i32, i32
  }
  func.func @transform_14(%arg0: i32) -> (i32, i32, i32) {
    %c0_i32 = arith.constant 0 : i32
    %c0_i32_0 = arith.constant 0 : i32
    %c0_i32_1 = arith.constant 0 : i32
    %c0_i32_2 = arith.constant 0 : i32
    return %c0_i32, %c0_i32_0, %c0_i32_1 : i32, i32, i32
  }
  func.func @transform_15(%arg0: i32) -> (i32, i32, i32) {
    %c0_i32 = arith.constant 0 : i32
    %c0_i32_0 = arith.constant 0 : i32
    %c0_i32_1 = arith.constant 0 : i32
    %c0_i32_2 = arith.constant 0 : i32
    return %c0_i32, %c0_i32_0, %c0_i32_1 : i32, i32, i32
  }
  func.func @transform_16(%arg0: i32) -> (i32, i32, i32) {
    %c0_i32 = arith.constant 0 : i32
    %c0_i32_0 = arith.constant 0 : i32
    %c0_i32_1 = arith.constant 0 : i32
    %c0_i32_2 = arith.constant 0 : i32
    return %c0_i32, %c0_i32_0, %c0_i32_1 : i32, i32, i32
  }
  func.func @transform_17(%arg0: i32) -> (i32, i32, i32) {
    %c0_i32 = arith.constant 0 : i32
    %c0_i32_0 = arith.constant 0 : i32
    %c0_i32_1 = arith.constant 0 : i32
    %c0_i32_2 = arith.constant 0 : i32
    return %c0_i32, %c0_i32_0, %c0_i32_1 : i32, i32, i32
  }
  func.func @transform_18(%arg0: i32) -> (i32, i32) {
    %c0_i32 = arith.constant 0 : i32
    %c0_i32_0 = arith.constant 0 : i32
    %c0_i32_1 = arith.constant 0 : i32
    return %c0_i32, %c0_i32_0 : i32, i32
  }
  func.func @transform_19(%arg0: i32) -> (i32, i32) {
    %c0_i32 = arith.constant 0 : i32
    %c0_i32_0 = arith.constant 0 : i32
    %c0_i32_1 = arith.constant 0 : i32
    return %c0_i32, %c0_i32_0 : i32, i32
  }
  func.func @transform_20(%arg0: i32) -> (i32, i32) {
    %c0_i32 = arith.constant 0 : i32
    %c0_i32_0 = arith.constant 0 : i32
    %c0_i32_1 = arith.constant 0 : i32
    return %c0_i32, %c0_i32_0 : i32, i32
  }
  func.func @transform_21(%arg0: i32) -> (i32, i32) {
    %c0_i32 = arith.constant 0 : i32
    %c0_i32_0 = arith.constant 0 : i32
    %c0_i32_1 = arith.constant 0 : i32
    return %c0_i32, %c0_i32_0 : i32, i32
  }
  func.func @transform_22(%arg0: i32) -> (i32, i32, i32) {
    %c0_i32 = arith.constant 0 : i32
    %c0_i32_0 = arith.constant 0 : i32
    %c0_i32_1 = arith.constant 0 : i32
    return %arg0, %c0_i32, %c0_i32_0 : i32, i32, i32
  }
}

module attributes {stable_mosaic.version = 11 : i64} {
  func.func @kernel(%arg0: i32, %arg1: memref<1x8x8xf32, #tpu.memory_space<vmem>>, %arg2: memref<1x1x16xf32, #tpu.memory_space<vmem>>, %arg3: memref<1x1x16xf32, #tpu.memory_space<vmem>>, %arg4: memref<8x16xbf16, #tpu.memory_space<vmem>>, %arg5: memref<1x16xf32, #tpu.memory_space<vmem>>, %arg6: memref<2x48x16xbf16, #tpu.memory_space<vmem>>, %arg7: memref<2x1x16xf32, #tpu.memory_space<vmem>>, %arg8: memref<2x1x16xf32, #tpu.memory_space<vmem>>, %arg9: memref<2x1x16xf32, #tpu.memory_space<vmem>>, %arg10: memref<48x16xbf16, #tpu.memory_space<vmem>>, %arg11: memref<1x16xf32, #tpu.memory_space<vmem>>, %arg12: memref<1x16xf32, #tpu.memory_space<vmem>>, %arg13: memref<1x16xf32, #tpu.memory_space<vmem>>, %arg14: memref<4x16xf32, #tpu.memory_space<vmem>>, %arg15: memref<2x1x16xf32, #tpu.memory_space<vmem>>, %arg16: memref<2x1x16xf32, #tpu.memory_space<vmem>>, %arg17: memref<2x48x16xbf16, #tpu.memory_space<vmem>>, %arg18: memref<2x1x16xf32, #tpu.memory_space<vmem>>, %arg19: memref<2x16x16xbf16, #tpu.memory_space<vmem>>, %arg20: memref<2x1x16xf32, #tpu.memory_space<vmem>>, %arg21: memref<1x16xf32, #tpu.memory_space<vmem>>, %arg22: memref<1x16xf32, #tpu.memory_space<vmem>>, %arg23: memref<1x16x4xf32, #tpu.memory_space<vmem>>, %arg24: memref<8x16xf32, #tpu.memory_space<vmem>>) attributes {dimension_semantics = [#tpu.dimension_semantics<parallel>], iteration_bounds = array<i64: 2>, scalar_prefetch = 0 : i64, scratch_operands = 1 : i64, tpu.core_type = #tpu.core_type<tc>, window_params = [{transform_indices = @transform_0, window_bounds = array<i64: 1, 8, 8>}, {transform_indices = @transform_1, window_bounds = array<i64: 1, 1, 16>}, {transform_indices = @transform_2, window_bounds = array<i64: 1, 1, 16>}, {pipeline_mode = #tpu.pipeline_mode<synchronous>, transform_indices = @transform_3, window_bounds = array<i64: 8, 16>}, {pipeline_mode = #tpu.pipeline_mode<synchronous>, transform_indices = @transform_4, window_bounds = array<i64: 1, 16>}, {pipeline_mode = #tpu.pipeline_mode<synchronous>, transform_indices = @transform_5, window_bounds = array<i64: 2, 48, 16>}, {pipeline_mode = #tpu.pipeline_mode<synchronous>, transform_indices = @transform_6, window_bounds = array<i64: 2, 1, 16>}, {pipeline_mode = #tpu.pipeline_mode<synchronous>, transform_indices = @transform_7, window_bounds = array<i64: 2, 1, 16>}, {pipeline_mode = #tpu.pipeline_mode<synchronous>, transform_indices = @transform_8, window_bounds = array<i64: 2, 1, 16>}, {pipeline_mode = #tpu.pipeline_mode<synchronous>, transform_indices = @transform_9, window_bounds = array<i64: 48, 16>}, {pipeline_mode = #tpu.pipeline_mode<synchronous>, transform_indices = @transform_10, window_bounds = array<i64: 1, 16>}, {pipeline_mode = #tpu.pipeline_mode<synchronous>, transform_indices = @transform_11, window_bounds = array<i64: 1, 16>}, {pipeline_mode = #tpu.pipeline_mode<synchronous>, transform_indices = @transform_12, window_bounds = array<i64: 1, 16>}, {pipeline_mode = #tpu.pipeline_mode<synchronous>, transform_indices = @transform_13, window_bounds = array<i64: 4, 16>}, {pipeline_mode = #tpu.pipeline_mode<synchronous>, transform_indices = @transform_14, window_bounds = array<i64: 2, 1, 16>}, {pipeline_mode = #tpu.pipeline_mode<synchronous>, transform_indices = @transform_15, window_bounds = array<i64: 2, 1, 16>}, {pipeline_mode = #tpu.pipeline_mode<synchronous>, transform_indices = @transform_16, window_bounds = array<i64: 2, 48, 16>}, {pipeline_mode = #tpu.pipeline_mode<synchronous>, transform_indices = @transform_17, window_bounds = array<i64: 2, 1, 16>}, {pipeline_mode = #tpu.pipeline_mode<synchronous>, transform_indices = @transform_18, window_bounds = array<i64: 2, 16, 16>}, {pipeline_mode = #tpu.pipeline_mode<synchronous>, transform_indices = @transform_19, window_bounds = array<i64: 2, 1, 16>}, {pipeline_mode = #tpu.pipeline_mode<synchronous>, transform_indices = @transform_20, window_bounds = array<i64: 1, 16>}, {pipeline_mode = #tpu.pipeline_mode<synchronous>, transform_indices = @transform_21, window_bounds = array<i64: 1, 16>}, {transform_indices = @transform_22, window_bounds = array<i64: 1, 16, 4>}]} {
    %c0 = arith.constant 0 : index
    %c0_0 = arith.constant 0 : index
    %c0_1 = arith.constant 0 : index
    %0 = vector.load %arg1[%c0, %c0_0, %c0_1] : memref<1x8x8xf32, #tpu.memory_space<vmem>>, vector<1x8x8xf32>
    %1 = vector.shape_cast %0 : vector<1x8x8xf32> to vector<8x8xf32>
    %2 = tpu.transpose %1, [1, 0] : vector<8x8xf32> -> vector<8x8xf32>
    %c0_2 = arith.constant 0 : index
    %c0_3 = arith.constant 0 : index
    %3 = vector.load %arg4[%c0_2, %c0_3] : memref<8x16xbf16, #tpu.memory_space<vmem>>, vector<8x16xbf16>
    %4 = arith.truncf %2 : vector<8x8xf32> to vector<8x8xbf16>
    %cst = arith.constant dense<0.000000e+00> : vector<8x16xf32>
    %5 = tpu.matmul %4, %3, %cst {dimension_numbers = #tpu.dot_dimension_numbers<[1], [0], [0], [1], [0, 0, 1, 1], [], []>} : vector<8x8xbf16>, vector<8x16xbf16>, vector<8x16xf32> -> vector<8x16xf32>
    %c0_4 = arith.constant 0 : index
    %c0_5 = arith.constant 0 : index
    %6 = vector.load %arg5[%c0_4, %c0_5] : memref<1x16xf32, #tpu.memory_space<vmem>>, vector<1x16xf32>
    %7 = vector.broadcast %6 : vector<1x16xf32> to vector<8x16xf32>
    %8 = arith.addf %5, %7 : vector<8x16xf32>
    %c0_6 = arith.constant 0 : index
    %c0_7 = arith.constant 0 : index
    %c0_8 = arith.constant 0 : index
    %9 = vector.load %arg6[%c0_6, %c0_7, %c0_8] : memref<2x48x16xbf16, #tpu.memory_space<vmem>>, vector<1x48x16xbf16>
    %10 = vector.shape_cast %9 : vector<1x48x16xbf16> to vector<48x16xbf16>
    %c0_9 = arith.constant 0 : index
    %c0_10 = arith.constant 0 : index
    %c0_11 = arith.constant 0 : index
    %11 = vector.load %arg7[%c0_9, %c0_10, %c0_11] : memref<2x1x16xf32, #tpu.memory_space<vmem>>, vector<1x1x16xf32>
    %12 = vector.shape_cast %11 : vector<1x1x16xf32> to vector<1x16xf32>
    %cst_12 = arith.constant 0.000000e+00 : f32
    %13 = vector.broadcast %cst_12 : f32 to vector<1x16xf32>
    %14 = tpu.concatenate %13, %8, %13 in 0 : vector<1x16xf32>, vector<8x16xf32>, vector<1x16xf32> -> vector<10x16xf32>
    %15 = vector.extract_strided_slice %14 {offsets = [0, 0], sizes = [8, 16], strides = [1, 1]} : vector<10x16xf32> to vector<8x16xf32>
    %16 = vector.extract_strided_slice %14 {offsets = [1, 0], sizes = [8, 16], strides = [1, 1]} : vector<10x16xf32> to vector<8x16xf32>
    %17 = vector.extract_strided_slice %14 {offsets = [2, 0], sizes = [8, 16], strides = [1, 1]} : vector<10x16xf32> to vector<8x16xf32>
    %18 = tpu.concatenate %15, %16, %17 in 1 : vector<8x16xf32>, vector<8x16xf32>, vector<8x16xf32> -> vector<8x48xf32>
    %19 = arith.truncf %18 : vector<8x48xf32> to vector<8x48xbf16>
    %cst_13 = arith.constant dense<0.000000e+00> : vector<8x16xf32>
    %20 = tpu.matmul %19, %10, %cst_13 {dimension_numbers = #tpu.dot_dimension_numbers<[1], [0], [0], [1], [0, 0, 1, 1], [], []>} : vector<8x48xbf16>, vector<48x16xbf16>, vector<8x16xf32> -> vector<8x16xf32>
    %21 = vector.broadcast %12 : vector<1x16xf32> to vector<8x16xf32>
    %22 = arith.addf %20, %21 : vector<8x16xf32>
    %23 = arith.mulf %22, %22 : vector<8x16xf32>
    %24 = arith.mulf %22, %23 : vector<8x16xf32>
    %cst_14 = arith.constant 4.471500e-02 : f32
    %25 = vector.broadcast %cst_14 : f32 to vector<8x16xf32>
    %26 = arith.mulf %25, %24 : vector<8x16xf32>
    %27 = arith.addf %22, %26 : vector<8x16xf32>
    %cst_15 = arith.constant 0.797884583 : f32
    %28 = vector.broadcast %cst_15 : f32 to vector<8x16xf32>
    %29 = arith.mulf %28, %27 : vector<8x16xf32>
    %30 = math.tanh %29 : vector<8x16xf32>
    %cst_16 = arith.constant 1.000000e+00 : f32
    %31 = vector.broadcast %cst_16 : f32 to vector<8x16xf32>
    %32 = arith.addf %31, %30 : vector<8x16xf32>
    %cst_17 = arith.constant 5.000000e-01 : f32
    %33 = vector.broadcast %cst_17 : f32 to vector<8x16xf32>
    %34 = arith.mulf %33, %32 : vector<8x16xf32>
    %35 = arith.mulf %22, %34 : vector<8x16xf32>
    %c0_18 = arith.constant 0 : index
    %c0_19 = arith.constant 0 : index
    %c0_20 = arith.constant 0 : index
    %36 = vector.load %arg8[%c0_18, %c0_19, %c0_20] : memref<2x1x16xf32, #tpu.memory_space<vmem>>, vector<1x1x16xf32>
    %37 = vector.shape_cast %36 : vector<1x1x16xf32> to vector<1x16xf32>
    %c0_21 = arith.constant 0 : index
    %c0_22 = arith.constant 0 : index
    %c0_23 = arith.constant 0 : index
    %38 = vector.load %arg9[%c0_21, %c0_22, %c0_23] : memref<2x1x16xf32, #tpu.memory_space<vmem>>, vector<1x1x16xf32>
    %39 = vector.shape_cast %38 : vector<1x1x16xf32> to vector<1x16xf32>
    %cst_24 = arith.constant dense<0.000000e+00> : vector<8xf32>
    %40 = vector.multi_reduction <add>, %35, %cst_24 [1] : vector<8x16xf32> to vector<8xf32>
    %41 = vector.shape_cast %40 : vector<8xf32> to vector<8x1xf32>
    %cst_25 = arith.constant 1.600000e+01 : f32
    %42 = vector.broadcast %cst_25 : f32 to vector<8x1xf32>
    %43 = arith.divf %41, %42 : vector<8x1xf32>
    %44 = vector.broadcast %43 : vector<8x1xf32> to vector<8x16xf32>
    %45 = arith.subf %35, %44 : vector<8x16xf32>
    %46 = arith.mulf %45, %45 : vector<8x16xf32>
    %cst_26 = arith.constant dense<0.000000e+00> : vector<8xf32>
    %47 = vector.multi_reduction <add>, %46, %cst_26 [1] : vector<8x16xf32> to vector<8xf32>
    %48 = vector.shape_cast %47 : vector<8xf32> to vector<8x1xf32>
    %cst_27 = arith.constant 1.600000e+01 : f32
    %49 = vector.broadcast %cst_27 : f32 to vector<8x1xf32>
    %50 = arith.divf %48, %49 : vector<8x1xf32>
    %51 = vector.broadcast %43 : vector<8x1xf32> to vector<8x16xf32>
    %52 = arith.subf %35, %51 : vector<8x16xf32>
    %cst_28 = arith.constant 9.99999974E-6 : f32
    %53 = vector.broadcast %cst_28 : f32 to vector<8x1xf32>
    %54 = arith.addf %50, %53 : vector<8x1xf32>
    %55 = math.rsqrt %54 : vector<8x1xf32>
    %56 = vector.broadcast %55 : vector<8x1xf32> to vector<8x16xf32>
    %57 = arith.mulf %52, %56 : vector<8x16xf32>
    %58 = vector.broadcast %37 : vector<1x16xf32> to vector<8x16xf32>
    %59 = arith.mulf %57, %58 : vector<8x16xf32>
    %60 = vector.broadcast %39 : vector<1x16xf32> to vector<8x16xf32>
    %61 = arith.addf %59, %60 : vector<8x16xf32>
    %c1 = arith.constant 1 : index
    %c0_29 = arith.constant 0 : index
    %c0_30 = arith.constant 0 : index
    %62 = vector.load %arg6[%c1, %c0_29, %c0_30] : memref<2x48x16xbf16, #tpu.memory_space<vmem>>, vector<1x48x16xbf16>
    %63 = vector.shape_cast %62 : vector<1x48x16xbf16> to vector<48x16xbf16>
    %c1_31 = arith.constant 1 : index
    %c0_32 = arith.constant 0 : index
    %c0_33 = arith.constant 0 : index
    %64 = vector.load %arg7[%c1_31, %c0_32, %c0_33] : memref<2x1x16xf32, #tpu.memory_space<vmem>>, vector<1x1x16xf32>
    %65 = vector.shape_cast %64 : vector<1x1x16xf32> to vector<1x16xf32>
    %cst_34 = arith.constant 0.000000e+00 : f32
    %66 = vector.broadcast %cst_34 : f32 to vector<1x16xf32>
    %67 = tpu.concatenate %66, %61, %66 in 0 : vector<1x16xf32>, vector<8x16xf32>, vector<1x16xf32> -> vector<10x16xf32>
    %68 = vector.extract_strided_slice %67 {offsets = [0, 0], sizes = [8, 16], strides = [1, 1]} : vector<10x16xf32> to vector<8x16xf32>
    %69 = vector.extract_strided_slice %67 {offsets = [1, 0], sizes = [8, 16], strides = [1, 1]} : vector<10x16xf32> to vector<8x16xf32>
    %70 = vector.extract_strided_slice %67 {offsets = [2, 0], sizes = [8, 16], strides = [1, 1]} : vector<10x16xf32> to vector<8x16xf32>
    %71 = tpu.concatenate %68, %69, %70 in 1 : vector<8x16xf32>, vector<8x16xf32>, vector<8x16xf32> -> vector<8x48xf32>
    %72 = arith.truncf %71 : vector<8x48xf32> to vector<8x48xbf16>
    %cst_35 = arith.constant dense<0.000000e+00> : vector<8x16xf32>
    %73 = tpu.matmul %72, %63, %cst_35 {dimension_numbers = #tpu.dot_dimension_numbers<[1], [0], [0], [1], [0, 0, 1, 1], [], []>} : vector<8x48xbf16>, vector<48x16xbf16>, vector<8x16xf32> -> vector<8x16xf32>
    %74 = vector.broadcast %65 : vector<1x16xf32> to vector<8x16xf32>
    %75 = arith.addf %73, %74 : vector<8x16xf32>
    %76 = arith.mulf %75, %75 : vector<8x16xf32>
    %77 = arith.mulf %75, %76 : vector<8x16xf32>
    %cst_36 = arith.constant 4.471500e-02 : f32
    %78 = vector.broadcast %cst_36 : f32 to vector<8x16xf32>
    %79 = arith.mulf %78, %77 : vector<8x16xf32>
    %80 = arith.addf %75, %79 : vector<8x16xf32>
    %cst_37 = arith.constant 0.797884583 : f32
    %81 = vector.broadcast %cst_37 : f32 to vector<8x16xf32>
    %82 = arith.mulf %81, %80 : vector<8x16xf32>
    %83 = math.tanh %82 : vector<8x16xf32>
    %cst_38 = arith.constant 1.000000e+00 : f32
    %84 = vector.broadcast %cst_38 : f32 to vector<8x16xf32>
    %85 = arith.addf %84, %83 : vector<8x16xf32>
    %cst_39 = arith.constant 5.000000e-01 : f32
    %86 = vector.broadcast %cst_39 : f32 to vector<8x16xf32>
    %87 = arith.mulf %86, %85 : vector<8x16xf32>
    %88 = arith.mulf %75, %87 : vector<8x16xf32>
    %c1_40 = arith.constant 1 : index
    %c0_41 = arith.constant 0 : index
    %c0_42 = arith.constant 0 : index
    %89 = vector.load %arg8[%c1_40, %c0_41, %c0_42] : memref<2x1x16xf32, #tpu.memory_space<vmem>>, vector<1x1x16xf32>
    %90 = vector.shape_cast %89 : vector<1x1x16xf32> to vector<1x16xf32>
    %c1_43 = arith.constant 1 : index
    %c0_44 = arith.constant 0 : index
    %c0_45 = arith.constant 0 : index
    %91 = vector.load %arg9[%c1_43, %c0_44, %c0_45] : memref<2x1x16xf32, #tpu.memory_space<vmem>>, vector<1x1x16xf32>
    %92 = vector.shape_cast %91 : vector<1x1x16xf32> to vector<1x16xf32>
    %cst_46 = arith.constant dense<0.000000e+00> : vector<8xf32>
    %93 = vector.multi_reduction <add>, %88, %cst_46 [1] : vector<8x16xf32> to vector<8xf32>
    %94 = vector.shape_cast %93 : vector<8xf32> to vector<8x1xf32>
    %cst_47 = arith.constant 1.600000e+01 : f32
    %95 = vector.broadcast %cst_47 : f32 to vector<8x1xf32>
    %96 = arith.divf %94, %95 : vector<8x1xf32>
    %97 = vector.broadcast %96 : vector<8x1xf32> to vector<8x16xf32>
    %98 = arith.subf %88, %97 : vector<8x16xf32>
    %99 = arith.mulf %98, %98 : vector<8x16xf32>
    %cst_48 = arith.constant dense<0.000000e+00> : vector<8xf32>
    %100 = vector.multi_reduction <add>, %99, %cst_48 [1] : vector<8x16xf32> to vector<8xf32>
    %101 = vector.shape_cast %100 : vector<8xf32> to vector<8x1xf32>
    %cst_49 = arith.constant 1.600000e+01 : f32
    %102 = vector.broadcast %cst_49 : f32 to vector<8x1xf32>
    %103 = arith.divf %101, %102 : vector<8x1xf32>
    %104 = vector.broadcast %96 : vector<8x1xf32> to vector<8x16xf32>
    %105 = arith.subf %88, %104 : vector<8x16xf32>
    %cst_50 = arith.constant 9.99999974E-6 : f32
    %106 = vector.broadcast %cst_50 : f32 to vector<8x1xf32>
    %107 = arith.addf %103, %106 : vector<8x1xf32>
    %108 = math.rsqrt %107 : vector<8x1xf32>
    %109 = vector.broadcast %108 : vector<8x1xf32> to vector<8x16xf32>
    %110 = arith.mulf %105, %109 : vector<8x16xf32>
    %111 = vector.broadcast %90 : vector<1x16xf32> to vector<8x16xf32>
    %112 = arith.mulf %110, %111 : vector<8x16xf32>
    %113 = vector.broadcast %92 : vector<1x16xf32> to vector<8x16xf32>
    %114 = arith.addf %112, %113 : vector<8x16xf32>
    %c0_51 = arith.constant 0 : index
    %c0_52 = arith.constant 0 : index
    %115 = vector.load %arg10[%c0_51, %c0_52] : memref<48x16xbf16, #tpu.memory_space<vmem>>, vector<48x16xbf16>
    %c0_53 = arith.constant 0 : index
    %c0_54 = arith.constant 0 : index
    %116 = vector.load %arg11[%c0_53, %c0_54] : memref<1x16xf32, #tpu.memory_space<vmem>>, vector<1x16xf32>
    %cst_55 = arith.constant 0.000000e+00 : f32
    %117 = vector.broadcast %cst_55 : f32 to vector<1x16xf32>
    %118 = tpu.concatenate %117, %114, %117 in 0 : vector<1x16xf32>, vector<8x16xf32>, vector<1x16xf32> -> vector<10x16xf32>
    %119 = vector.extract_strided_slice %118 {offsets = [0, 0], sizes = [8, 16], strides = [1, 1]} : vector<10x16xf32> to vector<8x16xf32>
    %120 = vector.extract_strided_slice %118 {offsets = [1, 0], sizes = [8, 16], strides = [1, 1]} : vector<10x16xf32> to vector<8x16xf32>
    %121 = vector.extract_strided_slice %118 {offsets = [2, 0], sizes = [8, 16], strides = [1, 1]} : vector<10x16xf32> to vector<8x16xf32>
    %122 = tpu.concatenate %119, %120, %121 in 1 : vector<8x16xf32>, vector<8x16xf32>, vector<8x16xf32> -> vector<8x48xf32>
    %123 = arith.truncf %122 : vector<8x48xf32> to vector<8x48xbf16>
    %cst_56 = arith.constant dense<0.000000e+00> : vector<8x16xf32>
    %124 = tpu.matmul %123, %115, %cst_56 {dimension_numbers = #tpu.dot_dimension_numbers<[1], [0], [0], [1], [0, 0, 1, 1], [], []>} : vector<8x48xbf16>, vector<48x16xbf16>, vector<8x16xf32> -> vector<8x16xf32>
    %125 = vector.broadcast %116 : vector<1x16xf32> to vector<8x16xf32>
    %126 = arith.addf %124, %125 : vector<8x16xf32>
    %c0_57 = arith.constant 0 : index
    %c0_58 = arith.constant 0 : index
    %127 = vector.load %arg24[%c0_57, %c0_58] : memref<8x16xf32, #tpu.memory_space<vmem>>, vector<8x16xf32>
    tpu.vector_store %arg24[%c0_57, %c0_58], %126 {strides = array<i32>} : memref<8x16xf32, #tpu.memory_space<vmem>>, vector<8x16xf32>,
    %c0_59 = arith.constant 0 : index
    %c0_60 = arith.constant 0 : index
    %128 = tpu.strided_load %arg24[%c0_59, %c0_60] {strides = array<i32: 2, 1>} : memref<8x16xf32, #tpu.memory_space<vmem>>, vector<4x16xf32>
    %c0_61 = arith.constant 0 : index
    %c0_62 = arith.constant 0 : index
    %129 = vector.load %arg12[%c0_61, %c0_62] : memref<1x16xf32, #tpu.memory_space<vmem>>, vector<1x16xf32>
    %c0_63 = arith.constant 0 : index
    %c0_64 = arith.constant 0 : index
    %130 = vector.load %arg13[%c0_63, %c0_64] : memref<1x16xf32, #tpu.memory_space<vmem>>, vector<1x16xf32>
    %cst_65 = arith.constant dense<0.000000e+00> : vector<4xf32>
    %131 = vector.multi_reduction <add>, %128, %cst_65 [1] : vector<4x16xf32> to vector<4xf32>
    %132 = vector.shape_cast %131 : vector<4xf32> to vector<4x1xf32>
    %cst_66 = arith.constant 1.600000e+01 : f32
    %133 = vector.broadcast %cst_66 : f32 to vector<4x1xf32>
    %134 = arith.divf %132, %133 : vector<4x1xf32>
    %135 = vector.broadcast %134 : vector<4x1xf32> to vector<4x16xf32>
    %136 = arith.subf %128, %135 : vector<4x16xf32>
    %137 = arith.mulf %136, %136 : vector<4x16xf32>
    %cst_67 = arith.constant dense<0.000000e+00> : vector<4xf32>
    %138 = vector.multi_reduction <add>, %137, %cst_67 [1] : vector<4x16xf32> to vector<4xf32>
    %139 = vector.shape_cast %138 : vector<4xf32> to vector<4x1xf32>
    %cst_68 = arith.constant 1.600000e+01 : f32
    %140 = vector.broadcast %cst_68 : f32 to vector<4x1xf32>
    %141 = arith.divf %139, %140 : vector<4x1xf32>
    %142 = vector.broadcast %134 : vector<4x1xf32> to vector<4x16xf32>
    %143 = arith.subf %128, %142 : vector<4x16xf32>
    %cst_69 = arith.constant 9.99999974E-6 : f32
    %144 = vector.broadcast %cst_69 : f32 to vector<4x1xf32>
    %145 = arith.addf %141, %144 : vector<4x1xf32>
    %146 = math.rsqrt %145 : vector<4x1xf32>
    %147 = vector.broadcast %146 : vector<4x1xf32> to vector<4x16xf32>
    %148 = arith.mulf %143, %147 : vector<4x16xf32>
    %149 = vector.broadcast %129 : vector<1x16xf32> to vector<4x16xf32>
    %150 = arith.mulf %148, %149 : vector<4x16xf32>
    %151 = vector.broadcast %130 : vector<1x16xf32> to vector<4x16xf32>
    %152 = arith.addf %150, %151 : vector<4x16xf32>
    %153 = arith.mulf %152, %152 : vector<4x16xf32>
    %154 = arith.mulf %152, %153 : vector<4x16xf32>
    %cst_70 = arith.constant 4.471500e-02 : f32
    %155 = vector.broadcast %cst_70 : f32 to vector<4x16xf32>
    %156 = arith.mulf %155, %154 : vector<4x16xf32>
    %157 = arith.addf %152, %156 : vector<4x16xf32>
    %cst_71 = arith.constant 0.797884583 : f32
    %158 = vector.broadcast %cst_71 : f32 to vector<4x16xf32>
    %159 = arith.mulf %158, %157 : vector<4x16xf32>
    %160 = math.tanh %159 : vector<4x16xf32>
    %cst_72 = arith.constant 1.000000e+00 : f32
    %161 = vector.broadcast %cst_72 : f32 to vector<4x16xf32>
    %162 = arith.addf %161, %160 : vector<4x16xf32>
    %cst_73 = arith.constant 5.000000e-01 : f32
    %163 = vector.broadcast %cst_73 : f32 to vector<4x16xf32>
    %164 = arith.mulf %163, %162 : vector<4x16xf32>
    %165 = arith.mulf %152, %164 : vector<4x16xf32>
    %c0_74 = arith.constant 0 : index
    %c0_75 = arith.constant 0 : index
    %166 = vector.load %arg14[%c0_74, %c0_75] : memref<4x16xf32, #tpu.memory_space<vmem>>, vector<4x16xf32>
    %167 = arith.addf %165, %166 : vector<4x16xf32>
    %c0_76 = arith.constant 0 : index
    %c0_77 = arith.constant 0 : index
    %c0_78 = arith.constant 0 : index
    %168 = vector.load %arg15[%c0_76, %c0_77, %c0_78] : memref<2x1x16xf32, #tpu.memory_space<vmem>>, vector<1x1x16xf32>
    %169 = vector.shape_cast %168 : vector<1x1x16xf32> to vector<1x16xf32>
    %c0_79 = arith.constant 0 : index
    %c0_80 = arith.constant 0 : index
    %c0_81 = arith.constant 0 : index
    %170 = vector.load %arg16[%c0_79, %c0_80, %c0_81] : memref<2x1x16xf32, #tpu.memory_space<vmem>>, vector<1x1x16xf32>
    %171 = vector.shape_cast %170 : vector<1x1x16xf32> to vector<1x16xf32>
    %cst_82 = arith.constant dense<0.000000e+00> : vector<4xf32>
    %172 = vector.multi_reduction <add>, %167, %cst_82 [1] : vector<4x16xf32> to vector<4xf32>
    %173 = vector.shape_cast %172 : vector<4xf32> to vector<4x1xf32>
    %cst_83 = arith.constant 1.600000e+01 : f32
    %174 = vector.broadcast %cst_83 : f32 to vector<4x1xf32>
    %175 = arith.divf %173, %174 : vector<4x1xf32>
    %176 = vector.broadcast %175 : vector<4x1xf32> to vector<4x16xf32>
    %177 = arith.subf %167, %176 : vector<4x16xf32>
    %178 = arith.mulf %177, %177 : vector<4x16xf32>
    %cst_84 = arith.constant dense<0.000000e+00> : vector<4xf32>
    %179 = vector.multi_reduction <add>, %178, %cst_84 [1] : vector<4x16xf32> to vector<4xf32>
    %180 = vector.shape_cast %179 : vector<4xf32> to vector<4x1xf32>
    %cst_85 = arith.constant 1.600000e+01 : f32
    %181 = vector.broadcast %cst_85 : f32 to vector<4x1xf32>
    %182 = arith.divf %180, %181 : vector<4x1xf32>
    %183 = vector.broadcast %175 : vector<4x1xf32> to vector<4x16xf32>
    %184 = arith.subf %167, %183 : vector<4x16xf32>
    %cst_86 = arith.constant 9.99999974E-6 : f32
    %185 = vector.broadcast %cst_86 : f32 to vector<4x1xf32>
    %186 = arith.addf %182, %185 : vector<4x1xf32>
    %187 = math.rsqrt %186 : vector<4x1xf32>
    %188 = vector.broadcast %187 : vector<4x1xf32> to vector<4x16xf32>
    %189 = arith.mulf %184, %188 : vector<4x16xf32>
    %190 = vector.broadcast %169 : vector<1x16xf32> to vector<4x16xf32>
    %191 = arith.mulf %189, %190 : vector<4x16xf32>
    %192 = vector.broadcast %171 : vector<1x16xf32> to vector<4x16xf32>
    %193 = arith.addf %191, %192 : vector<4x16xf32>
    %c0_87 = arith.constant 0 : index
    %c0_88 = arith.constant 0 : index
    %c0_89 = arith.constant 0 : index
    %194 = vector.load %arg17[%c0_87, %c0_88, %c0_89] : memref<2x48x16xbf16, #tpu.memory_space<vmem>>, vector<1x48x16xbf16>
    %195 = vector.shape_cast %194 : vector<1x48x16xbf16> to vector<48x16xbf16>
    %c0_90 = arith.constant 0 : index
    %c0_91 = arith.constant 0 : index
    %c0_92 = arith.constant 0 : index
    %196 = vector.load %arg18[%c0_90, %c0_91, %c0_92] : memref<2x1x16xf32, #tpu.memory_space<vmem>>, vector<1x1x16xf32>
    %197 = vector.shape_cast %196 : vector<1x1x16xf32> to vector<1x16xf32>
    %cst_93 = arith.constant 0.000000e+00 : f32
    %198 = vector.broadcast %cst_93 : f32 to vector<1x16xf32>
    %199 = tpu.concatenate %198, %193, %198 in 0 : vector<1x16xf32>, vector<4x16xf32>, vector<1x16xf32> -> vector<6x16xf32>
    %200 = vector.extract_strided_slice %199 {offsets = [0, 0], sizes = [4, 16], strides = [1, 1]} : vector<6x16xf32> to vector<4x16xf32>
    %201 = vector.extract_strided_slice %199 {offsets = [1, 0], sizes = [4, 16], strides = [1, 1]} : vector<6x16xf32> to vector<4x16xf32>
    %202 = vector.extract_strided_slice %199 {offsets = [2, 0], sizes = [4, 16], strides = [1, 1]} : vector<6x16xf32> to vector<4x16xf32>
    %203 = tpu.concatenate %200, %201, %202 in 1 : vector<4x16xf32>, vector<4x16xf32>, vector<4x16xf32> -> vector<4x48xf32>
    %204 = arith.truncf %203 : vector<4x48xf32> to vector<4x48xbf16>
    %cst_94 = arith.constant dense<0.000000e+00> : vector<4x16xf32>
    %205 = tpu.matmul %204, %195, %cst_94 {dimension_numbers = #tpu.dot_dimension_numbers<[1], [0], [0], [1], [0, 0, 1, 1], [], []>} : vector<4x48xbf16>, vector<48x16xbf16>, vector<4x16xf32> -> vector<4x16xf32>
    %206 = vector.broadcast %197 : vector<1x16xf32> to vector<4x16xf32>
    %207 = arith.addf %205, %206 : vector<4x16xf32>
    %208 = arith.mulf %207, %207 : vector<4x16xf32>
    %209 = arith.mulf %207, %208 : vector<4x16xf32>
    %cst_95 = arith.constant 4.471500e-02 : f32
    %210 = vector.broadcast %cst_95 : f32 to vector<4x16xf32>
    %211 = arith.mulf %210, %209 : vector<4x16xf32>
    %212 = arith.addf %207, %211 : vector<4x16xf32>
    %cst_96 = arith.constant 0.797884583 : f32
    %213 = vector.broadcast %cst_96 : f32 to vector<4x16xf32>
    %214 = arith.mulf %213, %212 : vector<4x16xf32>
    %215 = math.tanh %214 : vector<4x16xf32>
    %cst_97 = arith.constant 1.000000e+00 : f32
    %216 = vector.broadcast %cst_97 : f32 to vector<4x16xf32>
    %217 = arith.addf %216, %215 : vector<4x16xf32>
    %cst_98 = arith.constant 5.000000e-01 : f32
    %218 = vector.broadcast %cst_98 : f32 to vector<4x16xf32>
    %219 = arith.mulf %218, %217 : vector<4x16xf32>
    %220 = arith.mulf %207, %219 : vector<4x16xf32>
    %c0_99 = arith.constant 0 : index
    %c0_100 = arith.constant 0 : index
    %c0_101 = arith.constant 0 : index
    %221 = vector.load %arg19[%c0_99, %c0_100, %c0_101] : memref<2x16x16xbf16, #tpu.memory_space<vmem>>, vector<1x16x16xbf16>
    %222 = vector.shape_cast %221 : vector<1x16x16xbf16> to vector<16x16xbf16>
    %223 = arith.truncf %220 : vector<4x16xf32> to vector<4x16xbf16>
    %cst_102 = arith.constant dense<0.000000e+00> : vector<4x16xf32>
    %224 = tpu.matmul %223, %222, %cst_102 {dimension_numbers = #tpu.dot_dimension_numbers<[1], [0], [0], [1], [0, 0, 1, 1], [], []>} : vector<4x16xbf16>, vector<16x16xbf16>, vector<4x16xf32> -> vector<4x16xf32>
    %c0_103 = arith.constant 0 : index
    %c0_104 = arith.constant 0 : index
    %c0_105 = arith.constant 0 : index
    %225 = vector.load %arg20[%c0_103, %c0_104, %c0_105] : memref<2x1x16xf32, #tpu.memory_space<vmem>>, vector<1x1x16xf32>
    %226 = vector.shape_cast %225 : vector<1x1x16xf32> to vector<1x16xf32>
    %227 = vector.broadcast %226 : vector<1x16xf32> to vector<4x16xf32>
    %228 = arith.addf %224, %227 : vector<4x16xf32>
    %229 = arith.addf %167, %228 : vector<4x16xf32>
    %c1_106 = arith.constant 1 : index
    %c0_107 = arith.constant 0 : index
    %c0_108 = arith.constant 0 : index
    %230 = vector.load %arg15[%c1_106, %c0_107, %c0_108] : memref<2x1x16xf32, #tpu.memory_space<vmem>>, vector<1x1x16xf32>
    %231 = vector.shape_cast %230 : vector<1x1x16xf32> to vector<1x16xf32>
    %c1_109 = arith.constant 1 : index
    %c0_110 = arith.constant 0 : index
    %c0_111 = arith.constant 0 : index
    %232 = vector.load %arg16[%c1_109, %c0_110, %c0_111] : memref<2x1x16xf32, #tpu.memory_space<vmem>>, vector<1x1x16xf32>
    %233 = vector.shape_cast %232 : vector<1x1x16xf32> to vector<1x16xf32>
    %cst_112 = arith.constant dense<0.000000e+00> : vector<4xf32>
    %234 = vector.multi_reduction <add>, %229, %cst_112 [1] : vector<4x16xf32> to vector<4xf32>
    %235 = vector.shape_cast %234 : vector<4xf32> to vector<4x1xf32>
    %cst_113 = arith.constant 1.600000e+01 : f32
    %236 = vector.broadcast %cst_113 : f32 to vector<4x1xf32>
    %237 = arith.divf %235, %236 : vector<4x1xf32>
    %238 = vector.broadcast %237 : vector<4x1xf32> to vector<4x16xf32>
    %239 = arith.subf %229, %238 : vector<4x16xf32>
    %240 = arith.mulf %239, %239 : vector<4x16xf32>
    %cst_114 = arith.constant dense<0.000000e+00> : vector<4xf32>
    %241 = vector.multi_reduction <add>, %240, %cst_114 [1] : vector<4x16xf32> to vector<4xf32>
    %242 = vector.shape_cast %241 : vector<4xf32> to vector<4x1xf32>
    %cst_115 = arith.constant 1.600000e+01 : f32
    %243 = vector.broadcast %cst_115 : f32 to vector<4x1xf32>
    %244 = arith.divf %242, %243 : vector<4x1xf32>
    %245 = vector.broadcast %237 : vector<4x1xf32> to vector<4x16xf32>
    %246 = arith.subf %229, %245 : vector<4x16xf32>
    %cst_116 = arith.constant 9.99999974E-6 : f32
    %247 = vector.broadcast %cst_116 : f32 to vector<4x1xf32>
    %248 = arith.addf %244, %247 : vector<4x1xf32>
    %249 = math.rsqrt %248 : vector<4x1xf32>
    %250 = vector.broadcast %249 : vector<4x1xf32> to vector<4x16xf32>
    %251 = arith.mulf %246, %250 : vector<4x16xf32>
    %252 = vector.broadcast %231 : vector<1x16xf32> to vector<4x16xf32>
    %253 = arith.mulf %251, %252 : vector<4x16xf32>
    %254 = vector.broadcast %233 : vector<1x16xf32> to vector<4x16xf32>
    %255 = arith.addf %253, %254 : vector<4x16xf32>
    %c1_117 = arith.constant 1 : index
    %c0_118 = arith.constant 0 : index
    %c0_119 = arith.constant 0 : index
    %256 = vector.load %arg17[%c1_117, %c0_118, %c0_119] : memref<2x48x16xbf16, #tpu.memory_space<vmem>>, vector<1x48x16xbf16>
    %257 = vector.shape_cast %256 : vector<1x48x16xbf16> to vector<48x16xbf16>
    %c1_120 = arith.constant 1 : index
    %c0_121 = arith.constant 0 : index
    %c0_122 = arith.constant 0 : index
    %258 = vector.load %arg18[%c1_120, %c0_121, %c0_122] : memref<2x1x16xf32, #tpu.memory_space<vmem>>, vector<1x1x16xf32>
    %259 = vector.shape_cast %258 : vector<1x1x16xf32> to vector<1x16xf32>
    %cst_123 = arith.constant 0.000000e+00 : f32
    %260 = vector.broadcast %cst_123 : f32 to vector<1x16xf32>
    %261 = tpu.concatenate %260, %255, %260 in 0 : vector<1x16xf32>, vector<4x16xf32>, vector<1x16xf32> -> vector<6x16xf32>
    %262 = vector.extract_strided_slice %261 {offsets = [0, 0], sizes = [4, 16], strides = [1, 1]} : vector<6x16xf32> to vector<4x16xf32>
    %263 = vector.extract_strided_slice %261 {offsets = [1, 0], sizes = [4, 16], strides = [1, 1]} : vector<6x16xf32> to vector<4x16xf32>
    %264 = vector.extract_strided_slice %261 {offsets = [2, 0], sizes = [4, 16], strides = [1, 1]} : vector<6x16xf32> to vector<4x16xf32>
    %265 = tpu.concatenate %262, %263, %264 in 1 : vector<4x16xf32>, vector<4x16xf32>, vector<4x16xf32> -> vector<4x48xf32>
    %266 = arith.truncf %265 : vector<4x48xf32> to vector<4x48xbf16>
    %cst_124 = arith.constant dense<0.000000e+00> : vector<4x16xf32>
    %267 = tpu.matmul %266, %257, %cst_124 {dimension_numbers = #tpu.dot_dimension_numbers<[1], [0], [0], [1], [0, 0, 1, 1], [], []>} : vector<4x48xbf16>, vector<48x16xbf16>, vector<4x16xf32> -> vector<4x16xf32>
    %268 = vector.broadcast %259 : vector<1x16xf32> to vector<4x16xf32>
    %269 = arith.addf %267, %268 : vector<4x16xf32>
    %270 = arith.mulf %269, %269 : vector<4x16xf32>
    %271 = arith.mulf %269, %270 : vector<4x16xf32>
    %cst_125 = arith.constant 4.471500e-02 : f32
    %272 = vector.broadcast %cst_125 : f32 to vector<4x16xf32>
    %273 = arith.mulf %272, %271 : vector<4x16xf32>
    %274 = arith.addf %269, %273 : vector<4x16xf32>
    %cst_126 = arith.constant 0.797884583 : f32
    %275 = vector.broadcast %cst_126 : f32 to vector<4x16xf32>
    %276 = arith.mulf %275, %274 : vector<4x16xf32>
    %277 = math.tanh %276 : vector<4x16xf32>
    %cst_127 = arith.constant 1.000000e+00 : f32
    %278 = vector.broadcast %cst_127 : f32 to vector<4x16xf32>
    %279 = arith.addf %278, %277 : vector<4x16xf32>
    %cst_128 = arith.constant 5.000000e-01 : f32
    %280 = vector.broadcast %cst_128 : f32 to vector<4x16xf32>
    %281 = arith.mulf %280, %279 : vector<4x16xf32>
    %282 = arith.mulf %269, %281 : vector<4x16xf32>
    %c1_129 = arith.constant 1 : index
    %c0_130 = arith.constant 0 : index
    %c0_131 = arith.constant 0 : index
    %283 = vector.load %arg19[%c1_129, %c0_130, %c0_131] : memref<2x16x16xbf16, #tpu.memory_space<vmem>>, vector<1x16x16xbf16>
    %284 = vector.shape_cast %283 : vector<1x16x16xbf16> to vector<16x16xbf16>
    %285 = arith.truncf %282 : vector<4x16xf32> to vector<4x16xbf16>
    %cst_132 = arith.constant dense<0.000000e+00> : vector<4x16xf32>
    %286 = tpu.matmul %285, %284, %cst_132 {dimension_numbers = #tpu.dot_dimension_numbers<[1], [0], [0], [1], [0, 0, 1, 1], [], []>} : vector<4x16xbf16>, vector<16x16xbf16>, vector<4x16xf32> -> vector<4x16xf32>
    %c1_133 = arith.constant 1 : index
    %c0_134 = arith.constant 0 : index
    %c0_135 = arith.constant 0 : index
    %287 = vector.load %arg20[%c1_133, %c0_134, %c0_135] : memref<2x1x16xf32, #tpu.memory_space<vmem>>, vector<1x1x16xf32>
    %288 = vector.shape_cast %287 : vector<1x1x16xf32> to vector<1x16xf32>
    %289 = vector.broadcast %288 : vector<1x16xf32> to vector<4x16xf32>
    %290 = arith.addf %286, %289 : vector<4x16xf32>
    %291 = arith.addf %229, %290 : vector<4x16xf32>
    %c0_136 = arith.constant 0 : index
    %c0_137 = arith.constant 0 : index
    %c0_138 = arith.constant 0 : index
    %292 = vector.load %arg2[%c0_136, %c0_137, %c0_138] : memref<1x1x16xf32, #tpu.memory_space<vmem>>, vector<1x1x16xf32>
    %293 = vector.shape_cast %292 : vector<1x1x16xf32> to vector<1x16xf32>
    %cst_139 = arith.constant 1.000000e+00 : f32
    %294 = vector.broadcast %cst_139 : f32 to vector<1x16xf32>
    %295 = arith.addf %294, %293 : vector<1x16xf32>
    %296 = vector.broadcast %295 : vector<1x16xf32> to vector<4x16xf32>
    %297 = arith.mulf %291, %296 : vector<4x16xf32>
    %c0_140 = arith.constant 0 : index
    %c0_141 = arith.constant 0 : index
    %c0_142 = arith.constant 0 : index
    %298 = vector.load %arg3[%c0_140, %c0_141, %c0_142] : memref<1x1x16xf32, #tpu.memory_space<vmem>>, vector<1x1x16xf32>
    %299 = vector.shape_cast %298 : vector<1x1x16xf32> to vector<1x16xf32>
    %300 = vector.broadcast %299 : vector<1x16xf32> to vector<4x16xf32>
    %301 = arith.addf %297, %300 : vector<4x16xf32>
    %c0_143 = arith.constant 0 : index
    %c0_144 = arith.constant 0 : index
    %302 = vector.load %arg21[%c0_143, %c0_144] : memref<1x16xf32, #tpu.memory_space<vmem>>, vector<1x16xf32>
    %c0_145 = arith.constant 0 : index
    %c0_146 = arith.constant 0 : index
    %303 = vector.load %arg22[%c0_145, %c0_146] : memref<1x16xf32, #tpu.memory_space<vmem>>, vector<1x16xf32>
    %cst_147 = arith.constant dense<0.000000e+00> : vector<4xf32>
    %304 = vector.multi_reduction <add>, %301, %cst_147 [1] : vector<4x16xf32> to vector<4xf32>
    %305 = vector.shape_cast %304 : vector<4xf32> to vector<4x1xf32>
    %cst_148 = arith.constant 1.600000e+01 : f32
    %306 = vector.broadcast %cst_148 : f32 to vector<4x1xf32>
    %307 = arith.divf %305, %306 : vector<4x1xf32>
    %308 = vector.broadcast %307 : vector<4x1xf32> to vector<4x16xf32>
    %309 = arith.subf %301, %308 : vector<4x16xf32>
    %310 = arith.mulf %309, %309 : vector<4x16xf32>
    %cst_149 = arith.constant dense<0.000000e+00> : vector<4xf32>
    %311 = vector.multi_reduction <add>, %310, %cst_149 [1] : vector<4x16xf32> to vector<4xf32>
    %312 = vector.shape_cast %311 : vector<4xf32> to vector<4x1xf32>
    %cst_150 = arith.constant 1.600000e+01 : f32
    %313 = vector.broadcast %cst_150 : f32 to vector<4x1xf32>
    %314 = arith.divf %312, %313 : vector<4x1xf32>
    %315 = vector.broadcast %307 : vector<4x1xf32> to vector<4x16xf32>
    %316 = arith.subf %301, %315 : vector<4x16xf32>
    %cst_151 = arith.constant 9.99999974E-6 : f32
    %317 = vector.broadcast %cst_151 : f32 to vector<4x1xf32>
    %318 = arith.addf %314, %317 : vector<4x1xf32>
    %319 = math.rsqrt %318 : vector<4x1xf32>
    %320 = vector.broadcast %319 : vector<4x1xf32> to vector<4x16xf32>
    %321 = arith.mulf %316, %320 : vector<4x16xf32>
    %322 = vector.broadcast %302 : vector<1x16xf32> to vector<4x16xf32>
    %323 = arith.mulf %321, %322 : vector<4x16xf32>
    %324 = vector.broadcast %303 : vector<1x16xf32> to vector<4x16xf32>
    %325 = arith.addf %323, %324 : vector<4x16xf32>
    %326 = tpu.transpose %325, [1, 0] : vector<4x16xf32> -> vector<16x4xf32>
    %c0_152 = arith.constant 0 : index
    %c0_153 = arith.constant 0 : index
    %c0_154 = arith.constant 0 : index
    %327 = vector.load %arg23[%c0_152, %c0_153, %c0_154] : memref<1x16x4xf32, #tpu.memory_space<vmem>>, vector<1x16x4xf32>
    %328 = vector.shape_cast %327 : vector<1x16x4xf32> to vector<16x4xf32>
    %329 = vector.shape_cast %326 : vector<16x4xf32> to vector<1x16x4xf32>
    tpu.vector_store %arg23[%c0_152, %c0_153, %c0_154], %329 {strides = array<i32>} : memref<1x16x4xf32, #tpu.memory_space<vmem>>, vector<1x16x4xf32>,
    return
  }
  func.func @transform_0(%arg0: i32) -> (i32, i32, i32) {
    %c0_i32 = arith.constant 0 : i32
    %c0_i32_0 = arith.constant 0 : i32
    %c0_i32_1 = arith.constant 0 : i32
    return %arg0, %c0_i32, %c0_i32_0 : i32, i32, i32
  }
  func.func @transform_1(%arg0: i32) -> (i32, i32, i32) {
    %c0_i32 = arith.constant 0 : i32
    %c0_i32_0 = arith.constant 0 : i32
    %c0_i32_1 = arith.constant 0 : i32
    return %arg0, %c0_i32, %c0_i32_0 : i32, i32, i32
  }
  func.func @transform_2(%arg0: i32) -> (i32, i32, i32) {
    %c0_i32 = arith.constant 0 : i32
    %c0_i32_0 = arith.constant 0 : i32
    %c0_i32_1 = arith.constant 0 : i32
    return %arg0, %c0_i32, %c0_i32_0 : i32, i32, i32
  }
  func.func @transform_3(%arg0: i32) -> (i32, i32) {
    %c0_i32 = arith.constant 0 : i32
    %c0_i32_0 = arith.constant 0 : i32
    %c0_i32_1 = arith.constant 0 : i32
    return %c0_i32, %c0_i32_0 : i32, i32
  }
  func.func @transform_4(%arg0: i32) -> (i32, i32) {
    %c0_i32 = arith.constant 0 : i32
    %c0_i32_0 = arith.constant 0 : i32
    %c0_i32_1 = arith.constant 0 : i32
    return %c0_i32, %c0_i32_0 : i32, i32
  }
  func.func @transform_5(%arg0: i32) -> (i32, i32, i32) {
    %c0_i32 = arith.constant 0 : i32
    %c0_i32_0 = arith.constant 0 : i32
    %c0_i32_1 = arith.constant 0 : i32
    %c0_i32_2 = arith.constant 0 : i32
    return %c0_i32, %c0_i32_0, %c0_i32_1 : i32, i32, i32
  }
  func.func @transform_6(%arg0: i32) -> (i32, i32, i32) {
    %c0_i32 = arith.constant 0 : i32
    %c0_i32_0 = arith.constant 0 : i32
    %c0_i32_1 = arith.constant 0 : i32
    %c0_i32_2 = arith.constant 0 : i32
    return %c0_i32, %c0_i32_0, %c0_i32_1 : i32, i32, i32
  }
  func.func @transform_7(%arg0: i32) -> (i32, i32, i32) {
    %c0_i32 = arith.constant 0 : i32
    %c0_i32_0 = arith.constant 0 : i32
    %c0_i32_1 = arith.constant 0 : i32
    %c0_i32_2 = arith.constant 0 : i32
    return %c0_i32, %c0_i32_0, %c0_i32_1 : i32, i32, i32
  }
  func.func @transform_8(%arg0: i32) -> (i32, i32, i32) {
    %c0_i32 = arith.constant 0 : i32
    %c0_i32_0 = arith.constant 0 : i32
    %c0_i32_1 = arith.constant 0 : i32
    %c0_i32_2 = arith.constant 0 : i32
    return %c0_i32, %c0_i32_0, %c0_i32_1 : i32, i32, i32
  }
  func.func @transform_9(%arg0: i32) -> (i32, i32) {
    %c0_i32 = arith.constant 0 : i32
    %c0_i32_0 = arith.constant 0 : i32
    %c0_i32_1 = arith.constant 0 : i32
    return %c0_i32, %c0_i32_0 : i32, i32
  }
  func.func @transform_10(%arg0: i32) -> (i32, i32) {
    %c0_i32 = arith.constant 0 : i32
    %c0_i32_0 = arith.constant 0 : i32
    %c0_i32_1 = arith.constant 0 : i32
    return %c0_i32, %c0_i32_0 : i32, i32
  }
  func.func @transform_11(%arg0: i32) -> (i32, i32) {
    %c0_i32 = arith.constant 0 : i32
    %c0_i32_0 = arith.constant 0 : i32
    %c0_i32_1 = arith.constant 0 : i32
    return %c0_i32, %c0_i32_0 : i32, i32
  }
  func.func @transform_12(%arg0: i32) -> (i32, i32) {
    %c0_i32 = arith.constant 0 : i32
    %c0_i32_0 = arith.constant 0 : i32
    %c0_i32_1 = arith.constant 0 : i32
    return %c0_i32, %c0_i32_0 : i32, i32
  }
  func.func @transform_13(%arg0: i32) -> (i32, i32) {
    %c0_i32 = arith.constant 0 : i32
    %c0_i32_0 = arith.constant 0 : i32
    %c0_i32_1 = arith.constant 0 : i32
    return %c0_i32, %c0_i32_0 : i32, i32
  }
  func.func @transform_14(%arg0: i32) -> (i32, i32, i32) {
    %c0_i32 = arith.constant 0 : i32
    %c0_i32_0 = arith.constant 0 : i32
    %c0_i32_1 = arith.constant 0 : i32
    %c0_i32_2 = arith.constant 0 : i32
    return %c0_i32, %c0_i32_0, %c0_i32_1 : i32, i32, i32
  }
  func.func @transform_15(%arg0: i32) -> (i32, i32, i32) {
    %c0_i32 = arith.constant 0 : i32
    %c0_i32_0 = arith.constant 0 : i32
    %c0_i32_1 = arith.constant 0 : i32
    %c0_i32_2 = arith.constant 0 : i32
    return %c0_i32, %c0_i32_0, %c0_i32_1 : i32, i32, i32
  }
  func.func @transform_16(%arg0: i32) -> (i32, i32, i32) {
    %c0_i32 = arith.constant 0 : i32
    %c0_i32_0 = arith.constant 0 : i32
    %c0_i32_1 = arith.constant 0 : i32
    %c0_i32_2 = arith.constant 0 : i32
    return %c0_i32, %c0_i32_0, %c0_i32_1 : i32, i32, i32
  }
  func.func @transform_17(%arg0: i32) -> (i32, i32, i32) {
    %c0_i32 = arith.constant 0 : i32
    %c0_i32_0 = arith.constant 0 : i32
    %c0_i32_1 = arith.constant 0 : i32
    %c0_i32_2 = arith.constant 0 : i32
    return %c0_i32, %c0_i32_0, %c0_i32_1 : i32, i32, i32
  }
  func.func @transform_18(%arg0: i32) -> (i32, i32, i32) {
    %c0_i32 = arith.constant 0 : i32
    %c0_i32_0 = arith.constant 0 : i32
    %c0_i32_1 = arith.constant 0 : i32
    %c0_i32_2 = arith.constant 0 : i32
    return %c0_i32, %c0_i32_0, %c0_i32_1 : i32, i32, i32
  }
  func.func @transform_19(%arg0: i32) -> (i32, i32, i32) {
    %c0_i32 = arith.constant 0 : i32
    %c0_i32_0 = arith.constant 0 : i32
    %c0_i32_1 = arith.constant 0 : i32
    %c0_i32_2 = arith.constant 0 : i32
    return %c0_i32, %c0_i32_0, %c0_i32_1 : i32, i32, i32
  }
  func.func @transform_20(%arg0: i32) -> (i32, i32) {
    %c0_i32 = arith.constant 0 : i32
    %c0_i32_0 = arith.constant 0 : i32
    %c0_i32_1 = arith.constant 0 : i32
    return %c0_i32, %c0_i32_0 : i32, i32
  }
  func.func @transform_21(%arg0: i32) -> (i32, i32) {
    %c0_i32 = arith.constant 0 : i32
    %c0_i32_0 = arith.constant 0 : i32
    %c0_i32_1 = arith.constant 0 : i32
    return %c0_i32, %c0_i32_0 : i32, i32
  }
  func.func @transform_22(%arg0: i32) -> (i32, i32, i32) {
    %c0_i32 = arith.constant 0 : i32
    %c0_i32_0 = arith.constant 0 : i32
    %c0_i32_1 = arith.constant 0 : i32
    return %arg0, %c0_i32, %c0_i32_0 : i32, i32, i32
  }
}

</mosaic_0001>

<bundles_post_ra>
// kernel: multi_scale_encoder_stack.3
= control target key start
LH: loop header
LB: loop body
LE: loop exit
PB: predicated region body
PF: predicated region fallthrough
CT: control target
= control target key end

     0   :  { %s704_s18 = smov 0   ;;  %s777_s0 = inlined_call_operand.vmem [shape: f32[2,4,16], index: 0, kind: input, shape index: {}]   ;;  %s778_s1 = inlined_call_operand.vmem [shape: bf16[28,8], index: 1, kind: input, shape index: {}]   ;;  %s779_s2 = inlined_call_operand.vmem [shape: f32[1,8], index: 2, kind: input, shape index: {}]   ;;  %s780_s3 = inlined_call_operand.vmem [shape: f32[1,8], index: 3, kind: input, shape index: {}]   ;;  %s781_s4 = inlined_call_operand.vmem [shape: f32[1,8], index: 4, kind: input, shape index: {}]   ;;  %s782_s5 = inlined_call_operand.vmem [shape: f32[2,8,16], index: 5, kind: output, shape index: {}]  }
   0x1 LB: > { %s576_s19 = sadd.s32 4294967295, %s664_s18   ;;  %p580_p0 = scmp.ge.s32.totalorder %s664_s18, 1  ;;  %s664_s18 = sphi %s704_s18, %s15_s18  }
   0x2   : > { %p186_p1 = scmp.lt.s32.totalorder %s664_s18, 3 }
   0x4   : > { %p187_p2 = pnand %p580_p0, %p186_p1 }
   0x5   : > { %p212_p3 = scmp.lt.s32.totalorder (!%p187_p2), %s576_s19, 1  ;;  %s666_s24 = smov (!%p187_p2), 8  }
   0x6   : > { %190 = sbr.rel (%p187_p2) target bundleno = 947 (0x3b3), region = 40  ;;  %s667_s25 = smov (!%p187_p2), 4  }
   0x7   : > { %s669_s28 = smov (!%p187_p2), 12   ;;  %s671_s6 = smov (!%p187_p2), 16  }
   0x8   : > { %s672_s7 = smov (!%p187_p2), 20   ;;  %s673_s8 = smov (!%p187_p2), 24  }
   0xb   : > { %s784_s19 = smov (!%p212_p3, %s576_s19), 1  ;;  %vm261_vm0 = vcmask 1042432   ;;  %vm284_vm1 = vcmask 1045504   ;;  %vm272_vm2 = vcmask 1046528   ;;  %vm296_vm3 = vcmask 1044480   ;;  %v649_v38 = vld [vmem:[%s778_s1] sm:$0xff]  }
   0xc   : > { %s581_s20 = sshll.u32 %s784_s19, 2  ;;  %vm308_vm4 = vcmask 1043456   ;;  %v648_v28 = vld [vmem:[%s778_s1 + $0x8] sm:$0x3f]   ;;  %v668_v31 = vmov 0.0   ;;  %vm670_vm5 = vmmov 0  }
   0xd   : > { %s215_s23 = scalar_lea.vmem %s777_s0, %s581_s20  ;;  %594 = vmatprep.subr.bf16.mxu0 %v668_v31  ;;  %v384_v35 = vsel %vm284_vm1, %v648_v28, 0  ;;  %598 = vmatprep.mubr.msk.bf16.mxu0 %vm670_vm5, %v668_v31  ;;  %vm331_vm6 = vcmask 1041408   ;;  %vm343_vm7 = vcmask 31744   ;;  %vm346_vm8 = vcmask 64512   ;;  %s582_s15 = sshll.u32 %s784_s19, 3 }
   0xe   : > { %v221_v0 = vld [vmem:[%s215_s23] sm:$0xf]  ;;  %595 = vmatpush3.bf16.msra.mxu0 %v384_v35  ;;  %vm349_vm9 = vcmask 97280   ;;  %vm352_vm10 = vcmask 130048   ;;  %vm355_vm11 = vcmask 162816   ;;  %vm358_vm12 = vcmask 195584   ;;  %s219_s20 = scalar_lea.vmem %s782_s5, %s582_s15 }
   0xf   : > { %222 = vxpose.xlu0.b32.start.end [1/1] (short) (narrow) %v221_v0, 16  ;;  %596 = vmatprep.subr.bf16.mxu0 %v668_v31  ;;  %vm379_vm13 = vcmask 228352  }
  0x12   : > { %597 = vmatpush3.bf16.msra.mxu0 %v649_v38 }
  0x8b   : > { %v238_v1 = vpop.trf.xlu0 }
  0x8c   : > { %v262_v2 = vrot.slane %v238_v1, 5 }
  0x8e   : > { %v719_v3 = vsel %vm261_vm0, 0.0, %v262_v2 }
  0x8f   : > { %v239_v4 = vpop.trf.xlu0  ;;  %v285_v8 = vrot.slane %v719_v3, 2  ;;  %v273_v9 = vrot.slane %v719_v3, 1  ;;  %v297_v14 = vrot.slane %v719_v3, 3  ;;  %v309_v27 = vrot.slane %v719_v3, 4 }
  0x90   : > { %v263_v5 = vrot.slane %v239_v4, 5  ;;  %v320_v36 = vrot.slane %v719_v3, 5  ;;  %v332_v43 = vrot.slane %v719_v3, 6 }
  0x92   : > { %v722_v6 = vsel %vm261_vm0, %v262_v2, %v263_v5  ;;  %v269_v7 = vsel %vm261_vm0, %v263_v5, 0.0 }
  0x93   : > { %v286_v10 = vrot.slane %v722_v6, 2  ;;  %v288_v11 = vrot.slane %v269_v7, 2  ;;  %v274_v12 = vrot.slane %v722_v6, 1  ;;  %v276_v13 = vrot.slane %v269_v7, 1 }
  0x94   : > { %v298_v15 = vrot.slane %v722_v6, 3  ;;  %v300_v16 = vrot.slane %v269_v7, 3  ;;  %v310_v23 = vrot.slane %v722_v6, 4  ;;  %v312_v26 = vrot.slane %v269_v7, 4 }
  0x95   : > { %v287_v17 = vsel %vm284_vm1, %v285_v8, %v286_v10  ;;  %v289_v18 = vsel %vm284_vm1, %v286_v10, %v288_v11  ;;  %v275_v19 = vsel %vm272_vm2, %v273_v9, %v274_v12  ;;  %v277_v20 = vsel %vm272_vm2, %v274_v12, %v276_v13 }
  0x96   : > { %v623_v21 = vpack.i.bf16 %v289_v18, %v287_v17  ;;  %v618_v22 = vpack.i.bf16 %v277_v20, %v275_v19  ;;  %v299_v24 = vsel %vm296_vm3, %v297_v14, %v298_v15  ;;  %v301_v25 = vsel %vm296_vm3, %v298_v15, %v300_v16  ;;  %v583_v15 = vld [vmem:[%s779_s2] ss:$0 sm:$0xff] }
  0x97   : > { %v628_v29 = vpack.i.bf16 %v301_v25, %v299_v24  ;;  %v311_v30 = vsel %vm308_vm4, %v309_v27, %v310_v23  ;;  %v313_v32 = vsel %vm308_vm4, %v310_v23, %v312_v26  ;;  %v321_v33 = vrot.slane %v722_v6, 5 }
  0x98   : > { %624 = vrot.lane.b32.xlu1 %v623_v21, %s666_s24  ;;  %619 = vrot.lane.b32.xlu0 %v618_v22, %s667_s25  ;;  %v323_v34 = vrot.slane %v269_v7, 5  ;;  %v633_v37 = vpack.i.bf16 %v313_v32, %v311_v30  ;;  %v333_v41 = vrot.slane %v722_v6, 6  ;;  %v335_v42 = vrot.slane %v269_v7, 6 }
  0x99   : > { %v322_v39 = vsel %vm261_vm0, %v320_v36, %v321_v33 }
  0x9a   : > { %v324_v40 = vsel %vm261_vm0, %v321_v33, %v323_v34  ;;  %v334_v45 = vsel %vm331_vm6, %v332_v43, %v333_v41  ;;  %v336_v46 = vsel %vm331_vm6, %v333_v41, %v335_v42 }
  0x9b   : > { %v638_v44 = vpack.i.bf16 %v324_v40, %v322_v39  ;;  %v643_v47 = vpack.i.bf16 %v336_v46, %v334_v45 }
  0x9c   : > { %629 = vrot.lane.b32.xlu1 %v628_v29, %s669_s28 }
  0xa0   : > { %634 = vrot.lane.b32.xlu1 %v633_v37, %s671_s6 }
  0xa4   : > { %639 = vrot.lane.b32.xlu1 %v638_v44, %s672_s7 }
  0xa8   : > { %644 = vrot.lane.b32.xlu1 %v643_v47, %s673_s8 }
 0x10a   : > { %v625_v48 = vpop.permute.xlu1 %624  ;;  %v620_v50 = vpop.permute.xlu0 %619 }
 0x10b   : > { %v622_v51 = vunpack.i.h.bf16 %v620_v50  ;;  %v621_v52 = vunpack.i.l.bf16 %v620_v50  ;;  %v627_v54 = vunpack.i.h.bf16 %v625_v48  ;;  %v626_v55 = vunpack.i.l.bf16 %v625_v48 }
 0x10d   : > { %v345_v56 = vsel %vm343_vm7, %v722_v6, %v622_v51  ;;  %v344_v57 = vsel %vm343_vm7, %v719_v3, %v621_v52 }
 0x10e   : > { %v630_v49 = vpop.permute.xlu1 %629  ;;  %v347_v1 = vsel %vm346_vm8, %v344_v57, %v626_v55  ;;  %v348_v2 = vsel %vm346_vm8, %v345_v56, %v627_v54 }
 0x10f   : > { %v632_v58 = vunpack.i.h.bf16 %v630_v49  ;;  %v631_v59 = vunpack.i.l.bf16 %v630_v49 }
 0x111   : > { %v350_v4 = vsel %vm349_vm9, %v347_v1, %v631_v59  ;;  %v351_v5 = vsel %vm349_vm9, %v348_v2, %v632_v58  ;;  %v587_v59 = vld [vmem:[%s780_s3] ss:$0 sm:$0xff] }
 0x112   : > { %v635_v53 = vpop.permute.xlu1 %634 }
 0x113   : > { %v637_v61 = vunpack.i.h.bf16 %v635_v53  ;;  %v636_v62 = vunpack.i.l.bf16 %v635_v53 }
 0x115   : > { %v353_v3 = vsel %vm352_vm10, %v350_v4, %v636_v62  ;;  %v354_v7 = vsel %vm352_vm10, %v351_v5, %v637_v61  ;;  %v588_v61 = vld [vmem:[%s781_s4] ss:$0 sm:$0xff] }
 0x116   : > { %v640_v60 = vpop.permute.xlu1 %639 }
 0x117   : > { %v642_v63 = vunpack.i.h.bf16 %v640_v60  ;;  %v641_v0 = vunpack.i.l.bf16 %v640_v60 }
 0x119   : > { %v356_v10 = vsel %vm355_vm11, %v353_v3, %v641_v0  ;;  %v357_v11 = vsel %vm355_vm11, %v354_v7, %v642_v63 }
 0x11a   : > { %v645_v6 = vpop.permute.xlu1 %644 }
 0x11b   : > { %v647_v8 = vunpack.i.h.bf16 %v645_v6  ;;  %v646_v9 = vunpack.i.l.bf16 %v645_v6 }
 0x11d   : > { %v359_v12 = vsel %vm358_vm12, %v356_v10, %v646_v9  ;;  %v360_v13 = vsel %vm358_vm12, %v357_v11, %v647_v8 }
 0x11e   : > { %v361_v14 = vpack.c.bf16 %v360_v13, %v359_v12 }
 0x120   : > { %599 = vmatmul.mubr.msk.bf16.vlgmr.msra.gmra.mxu0 %vm379_vm13, %v361_v14 }
 0x1e0   : > { %v420_v16 = vpop.f32.mrf.mxu0 }
 0x1e1   : > { %v421_v17 = vadd.f32 %v583_v15, %v420_v16 }
 0x1e2   : > { %v600_v18 = vpop.f32.mrf.mxu0 }
 0x1e3   : > { %v427_v19 = vmul.f32 %v421_v17, %v421_v17 }
 0x1e4   : > { %v423_v20 = vpop.f32.mrf.mxu0 }
 0x1e5   : > { %v429_v21 = vmul.f32 %v427_v19, %v421_v17  ;;  %v424_v22 = vadd.f32 %v583_v15, %v423_v20 }
 0x1e6   : > { %v601_v23 = vpop.f32.mrf.mxu0 }
 0x1e7   : > { %v431_v24 = vmul.f32 0.044715, %v429_v21  ;;  %v428_v25 = vmul.f32 %v424_v22, %v424_v22 }
 0x1e9   : > { %v433_v26 = vadd.f32 %v431_v24, %v421_v17  ;;  %v430_v27 = vmul.f32 %v428_v25, %v424_v22 }
 0x1eb   : > { %v432_v28 = vmul.f32 0.044715, %v430_v27  ;;  %v435_v29 = vmul.f32 0.7978846, %v433_v26 }
 0x1ed   : > { %v434_v30 = vadd.f32 %v432_v28, %v424_v22  ;;  %650 = vtanh.f32 %v435_v29 }
 0x1ef   : > { %v436_v31 = vmul.f32 0.7978846, %v434_v30 }
 0x1f1   : > { %652 = vtanh.f32 %v436_v31 }
 0x1fa   : > { %v651_v32 = vpop.eup %650 }
 0x1fb   : > { %v439_v33 = vadd.f32 1.0, %v651_v32 }
 0x1fd   : > { %v441_v34 = vmul.f32 0.5, %v439_v33 }
 0x1fe   : > { %v653_v35 = vpop.eup %652 }
 0x1ff   : > { %v443_v36 = vmul.f32 %v441_v34, %v421_v17  ;;  %v440_v37 = vadd.f32 1.0, %v653_v35 }
 0x201   : > { %v447_v38 = vsel %vm346_vm8, %v443_v36, 0.0  ;;  %v442_v39 = vmul.f32 0.5, %v440_v37 }
 0x202   : > { %448 = vadd.xlane.f32.xlu1 %v447_v38 }
 0x203   : > { %v444_v40 = vmul.f32 %v442_v39, %v424_v22 }
 0x205   : > { %v450_v41 = vsel %vm346_vm8, %v444_v40, 0.0 }
 0x206   : > { %451 = vadd.xlane.f32.xlu0 %v450_v41 }
 0x28b   : > { %v449_v42 = vpop.xlane.xlu1 %448 }
 0x28c   : > { %v454_v43 = vmul.f32 0.125, %v449_v42 }
 0x28e   : > { %v456_v44 = vsub.f32 %v443_v36, %v454_v43 }
 0x28f   : > { %v452_v45 = vpop.xlane.xlu0 %451 }
 0x290   : > { %v455_v46 = vmul.f32 0.125, %v452_v45  ;;  %v458_v47 = vmul.f32 %v456_v44, %v456_v44 }
 0x292   : > { %v457_v48 = vsub.f32 %v444_v40, %v455_v46  ;;  %v460_v49 = vsel %vm346_vm8, %v458_v47, 0.0 }
 0x293   : > { %461 = vadd.xlane.f32.xlu1 %v460_v49 }
 0x294   : > { %v459_v50 = vmul.f32 %v457_v48, %v457_v48 }
 0x296   : > { %v463_v51 = vsel %vm346_vm8, %v459_v50, 0.0 }
 0x297   : > { %464 = vadd.xlane.f32.xlu1 %v463_v51 }
 0x31c   : > { %v462_v52 = vpop.xlane.xlu1 %461 }
 0x31d   : > { %v466_v53 = vmul.f32 0.125, %v462_v52 }
 0x31f   : > { %v468_v54 = vadd.f32 1e-05, %v466_v53 }
 0x320   : > { %v465_v55 = vpop.xlane.xlu1 %464 }
 0x321   : > { %654 = vrsqrt.f32 %v468_v54  ;;  %v467_v56 = vmul.f32 0.125, %v465_v55 }
 0x323   : > { %v469_v57 = vadd.f32 1e-05, %v467_v56 }
 0x325   : > { %656 = vrsqrt.f32 %v469_v57 }
 0x32e   : > { %v655_v58 = vpop.eup %654 }
 0x32f   : > { %v472_v60 = vmul.f32 %v655_v58, %v456_v44 }
 0x331   : > { %v480_v62 = vmul.f32 %v587_v59, %v472_v60 }
 0x332   : > { %v657_v63 = vpop.eup %656 }
 0x333   : > { %v488_v0 = vadd.f32 %v588_v61, %v480_v62  ;;  %v473_v1 = vmul.f32 %v657_v63, %v457_v48 }
 0x335   : > { %490 = vxpose.xlu1.b32.start [1/2] (short) (narrow) %v488_v0, 8  ;;  %v481_v2 = vmul.f32 %v587_v59, %v473_v1 }
 0x337   : > { %v489_v4 = vadd.f32 %v588_v61, %v481_v2 }
 0x339   : > { %491 = vxpose.xlu1.b32.end [2/2] (short) (narrow) %v489_v4, 8 }
 0x3b1   : > { %v506_v5 = vpop.trf.xlu1 }
 0x3b2   : > { %522 = vst.msk [vmem:[%s219_s20] sm:$0xff] %vm352_vm10, %v506_v5 }
 0x3b3 PF: > { %s15_s18 = sadd.s32 1, %s664_s18  }
 0x3b4   : > { %p12_p4 = scmp.ge.s32.totalorder %s15_s18, 4  }
 0x3b6   :  { %14 = sbr.rel (!%p12_p4) target bundleno = 1 (0x1), region = 70 }

// kernel: multi_scale_encoder_stack.4
= control target key start
LH: loop header
LB: loop body
LE: loop exit
PB: predicated region body
PF: predicated region fallthrough
CT: control target
= control target key end

     0   :  { %s2603_s0 = inlined_call_operand.vmem [shape: f32[2,8,16], index: 0, kind: input, shape index: {}]   ;;  %s2604_s1 = inlined_call_operand.vmem [shape: f32[2,1,8], index: 1, kind: input, shape index: {}]   ;;  %s2605_s2 = inlined_call_operand.vmem [shape: f32[2,1,8], index: 2, kind: input, shape index: {}]   ;;  %s2606_s3 = inlined_call_operand.vmem [shape: bf16[2,24,8], index: 3, kind: input, shape index: {}]   ;;  %s2607_s4 = inlined_call_operand.vmem [shape: f32[2,1,8], index: 4, kind: input, shape index: {}]   ;;  %s2608_s5 = inlined_call_operand.vmem [shape: f32[2,1,8], index: 5, kind: input, shape index: {}]   ;;  %s2609_s6 = inlined_call_operand.vmem [shape: f32[2,1,8], index: 6, kind: input, shape index: {}]   ;;  %s2610_s7 = inlined_call_operand.vmem [shape: bf16[24,8], index: 7, kind: input, shape index: {}]   ;;  %s2611_s8 = inlined_call_operand.vmem [shape: f32[1,8], index: 8, kind: input, shape index: {}]   ;;  %s2612_s9 = inlined_call_operand.vmem [shape: f32[1,8], index: 9, kind: input, shape index: {}]   ;;  %s2613_s10 = inlined_call_operand.vmem [shape: f32[1,8], index: 10, kind: input, shape index: {}]   ;;  %s2614_s11 = inlined_call_operand.vmem [shape: f32[8,8], index: 11, kind: input, shape index: {}]   ;;  %s2615_s12 = inlined_call_operand.vmem [shape: f32[2,1,8], index: 12, kind: input, shape index: {}]   ;;  %s2616_s13 = inlined_call_operand.vmem [shape: f32[2,1,8], index: 13, kind: input, shape index: {}]   ;;  %s2617_s14 = inlined_call_operand.vmem [shape: bf16[2,56,8], index: 14, kind: input, shape index: {}]   ;;  %s2618_s15 = inlined_call_operand.vmem [shape: f32[2,1,8], index: 15, kind: input, shape index: {}]   ;;  %s2619_s16 = inlined_call_operand.vmem [shape: bf16[2,8,8], index: 16, kind: input, shape index: {}]   ;;  %s2620_s17 = inlined_call_operand.vmem [shape: f32[2,1,8], index: 17, kind: input, shape index: {}]   ;;  %s2621_s18 = inlined_call_operand.vmem [shape: bf16[8,8], index: 18, kind: input, shape index: {}]   ;;  %s2622_s19 = inlined_call_operand.vmem [shape: f32[1,8], index: 19, kind: input, shape index: {}]   ;;  %s2623_s20 = inlined_call_operand.vmem [shape: f32[1,8], index: 20, kind: input, shape index: {}]   ;;  %s2624_s21 = inlined_call_operand.vmem [shape: f32[1,8], index: 21, kind: input, shape index: {}]   ;;  %s2625_s22 = inlined_call_operand.vmem [shape: f32[2,8,8], index: 22, kind: output, shape index: {}]  }
   0x1   :  { %2638 = sst [smem:[#allocation3_spill]] %s2603_s0 }
   0x2   :  { %2639 = sst [smem:[#allocation4_spill]] %s2604_s1 }
   0x3   :  { %2640 = sst [smem:[#allocation5_spill]] %s2605_s2 }
   0x4   :  { %2641 = sst [smem:[#allocation6_spill]] %s2606_s3  ;;  %s2290_s3 = smov 0  }
   0x5   :  { %2642 = sst [smem:[#allocation7_spill]] %s2607_s4 }
   0x6   :  { %2643 = sst [smem:[#allocation8_spill]] %s2608_s5 }
   0x7   :  { %2644 = sst [smem:[#allocation9_spill]] %s2609_s6 }
   0x8 LB: > { %s1908_s28 = sadd.s32 4294967295, %s2165_s3   ;;  %p1912_p0 = scmp.ge.s32.totalorder %s2165_s3, 1  ;;  %s2165_s3 = sphi %s2290_s3, %s32_s3  }
   0x9   : > { %p627_p1 = scmp.lt.s32.totalorder %s2165_s3, 3 }
   0xb   : > { %p628_p2 = pnand %p1912_p0, %p627_p1 }
   0xc   : > { %p693_p3 = scmp.lt.s32.totalorder (!%p628_p2), %s1908_s28, 1  ;;  %s2645_s0 = sld [smem:[#allocation3_spill]] (!%p628_p2) }
   0xd   : > { %631 = sbr.rel (%p628_p2) target bundleno = 4343 (0x10f7), region = 108  ;;  %s2646_s24 = sld [smem:[#allocation6_spill]] (!%p628_p2) }
   0xe   : > { %s2637_s26 = smov (!%p628_p2), 16   ;;  %s2631_s2 = smov (!%p628_p2), 8  }
   0xf   : > { %s2647_s4 = sld [smem:[#allocation7_spill]] (!%p628_p2)  ;;  %s2633_s1 = smov (!%p628_p2), 40  }
  0x10   : > { %s2648_s6 = sld [smem:[#allocation8_spill]] (!%p628_p2)  ;;  %s2654_s5 = smov (!%p628_p2), 48  }
  0x11   : > { %s2649_s30 = sld [smem:[#allocation9_spill]] (!%p628_p2)  ;;  %s2655_s25 = smov (!%p628_p2), 40  }
  0x12   : > { %s2660_s28 = smov (!%p693_p3, %s1908_s28), 1  ;;  %vm808_vm0 = vcmask 1043456   ;;  %v2167_v2 = vmov 0.0   ;;  %vm747_vm1 = vcmask 1040384   ;;  %vm2168_vm2 = vmmov 0  }
  0x13   : > { %s2630_s29 = sshll.u32 %s2660_s28, 3  ;;  %v2115_v1 = vld [vmem:[%s2646_s24 + $0x8] ss:$0 sps:$4 sm:$0xff]   ;;  %2003 = vmatprep.subr.bf16.mxu0 %v2167_v2  ;;  %2011 = vmatprep.subr.bf16.mxu1 %v2167_v2  ;;  %v2116_v6 = vld [vmem:[%s2646_s24] sm:$0xff]   ;;  %vm770_vm3 = vcmask 1045504   ;;  %vm758_vm4 = vcmask 1046528  }
  0x14   : > { %s696_s23 = scalar_lea.vmem %s2645_s0, %s2630_s29  ;;  %v810_v3 = vsel %vm808_vm0, %v2115_v1, 0  ;;  %2007 = vmatprep.mubr.msk.bf16.mxu0 %vm2168_vm2, %v2167_v2  ;;  %2015 = vmatprep.mubr.msk.bf16.mxu1 %vm2168_vm2, %v2167_v2  ;;  %vm782_vm5 = vcmask 64512   ;;  %vm785_vm6 = vcmask 130048   ;;  %vm804_vm7 = vcmask 195584   ;;  %s2650_s29 = smov 8  }
  0x15   : > { %v708_v0 = vld [vmem:[%s696_s23] sm:$0xff]  ;;  %2004 = vmatpush3.bf16.msra.mxu0 %v810_v3  ;;  %vm1275_vm8 = vcmask 1042432   ;;  %vm1292_vm9 = vcmask 1044480   ;;  %s2635_s0 = smov 24   ;;  %vm1311_vm10 = vcmask 1041408   ;;  %s2634_s23 = smov 48  }
  0x16   : > { %709 = vxpose.xlu0.b32.start.end [1/1] (short) (narrow) %v708_v0, 16  ;;  %2005 = vmatprep.subr.bf16.mxu0 %v2167_v2  ;;  %v1915_v35 = vld [vmem:[%s2647_s4] ss:$0 sm:$0xff]  ;;  %vm1321_vm11 = vcmask 261120   ;;  %vm1323_vm12 = vcmask 326656   ;;  %vm1325_vm13 = vcmask 392192  }
  0x17   : > { %vm1355_vm14 = vcmask 457728  }
  0x19   : > { %2006 = vmatpush3.bf16.msra.mxu0 %v2116_v6 }
  0x1a   : > { %2019 = vmatprep.subr.bf16.mxu0 %v2167_v2 }
  0x92   : > { %v2313_v4 = vpop.trf.xlu0 }
  0x93   : > { %v748_v5 = vrot.slane %v2313_v4, 7 }
  0x95   : > { %v754_v7 = vsel %vm747_vm1, 0.0, %v748_v5 }
  0x96   : > { %v2322_v8 = vpop.trf.xlu0  ;;  %v759_v10 = vrot.slane %v754_v7, 1  ;;  %v771_v11 = vrot.slane %v754_v7, 2 }
  0x97   : > { %v749_v9 = vrot.slane %v2322_v8, 7 }
  0x99   : > { %v750_v12 = vsel %vm747_vm1, %v748_v5, %v749_v9  ;;  %v755_v13 = vsel %vm747_vm1, %v749_v9, 0.0 }
  0x9a   : > { %v760_v14 = vrot.slane %v750_v12, 1  ;;  %v762_v15 = vrot.slane %v755_v13, 1  ;;  %v774_v16 = vrot.slane %v755_v13, 2  ;;  %v772_v17 = vrot.slane %v750_v12, 2 }
  0x9c   : > { %v773_v18 = vsel %vm770_vm3, %v771_v11, %v772_v17  ;;  %v775_v19 = vsel %vm770_vm3, %v772_v17, %v774_v16  ;;  %v761_v20 = vsel %vm758_vm4, %v759_v10, %v760_v14  ;;  %v763_v21 = vsel %vm758_vm4, %v760_v14, %v762_v15  ;;  %v2117_v11 = vld [vmem:[%s2646_s24 + $0x14] ss:$0 sps:$4 sm:$0xff]  }
  0x9d   : > { %v2090_v22 = vpack.i.bf16 %v775_v19, %v773_v18  ;;  %v2085_v23 = vpack.i.bf16 %v763_v21, %v761_v20  ;;  %v1919_v20 = vld [vmem:[%s2648_s6] ss:$0 sm:$0xff] }
  0x9f   : > { %2091 = vrot.lane.b32.xlu1 %v2090_v22, %s2637_s26  ;;  %2086 = vrot.lane.b32.xlu0 %v2085_v23, %s2631_s2  ;;  %v1920_v22 = vld [vmem:[%s2649_s30] ss:$0 sm:$0xff] }
 0x111   : > { %v2092_v24 = vpop.permute.xlu1 %2091  ;;  %v2087_v25 = vpop.permute.xlu0 %2086 }
 0x112   : > { %v2094_v26 = vunpack.i.h.bf16 %v2092_v24  ;;  %v2093_v27 = vunpack.i.l.bf16 %v2092_v24  ;;  %v2089_v28 = vunpack.i.h.bf16 %v2087_v25  ;;  %v2088_v29 = vunpack.i.l.bf16 %v2087_v25 }
 0x114   : > { %v784_v30 = vsel %vm782_vm5, %v750_v12, %v2089_v28  ;;  %v783_v31 = vsel %vm782_vm5, %v754_v7, %v2088_v29  ;;  %v980_v12 = vsel %vm808_vm0, %v2117_v11, 0  ;;  %v2118_v29 = vld [vmem:[%s2646_s24 + $0xc] sm:$0xff]  }
 0x115   : > { %v786_v32 = vsel %vm785_vm6, %v783_v31, %v2093_v27  ;;  %v787_v33 = vsel %vm785_vm6, %v784_v30, %v2094_v26  ;;  %2012 = vmatpush3.bf16.msra.mxu1 %v980_v12 }
 0x116   : > { %v788_v34 = vpack.c.bf16 %v787_v33, %v786_v32  ;;  %2013 = vmatprep.subr.bf16.mxu1 %v2167_v2 }
 0x118   : > { %2008 = vmatmul.mubr.msk.bf16.vlgmr.msra.gmra.mxu0 %vm804_vm7, %v788_v34 }
 0x119   : > { %2023 = vmatprep.mubr.msk.bf16.mxu0 %vm2168_vm2, %v2167_v2  ;;  %2014 = vmatpush3.bf16.msra.mxu1 %v2118_v29 }
 0x11a   : > { %2027 = vmatprep.subr.bf16.mxu1 %v2167_v2 }
 0x1d8   : > { %v846_v36 = vpop.f32.mrf.mxu0 }
 0x1d9   : > { %v847_v37 = vadd.f32 %v1915_v35, %v846_v36 }
 0x1da   : > { %v2009_v38 = vpop.f32.mrf.mxu0 }
 0x1db   : > { %v853_v39 = vmul.f32 %v847_v37, %v847_v37 }
 0x1dc   : > { %v849_v40 = vpop.f32.mrf.mxu0 }
 0x1dd   : > { %v855_v41 = vmul.f32 %v853_v39, %v847_v37  ;;  %v850_v42 = vadd.f32 %v1915_v35, %v849_v40 }
 0x1de   : > { %v2010_v43 = vpop.f32.mrf.mxu0 }
 0x1df   : > { %v857_v44 = vmul.f32 0.044715, %v855_v41  ;;  %v854_v45 = vmul.f32 %v850_v42, %v850_v42 }
 0x1e1   : > { %v859_v46 = vadd.f32 %v857_v44, %v847_v37  ;;  %v856_v47 = vmul.f32 %v854_v45, %v850_v42 }
 0x1e3   : > { %v858_v48 = vmul.f32 0.044715, %v856_v47  ;;  %v861_v49 = vmul.f32 0.7978846, %v859_v46 }
 0x1e5   : > { %v860_v50 = vadd.f32 %v858_v48, %v850_v42  ;;  %2129 = vtanh.f32 %v861_v49 }
 0x1e7   : > { %v862_v51 = vmul.f32 0.7978846, %v860_v50 }
 0x1e9   : > { %2131 = vtanh.f32 %v862_v51 }
 0x1f2   : > { %v2130_v52 = vpop.eup %2129 }
 0x1f3   : > { %v865_v53 = vadd.f32 1.0, %v2130_v52 }
 0x1f5   : > { %v867_v54 = vmul.f32 0.5, %v865_v53 }
 0x1f6   : > { %v2132_v55 = vpop.eup %2131 }
 0x1f7   : > { %v869_v56 = vmul.f32 %v867_v54, %v847_v37  ;;  %v866_v57 = vadd.f32 1.0, %v2132_v55 }
 0x1f9   : > { %v873_v58 = vsel %vm782_vm5, %v869_v56, 0.0  ;;  %v868_v59 = vmul.f32 0.5, %v866_v57 }
 0x1fa   : > { %874 = vadd.xlane.f32.xlu1 %v873_v58  ;;  %v1925_v58 = vld [vmem:[%s2647_s4 + $0x1] ss:$0 sm:$0xff] }
 0x1fb   : > { %v870_v60 = vmul.f32 %v868_v59, %v850_v42 }
 0x1fd   : > { %v876_v61 = vsel %vm782_vm5, %v870_v60, 0.0 }
 0x1fe   : > { %877 = vadd.xlane.f32.xlu1 %v876_v61 }
 0x283   : > { %v875_v62 = vpop.xlane.xlu1 %874 }
 0x284   : > { %v880_v63 = vmul.f32 0.125, %v875_v62 }
 0x286   : > { %v882_v0 = vsub.f32 %v869_v56, %v880_v63 }
 0x287   : > { %v878_v1 = vpop.xlane.xlu1 %877 }
 0x288   : > { %v881_v3 = vmul.f32 0.125, %v878_v1  ;;  %v884_v5 = vmul.f32 %v882_v0, %v882_v0 }
 0x28a   : > { %v883_v6 = vsub.f32 %v870_v60, %v881_v3  ;;  %v886_v7 = vsel %vm782_vm5, %v884_v5, 0.0 }
 0x28b   : > { %887 = vadd.xlane.f32.xlu1 %v886_v7 }
 0x28c   : > { %v885_v9 = vmul.f32 %v883_v6, %v883_v6 }
 0x28e   : > { %v889_v10 = vsel %vm782_vm5, %v885_v9, 0.0 }
 0x28f   : > { %890 = vadd.xlane.f32.xlu1 %v889_v10 }
 0x314   : > { %v888_v13 = vpop.xlane.xlu1 %887 }
 0x315   : > { %v892_v14 = vmul.f32 0.125, %v888_v13 }
 0x317   : > { %v894_v15 = vadd.f32 1e-05, %v892_v14 }
 0x318   : > { %v891_v16 = vpop.xlane.xlu1 %890 }
 0x319   : > { %2133 = vrsqrt.f32 %v894_v15  ;;  %v893_v17 = vmul.f32 0.125, %v891_v16 }
 0x31b   : > { %v895_v18 = vadd.f32 1e-05, %v893_v17 }
 0x31d   : > { %2135 = vrsqrt.f32 %v895_v18 }
 0x326   : > { %v2134_v19 = vpop.eup %2133 }
 0x327   : > { %v898_v21 = vmul.f32 %v2134_v19, %v882_v0 }
 0x329   : > { %v906_v23 = vmul.f32 %v1919_v20, %v898_v21 }
 0x32a   : > { %v2136_v24 = vpop.eup %2135 }
 0x32b   : > { %v899_v25 = vmul.f32 %v2136_v24, %v883_v6  ;;  %v914_v26 = vadd.f32 %v1920_v22, %v906_v23 }
 0x32d   : > { %v907_v27 = vmul.f32 %v1919_v20, %v899_v25  ;;  %v924_v28 = vrot.slane %v914_v26, 7 }
 0x32f   : > { %v915_v30 = vadd.f32 %v1920_v22, %v907_v27  ;;  %v930_v31 = vsel %vm747_vm1, 0.0, %v924_v28 }
 0x330   : > { %v945_v35 = vrot.slane %v930_v31, 2  ;;  %v934_v36 = vrot.slane %v930_v31, 1 }
 0x331   : > { %v925_v32 = vrot.slane %v915_v30, 7 }
 0x333   : > { %v926_v33 = vsel %vm747_vm1, %v924_v28, %v925_v32  ;;  %v931_v34 = vsel %vm747_vm1, %v925_v32, 0.0 }
 0x334   : > { %v946_v37 = vrot.slane %v926_v33, 2  ;;  %v948_v38 = vrot.slane %v931_v34, 2  ;;  %v935_v39 = vrot.slane %v926_v33, 1  ;;  %v937_v40 = vrot.slane %v931_v34, 1  ;;  %v2119_v34 = vld [vmem:[%s2610_s7 + $0x8] ss:$0 sps:$4 sm:$0xff]  }
 0x336   : > { %v947_v41 = vsel %vm770_vm3, %v945_v35, %v946_v37  ;;  %v949_v42 = vsel %vm770_vm3, %v946_v37, %v948_v38  ;;  %v936_v43 = vsel %vm758_vm4, %v934_v36, %v935_v39  ;;  %v938_v44 = vsel %vm758_vm4, %v935_v39, %v937_v40 }
 0x337   : > { %v2100_v45 = vpack.i.bf16 %v949_v42, %v947_v41  ;;  %v2095_v46 = vpack.i.bf16 %v938_v44, %v936_v43  ;;  %v1149_v35 = vsel %vm808_vm0, %v2119_v34, 0  ;;  %v1931_v43 = vld [vmem:[%s2648_s6 + $0x1] ss:$0 sm:$0xff] }
 0x338   : > { %2020 = vmatpush3.bf16.msra.mxu0 %v1149_v35 }
 0x339   : > { %2101 = vrot.lane.b32.xlu1 %v2100_v45, %s2637_s26  ;;  %2096 = vrot.lane.b32.xlu0 %v2095_v46, %s2631_s2  ;;  %v1932_v45 = vld [vmem:[%s2649_s30 + $0x1] ss:$0 sm:$0xff] }
 0x33a   : > { %2021 = vmatprep.subr.bf16.mxu0 %v2167_v2 }
 0x3ab   : > { %v2102_v47 = vpop.permute.xlu1 %2101  ;;  %v2097_v48 = vpop.permute.xlu0 %2096 }
 0x3ac   : > { %v2104_v49 = vunpack.i.h.bf16 %v2102_v47  ;;  %v2103_v50 = vunpack.i.l.bf16 %v2102_v47  ;;  %v2099_v51 = vunpack.i.h.bf16 %v2097_v48  ;;  %v2098_v52 = vunpack.i.l.bf16 %v2097_v48 }
 0x3ae   : > { %v957_v53 = vsel %vm782_vm5, %v926_v33, %v2099_v51  ;;  %v956_v54 = vsel %vm782_vm5, %v930_v31, %v2098_v52  ;;  %v2120_v52 = vld [vmem:[%s2610_s7] sm:$0xff]  }
 0x3af   : > { %v958_v55 = vsel %vm785_vm6, %v956_v54, %v2103_v50  ;;  %v959_v56 = vsel %vm785_vm6, %v957_v53, %v2104_v49  ;;  %2022 = vmatpush3.bf16.msra.mxu0 %v2120_v52 }
 0x3b0   : > { %v960_v57 = vpack.c.bf16 %v959_v56, %v958_v55  ;;  %2039 = vmatprep.subr.bf16.mxu0 %v2167_v2 }
 0x3b2   : > { %2016 = vmatmul.mubr.msk.bf16.vlgmr.msra.gmra.mxu1 %vm804_vm7, %v960_v57 }
 0x3b3   : > { %2035 = vmatprep.mubr.msk.bf16.mxu1 %vm2168_vm2, %v2167_v2 }
 0x472   : > { %v1016_v59 = vpop.f32.mrf.mxu1 }
 0x473   : > { %v1017_v60 = vadd.f32 %v1925_v58, %v1016_v59 }
 0x474   : > { %v2017_v61 = vpop.f32.mrf.mxu1 }
 0x475   : > { %v1023_v62 = vmul.f32 %v1017_v60, %v1017_v60 }
 0x476   : > { %v1019_v63 = vpop.f32.mrf.mxu1 }
 0x477   : > { %v1025_v0 = vmul.f32 %v1023_v62, %v1017_v60  ;;  %v1020_v1 = vadd.f32 %v1925_v58, %v1019_v63 }
 0x478   : > { %v2018_v3 = vpop.f32.mrf.mxu1 }
 0x479   : > { %v1027_v5 = vmul.f32 0.044715, %v1025_v0  ;;  %v1024_v6 = vmul.f32 %v1020_v1, %v1020_v1 }
 0x47b   : > { %v1029_v7 = vadd.f32 %v1027_v5, %v1017_v60  ;;  %v1026_v9 = vmul.f32 %v1024_v6, %v1020_v1 }
 0x47d   : > { %v1028_v10 = vmul.f32 0.044715, %v1026_v9  ;;  %v1031_v11 = vmul.f32 0.7978846, %v1029_v7 }
 0x47f   : > { %v1030_v12 = vadd.f32 %v1028_v10, %v1020_v1  ;;  %2137 = vtanh.f32 %v1031_v11 }
 0x481   : > { %v1032_v13 = vmul.f32 0.7978846, %v1030_v12 }
 0x483   : > { %2139 = vtanh.f32 %v1032_v13 }
 0x48c   : > { %v2138_v14 = vpop.eup %2137 }
 0x48d   : > { %v1035_v15 = vadd.f32 1.0, %v2138_v14 }
 0x48f   : > { %v1037_v16 = vmul.f32 0.5, %v1035_v15 }
 0x490   : > { %v2140_v17 = vpop.eup %2139 }
 0x491   : > { %v1039_v18 = vmul.f32 %v1037_v16, %v1017_v60  ;;  %v1036_v19 = vadd.f32 1.0, %v2140_v17 }
 0x493   : > { %v1045_v20 = vsel %vm782_vm5, %v1039_v18, 0.0  ;;  %v1038_v21 = vmul.f32 0.5, %v1036_v19 }
 0x494   : > { %1046 = vadd.xlane.f32.xlu0 %v1045_v20  ;;  %v1933_v20 = vld [vmem:[%s2611_s8] ss:$0 sm:$0xff] }
 0x495   : > { %v1040_v22 = vmul.f32 %v1038_v21, %v1020_v1 }
 0x497   : > { %v1048_v23 = vsel %vm782_vm5, %v1040_v22, 0.0 }
 0x498   : > { %1049 = vadd.xlane.f32.xlu1 %v1048_v23 }
 0x51d   : > { %v1047_v24 = vpop.xlane.xlu0 %1046 }
 0x51e   : > { %v1051_v25 = vmul.f32 0.125, %v1047_v24 }
 0x520   : > { %v1053_v26 = vsub.f32 %v1039_v18, %v1051_v25 }
 0x521   : > { %v1050_v27 = vpop.xlane.xlu1 %1049 }
 0x522   : > { %v1052_v28 = vmul.f32 0.125, %v1050_v27  ;;  %v1055_v29 = vmul.f32 %v1053_v26, %v1053_v26 }
 0x524   : > { %v1054_v30 = vsub.f32 %v1040_v22, %v1052_v28  ;;  %v1057_v31 = vsel %vm782_vm5, %v1055_v29, 0.0 }
 0x525   : > { %1058 = vadd.xlane.f32.xlu0 %v1057_v31 }
 0x526   : > { %v1056_v32 = vmul.f32 %v1054_v30, %v1054_v30 }
 0x528   : > { %v1060_v33 = vsel %vm782_vm5, %v1056_v32, 0.0 }
 0x529   : > { %1061 = vadd.xlane.f32.xlu0 %v1060_v33 }
 0x5ae   : > { %v1059_v36 = vpop.xlane.xlu0 %1058 }
 0x5af   : > { %v1063_v37 = vmul.f32 0.125, %v1059_v36 }
 0x5b1   : > { %v1065_v38 = vadd.f32 1e-05, %v1063_v37 }
 0x5b2   : > { %v1062_v39 = vpop.xlane.xlu0 %1061 }
 0x5b3   : > { %2141 = vrsqrt.f32 %v1065_v38  ;;  %v1064_v40 = vmul.f32 0.125, %v1062_v39  ;;  %v1937_v38 = vld [vmem:[%s2612_s9] ss:$0 sm:$0xff] }
 0x5b5   : > { %v1066_v41 = vadd.f32 1e-05, %v1064_v40  ;;  %v1938_v40 = vld [vmem:[%s2613_s10] ss:$0 sm:$0xff] }
 0x5b7   : > { %2143 = vrsqrt.f32 %v1066_v41 }
 0x5c0   : > { %v2142_v42 = vpop.eup %2141 }
 0x5c1   : > { %v1069_v44 = vmul.f32 %v2142_v42, %v1053_v26 }
 0x5c3   : > { %v1077_v46 = vmul.f32 %v1931_v43, %v1069_v44 }
 0x5c4   : > { %v2144_v47 = vpop.eup %2143 }
 0x5c5   : > { %v1070_v48 = vmul.f32 %v2144_v47, %v1054_v30  ;;  %v1085_v49 = vadd.f32 %v1932_v45, %v1077_v46 }
 0x5c7   : > { %v1078_v50 = vmul.f32 %v1931_v43, %v1070_v48  ;;  %v1093_v51 = vrot.slane %v1085_v49, 7 }
 0x5c9   : > { %v1086_v53 = vadd.f32 %v1932_v45, %v1078_v50  ;;  %v1099_v54 = vsel %vm747_vm1, 0.0, %v1093_v51 }
 0x5ca   : > { %v1114_v58 = vrot.slane %v1099_v54, 2  ;;  %v1103_v59 = vrot.slane %v1099_v54, 1 }
 0x5cb   : > { %v1094_v55 = vrot.slane %v1086_v53, 7 }
 0x5cd   : > { %v1095_v56 = vsel %vm747_vm1, %v1093_v51, %v1094_v55  ;;  %v1100_v57 = vsel %vm747_vm1, %v1094_v55, 0.0  ;;  %v1233_v51 = vld [vmem:[%s2614_s11] sm:$0xff] }
 0x5ce   : > { %v1115_v60 = vrot.slane %v1095_v56, 2  ;;  %v1117_v61 = vrot.slane %v1100_v57, 2  ;;  %v1104_v62 = vrot.slane %v1095_v56, 1  ;;  %v1106_v63 = vrot.slane %v1100_v57, 1 }
 0x5d0   : > { %v1116_v0 = vsel %vm770_vm3, %v1114_v58, %v1115_v60  ;;  %v1118_v1 = vsel %vm770_vm3, %v1115_v60, %v1117_v61  ;;  %v1105_v3 = vsel %vm758_vm4, %v1103_v59, %v1104_v62  ;;  %v1107_v5 = vsel %vm758_vm4, %v1104_v62, %v1106_v63  ;;  %v2121_v60 = vld [vmem:[%s2617_s14 + $0x18] ss:$0 sps:$4 sm:$0xff]  }
 0x5d1   : > { %v2110_v6 = vpack.i.bf16 %v1118_v1, %v1116_v0  ;;  %v2105_v7 = vpack.i.bf16 %v1107_v5, %v1105_v3  ;;  %v1360_v61 = vsel %vm808_vm0, %v2121_v60, 0  ;;  %v1939_v3 = vld [vmem:[%s2615_s12] ss:$0 sm:$0xff]  ;;  %v2122_v5 = vld [vmem:[%s2617_s14 + $0x10] sm:$0xff]  }
 0x5d2   : > { %2028 = vmatpush3.bf16.msra.mxu1 %v1360_v61 }
 0x5d3   : > { %2111 = vrot.lane.b32.xlu1 %v2110_v6, %s2637_s26  ;;  %2106 = vrot.lane.b32.xlu0 %v2105_v7, %s2631_s2  ;;  %v1940_v7 = vld [vmem:[%s2616_s13] ss:$0 sm:$0xff]  ;;  %s2636_s2 = smov 32  }
 0x5d4   : > { %2029 = vmatprep.subr.bf16.mxu1 %v2167_v2 }
 0x5d6   : > { %2030 = vmatpush3.bf16.msra.mxu1 %v2122_v5 }
 0x5d7   : > { %2031 = vmatprep.subr.bf16.mxu1 %v2167_v2 }
 0x645   : > { %v2112_v9 = vpop.permute.xlu1 %2111  ;;  %v2107_v10 = vpop.permute.xlu0 %2106 }
 0x646   : > { %v2114_v11 = vunpack.i.h.bf16 %v2112_v9  ;;  %v2113_v12 = vunpack.i.l.bf16 %v2112_v9  ;;  %v2109_v13 = vunpack.i.h.bf16 %v2107_v10  ;;  %v2108_v14 = vunpack.i.l.bf16 %v2107_v10  ;;  %v2123_v10 = vld [vmem:[%s2617_s14 + $0x8] sm:$0xff]  }
 0x647   : > { %2032 = vmatpush3.bf16.msra.mxu1 %v2123_v10 }
 0x648   : > { %v1126_v15 = vsel %vm782_vm5, %v1095_v56, %v2109_v13  ;;  %v1125_v16 = vsel %vm782_vm5, %v1099_v54, %v2108_v14  ;;  %2033 = vmatprep.subr.bf16.mxu1 %v2167_v2 }
 0x649   : > { %v1128_v17 = vsel %vm785_vm6, %v1126_v15, %v2114_v11  ;;  %v1127_v18 = vsel %vm785_vm6, %v1125_v16, %v2113_v12 }
 0x64a   : > { %v1129_v19 = vpack.c.bf16 %v1128_v17, %v1127_v18 }
 0x64c   : > { %2024 = vmatmul.mubr.msk.bf16.vlgmr.msra.gmra.mxu0 %vm804_vm7, %v1129_v19  ;;  %v2124_v19 = vld [vmem:[%s2617_s14] sm:$0xff]  }
 0x64d   : > { %2041 = vmatprep.mubr.msk.bf16.mxu0 %vm2168_vm2, %v2167_v2  ;;  %2034 = vmatpush3.bf16.msra.mxu1 %v2124_v19 }
 0x64e   : > { %2057 = vmatprep.subr.bf16.mxu1 %v2167_v2 }
 0x70c   : > { %v1185_v21 = vpop.f32.mrf.mxu0 }
 0x70d   : > { %v1186_v22 = vadd.f32 %v1933_v20, %v1185_v21 }
 0x70e   : > { %v2025_v23 = vpop.f32.mrf.mxu0 }
 0x70f   : > { %1192 = vst.msk [vmem:[#allocation2] sm:$0xff] %vm782_vm5, %v1186_v22 }
 0x710   : > { %v1188_v24 = vpop.f32.mrf.mxu0 }
 0x711   : > { %v1189_v25 = vadd.f32 %v1933_v20, %v1188_v24 }
 0x712   : > { %v2026_v26 = vpop.f32.mrf.mxu0 }
 0x713   : > { %1193 = vst.msk [vmem:[#allocation2 + $0x8] sm:$0xff] %vm782_vm5, %v1189_v25 }
 0x71a   : > { %v1194_v27 = vld [vmem:[#allocation2] ss:$2 sm:$0xff] }
 0x71b   : > { %v1197_v28 = vsel %vm782_vm5, %v1194_v27, 0.0 }
 0x71c   : > { %1198 = vadd.xlane.f32.xlu0 %v1197_v28 }
 0x7a5   : > { %v1199_v29 = vpop.xlane.xlu0 %1198 }
 0x7a6   : > { %v1200_v30 = vmul.f32 0.125, %v1199_v29 }
 0x7a8   : > { %v1201_v31 = vsub.f32 %v1194_v27, %v1200_v30 }
 0x7aa   : > { %v1202_v32 = vmul.f32 %v1201_v31, %v1201_v31 }
 0x7ac   : > { %v1203_v33 = vsel %vm782_vm5, %v1202_v32, 0.0 }
 0x7ad   : > { %1204 = vadd.xlane.f32.xlu1 %v1203_v33 }
 0x836   : > { %v1205_v34 = vpop.xlane.xlu1 %1204 }
 0x837   : > { %v1206_v35 = vmul.f32 0.125, %v1205_v34 }
 0x839   : > { %v1207_v36 = vadd.f32 1e-05, %v1206_v35 }
 0x83b   : > { %2145 = vrsqrt.f32 %v1207_v36 }
 0x848   : > { %v2146_v37 = vpop.eup %2145 }
 0x849   : > { %v1209_v39 = vmul.f32 %v2146_v37, %v1201_v31 }
 0x84b   : > { %v1216_v41 = vmul.f32 %v1937_v38, %v1209_v39 }
 0x84d   : > { %v1223_v42 = vadd.f32 %v1938_v40, %v1216_v41 }
 0x84f   : > { %v1224_v43 = vmul.f32 %v1223_v42, %v1223_v42 }
 0x851   : > { %v1225_v44 = vmul.f32 %v1224_v43, %v1223_v42 }
 0x853   : > { %v1226_v45 = vmul.f32 0.044715, %v1225_v44 }
 0x855   : > { %v1227_v46 = vadd.f32 %v1226_v45, %v1223_v42 }
 0x857   : > { %v1228_v47 = vmul.f32 0.7978846, %v1227_v46 }
 0x859   : > { %2147 = vtanh.f32 %v1228_v47  ;;  %v1411_v47 = vld [vmem:[%s2619_s16] sm:$0xf] }
 0x866   : > { %v2148_v48 = vpop.eup %2147 }
 0x867   : > { %v1230_v49 = vadd.f32 1.0, %v2148_v48  ;;  %v1424_v48 = vsel %vm808_vm0, %v1411_v47, 0 }
 0x868   : > { %2040 = vmatpush3.bf16.msra.mxu0 %v1424_v48 }
 0x869   : > { %v1231_v50 = vmul.f32 0.5, %v1230_v49  ;;  %2045 = vmatprep.subr.bf16.mxu0 %v2167_v2  ;;  %v1941_v49 = vld [vmem:[%s2618_s15] ss:$0 sm:$0xff] }
 0x86b   : > { %v1232_v52 = vmul.f32 %v1231_v50, %v1223_v42 }
 0x86d   : > { %v2435_v53 = vadd.f32 %v1233_v51, %v1232_v52 }
 0x86f   : > { %v1237_v54 = vsel %vm782_vm5, %v2435_v53, 0.0 }
 0x870   : > { %1238 = vadd.xlane.f32.xlu0 %v1237_v54 }
 0x8f9   : > { %v1239_v55 = vpop.xlane.xlu0 %1238 }
 0x8fa   : > { %v1240_v56 = vmul.f32 0.125, %v1239_v55 }
 0x8fc   : > { %v1241_v57 = vsub.f32 %v2435_v53, %v1240_v56 }
 0x8fe   : > { %v1242_v58 = vmul.f32 %v1241_v57, %v1241_v57 }
 0x900   : > { %v1243_v59 = vsel %vm782_vm5, %v1242_v58, 0.0 }
 0x901   : > { %1244 = vadd.xlane.f32.xlu0 %v1243_v59 }
 0x98a   : > { %v1245_v62 = vpop.xlane.xlu0 %1244 }
 0x98b   : > { %v1246_v63 = vmul.f32 0.125, %v1245_v62 }
 0x98d   : > { %v1247_v0 = vadd.f32 1e-05, %v1246_v63 }
 0x98f   : > { %2149 = vrsqrt.f32 %v1247_v0 }
 0x99c   : > { %v2150_v1 = vpop.eup %2149 }
 0x99d   : > { %v1249_v6 = vmul.f32 %v2150_v1, %v1241_v57 }
 0x99f   : > { %v1256_v9 = vmul.f32 %v1939_v3, %v1249_v6  ;;  %v1947_v3 = vld [vmem:[%s2620_s17] ss:$0 sm:$0xff] }
 0x9a1   : > { %v1263_v11 = vadd.f32 %v1940_v7, %v1256_v9 }
 0x9a3   : > { %v1273_v12 = vrot.slane %v1263_v11, 5 }
 0x9a5   : > { %v1276_v13 = vsel %vm1275_vm8, 0.0, %v1273_v12  ;;  %v1277_v14 = vsel %vm1275_vm8, %v1273_v12, 0.0 }
 0x9a6   : > { %v1286_v15 = vrot.slane %v1276_v13, 2  ;;  %v1287_v16 = vrot.slane %v1277_v14, 2  ;;  %v1280_v17 = vrot.slane %v1276_v13, 1  ;;  %v1281_v18 = vrot.slane %v1277_v14, 1 }
 0x9a7   : > { %v1299_v20 = vrot.slane %v1276_v13, 4  ;;  %v1300_v21 = vrot.slane %v1277_v14, 4  ;;  %v1293_v24 = vrot.slane %v1276_v13, 3  ;;  %v1294_v25 = vrot.slane %v1277_v14, 3 }
 0x9a8   : > { %v1288_v22 = vsel %vm770_vm3, %v1286_v15, %v1287_v16  ;;  %v1282_v23 = vsel %vm758_vm4, %v1280_v17, %v1281_v18  ;;  %v1312_v26 = vrot.slane %v1276_v13, 6  ;;  %v1313_v27 = vrot.slane %v1277_v14, 6  ;;  %v2125_v18 = vld [vmem:[%s2617_s14 + $0x34] ss:$0 sps:$4 sm:$0xff]  }
 0x9a9   : > { %1289 = vrot.lane.b32.xlu1 %v1288_v22, %s2637_s26  ;;  %1283 = vrot.lane.b32.xlu0 %v1282_v23, %s2650_s29  ;;  %v1301_v28 = vsel %vm808_vm0, %v1299_v20, %v1300_v21  ;;  %v1295_v29 = vsel %vm1292_vm9, %v1293_v24, %v1294_v25  ;;  %v1305_v30 = vrot.slane %v1276_v13, 5  ;;  %v1306_v31 = vrot.slane %v1277_v14, 5  ;;  %v1951_v23 = vld [vmem:[%s2615_s12 + $0x1] ss:$0 sm:$0xff]  ;;  %v2126_v24 = vld [vmem:[%s2617_s14 + $0x2c] sm:$0xff]   ;;  %s2651_s26 = smov 16  }
 0x9aa   : > { %v1314_v32 = vsel %vm1311_vm10, %v1312_v26, %v1313_v27  ;;  %v1952_v26 = vld [vmem:[%s2616_s13 + $0x1] ss:$0 sm:$0xff] }
 0x9ab   : > { %v1307_v33 = vsel %vm1275_vm8, %v1305_v30, %v1306_v31 }
 0x9ad   : > { %1302 = vrot.lane.b32.xlu1 %v1301_v28, %s2636_s2  ;;  %1296 = vrot.lane.b32.xlu0 %v1295_v29, %s2635_s0  ;;  %v2127_v28 = vld [vmem:[%s2617_s14 + $0x24] sm:$0xff]   ;;  %s2652_s2 = smov 32  }
 0x9b1   : > { %1315 = vrot.lane.b32.xlu1 %v1314_v32, %s2634_s23  ;;  %1308 = vrot.lane.b32.xlu0 %v1307_v33, %s2633_s1  ;;  %s2653_s1 = smov 24  }
 0xa1b   : > { %v1290_v34 = vpop.permute.xlu1 %1289  ;;  %v1284_v35 = vpop.permute.xlu0 %1283 }
 0xa1c   : > { %v1318_v36 = vsel %vm782_vm5, %v1276_v13, %v1284_v35 }
 0xa1d   : > { %v1319_v38 = vsel %vm785_vm6, %v1318_v36, %v1290_v34 }
 0xa1f   : > { %v1303_v37 = vpop.permute.xlu1 %1302  ;;  %v1297_v39 = vpop.permute.xlu0 %1296 }
 0xa20   : > { %v1320_v40 = vsel %vm804_vm7, %v1319_v38, %v1297_v39 }
 0xa21   : > { %v1322_v42 = vsel %vm1321_vm11, %v1320_v40, %v1303_v37  ;;  %v2128_v37 = vld [vmem:[%s2617_s14 + $0x1c] sm:$0xff]  }
 0xa23   : > { %v1316_v41 = vpop.permute.xlu1 %1315  ;;  %v1309_v43 = vpop.permute.xlu0 %1308 }
 0xa24   : > { %v1324_v44 = vsel %vm1323_vm12, %v1322_v42, %v1309_v43 }
 0xa25   : > { %v1326_v45 = vsel %vm1325_vm13, %v1324_v44, %v1316_v41 }
 0xa26   : > { %v1327_v46 = vpack.c.bf16 %v1326_v45, %v1326_v45 }
 0xa28   : > { %2036 = vmatmul.mubr.msk.bf16.vlgmr.msra.gmra.mxu1 %vm1355_vm14, %v1327_v46 }
 0xa29   : > { %2059 = vmatprep.mubr.msk.bf16.mxu1 %vm2168_vm2, %v2167_v2 }
 0xae8   : > { %v1396_v50 = vpop.f32.mrf.mxu1 }
 0xae9   : > { %v1397_v51 = vadd.f32 %v1941_v49, %v1396_v50 }
 0xaea   : > { %v2037_v52 = vpop.f32.mrf.mxu1 }
 0xaeb   : > { %v1402_v54 = vmul.f32 %v1397_v51, %v1397_v51 }
 0xaec   : > { %v1399_v55 = vpop.f32.mrf.mxu1 }
 0xaed   : > { %v1403_v56 = vmul.f32 %v1402_v54, %v1397_v51 }
 0xaee   : > { %v2038_v57 = vpop.f32.mrf.mxu1 }
 0xaef   : > { %v1404_v58 = vmul.f32 0.044715, %v1403_v56 }
 0xaf1   : > { %v1405_v59 = vadd.f32 %v1404_v58, %v1397_v51 }
 0xaf3   : > { %v1406_v60 = vmul.f32 0.7978846, %v1405_v59 }
 0xaf5   : > { %2151 = vtanh.f32 %v1406_v60 }
 0xb02   : > { %v2152_v61 = vpop.eup %2151 }
 0xb03   : > { %v1408_v62 = vadd.f32 1.0, %v2152_v61 }
 0xb05   : > { %v1409_v63 = vmul.f32 0.5, %v1408_v62 }
 0xb07   : > { %v1410_v0 = vmul.f32 %v1409_v63, %v1397_v51 }
 0xb09   : > { %v1412_v1 = vpack.c.bf16 %v1410_v0, %v1410_v0 }
 0xb0b   : > { %2042 = vmatmul.mubr.msk.bf16.vlgmr.msra.gmra.mxu0 %vm782_vm5, %v1412_v1 }
 0xb0c   : > { %2053 = vmatprep.mubr.msk.bf16.mxu0 %vm2168_vm2, %v2167_v2 }
 0xbcb   : > { %v1460_v5 = vpop.f32.mrf.mxu0 }
 0xbcc   : > { %v1461_v6 = vadd.f32 %v1947_v3, %v1460_v5  ;;  %v1967_v3 = vld [vmem:[%s2619_s16 + $0x4] sm:$0xf] }
 0xbcd   : > { %v2043_v7 = vpop.f32.mrf.mxu0  ;;  %v1655_v5 = vsel %vm808_vm0, %v1967_v3, 0 }
 0xbce   : > { %v2502_v9 = vadd.f32 %v1461_v6, %v2435_v53  ;;  %v1589_v53 = vsel %vm808_vm0, %v2125_v18, 0  ;;  %2058 = vmatpush3.bf16.msra.mxu1 %v1655_v5  ;;  %v1961_v6 = vld [vmem:[%s2618_s15 + $0x1] ss:$0 sm:$0xff] }
 0xbcf   : > { %v1463_v10 = vpop.f32.mrf.mxu0  ;;  %2046 = vmatpush3.bf16.msra.mxu0 %v1589_v53  ;;  %2063 = vmatprep.subr.bf16.mxu1 %v2167_v2 }
 0xbd0   : > { %v1471_v11 = vsel %vm782_vm5, %v2502_v9, 0.0  ;;  %2047 = vmatprep.subr.bf16.mxu0 %v2167_v2 }
 0xbd1   : > { %1472 = vadd.xlane.f32.xlu0 %v1471_v11  ;;  %v2044_v12 = vpop.f32.mrf.mxu0 }
 0xbd3   : > { %2048 = vmatpush3.bf16.msra.mxu0 %v2126_v24 }
 0xbd4   : > { %2049 = vmatprep.subr.bf16.mxu0 %v2167_v2 }
 0xbd7   : > { %2050 = vmatpush3.bf16.msra.mxu0 %v2127_v28 }
 0xbd8   : > { %2051 = vmatprep.subr.bf16.mxu0 %v2167_v2 }
 0xbdb   : > { %2052 = vmatpush3.bf16.msra.mxu0 %v2128_v37 }
 0xc5a   : > { %v1473_v13 = vpop.xlane.xlu0 %1472 }
 0xc5b   : > { %v1474_v14 = vmul.f32 0.125, %v1473_v13 }
 0xc5d   : > { %v1475_v15 = vsub.f32 %v2502_v9, %v1474_v14 }
 0xc5f   : > { %v1476_v16 = vmul.f32 %v1475_v15, %v1475_v15 }
 0xc61   : > { %v1477_v17 = vsel %vm782_vm5, %v1476_v16, 0.0 }
 0xc62   : > { %1478 = vadd.xlane.f32.xlu1 %v1477_v17 }
 0xceb   : > { %v1479_v19 = vpop.xlane.xlu1 %1478 }
 0xcec   : > { %v1480_v20 = vmul.f32 0.125, %v1479_v19 }
 0xcee   : > { %v1481_v21 = vadd.f32 1e-05, %v1480_v20 }
 0xcf0   : > { %2153 = vrsqrt.f32 %v1481_v21  ;;  %v1715_v21 = vld [vmem:[%s2621_s18] sm:$0xf] }
 0xcf1   : > { %v1728_v24 = vsel %vm808_vm0, %v1715_v21, 0 }
 0xcfd   : > { %v2154_v22 = vpop.eup %2153 }
 0xcfe   : > { %v1483_v25 = vmul.f32 %v2154_v22, %v1475_v15 }
 0xd00   : > { %v1490_v27 = vmul.f32 %v1951_v23, %v1483_v25  ;;  %v1716_v25 = vpack.c.bf16 %v2322_v8, %v2313_v4  ;;  %v1972_v4 = vld [vmem:[%s2622_s19] ss:$0 sm:$0xff] }
 0xd02   : > { %v1497_v29 = vadd.f32 %v1952_v26, %v1490_v27  ;;  %v1701_v27 = vlaneseq }
 0xd04   : > { %v1509_v30 = vrot.slane %v1497_v29, 5 }
 0xd06   : > { %v1511_v31 = vsel %vm1275_vm8, 0.0, %v1509_v30  ;;  %v1512_v32 = vsel %vm1275_vm8, %v1509_v30, 0.0  ;;  %v1702_v30 = vshrl.u32 %v1701_v27, 7 }
 0xd07   : > { %v1521_v33 = vrot.slane %v1511_v31, 2  ;;  %v1522_v34 = vrot.slane %v1512_v32, 2  ;;  %v1515_v35 = vrot.slane %v1511_v31, 1  ;;  %v1516_v36 = vrot.slane %v1512_v32, 1 }
 0xd08   : > { %v1533_v38 = vrot.slane %v1511_v31, 4  ;;  %v1534_v39 = vrot.slane %v1512_v32, 4  ;;  %v1527_v42 = vrot.slane %v1511_v31, 3  ;;  %v1528_v43 = vrot.slane %v1512_v32, 3 }
 0xd09   : > { %v1523_v40 = vsel %vm770_vm3, %v1521_v33, %v1522_v34  ;;  %v1517_v41 = vsel %vm758_vm4, %v1515_v35, %v1516_v36  ;;  %v1545_v44 = vrot.slane %v1511_v31, 6  ;;  %v1546_v45 = vrot.slane %v1512_v32, 6 }
 0xd0a   : > { %1524 = vrot.lane.b32.xlu1 %v1523_v40, %s2651_s26  ;;  %1518 = vrot.lane.b32.xlu0 %v1517_v41, %s2650_s29  ;;  %v1535_v46 = vsel %vm808_vm0, %v1533_v38, %v1534_v39  ;;  %v1529_v47 = vsel %vm1292_vm9, %v1527_v42, %v1528_v43  ;;  %v1539_v48 = vrot.slane %v1511_v31, 5  ;;  %v1540_v49 = vrot.slane %v1512_v32, 5  ;;  %s2658_s26 = sshll.u32 %s2660_s28, 3 }
 0xd0b   : > { %v1547_v50 = vsel %vm1311_vm10, %v1545_v44, %v1546_v45  ;;  %v1703_v35 = vsub.s32 0, %v1702_v30 }
 0xd0c   : > { %v1541_v51 = vsel %vm1275_vm8, %v1539_v48, %v1540_v49 }
 0xd0e   : > { %1536 = vrot.lane.b32.xlu1 %v1535_v46, %s2652_s2  ;;  %1530 = vrot.lane.b32.xlu0 %v1529_v47, %s2653_s1 }
 0xd12   : > { %1548 = vrot.lane.b32.xlu1 %v1547_v50, %s2654_s5  ;;  %1542 = vrot.lane.b32.xlu0 %v1541_v51, %s2655_s25  ;;  %s2656_s25 = sld [smem:[#allocation4_spill]] }
 0xd13   : > { %s2657_s5 = sld [smem:[#allocation5_spill]] }
 0xd18   : > { %s699_s29 = scalar_lea.vmem %s2656_s25, %s2660_s28 }
 0xd19   : > { %v1698_v32 = vld [vmem:[%s699_s29] sm:$0x1]  ;;  %s702_s25 = scalar_lea.vmem %s2657_s5, %s2660_s28  ;;  %s706_s5 = scalar_lea.vmem %s2625_s22, %s2658_s26 }
 0xd1a   : > { %v1699_v34 = vadd.f32 1.0, %v1698_v32  ;;  %v1971_v44 = vld [vmem:[%s702_s25] ss:$0 sm:$0xff] }
 0xd1c   : > { %v1704_v40 = vrot.slane %v1699_v34, %v1703_v35 }
 0xd7c   : > { %v1525_v52 = vpop.permute.xlu1 %1524  ;;  %v1519_v54 = vpop.permute.xlu0 %1518 }
 0xd7d   : > { %v1551_v55 = vsel %vm782_vm5, %v1511_v31, %v1519_v54  ;;  %v1969_v31 = vld [vmem:[%s2620_s17 + $0x1] ss:$0 sm:$0xff] }
 0xd7e   : > { %v1552_v57 = vsel %vm785_vm6, %v1551_v55, %v1525_v52 }
 0xd80   : > { %v1537_v56 = vpop.permute.xlu1 %1536  ;;  %v1531_v58 = vpop.permute.xlu0 %1530 }
 0xd81   : > { %v1553_v59 = vsel %vm804_vm7, %v1552_v57, %v1531_v58  ;;  %v1974_v58 = vld [vmem:[%s2623_s20] ss:$0 sm:$0xff] }
 0xd82   : > { %v1554_v61 = vsel %vm1321_vm11, %v1553_v59, %v1537_v56 }
 0xd84   : > { %v1549_v60 = vpop.permute.xlu1 %1548  ;;  %v1543_v62 = vpop.permute.xlu0 %1542 }
 0xd85   : > { %v1555_v63 = vsel %vm1323_vm12, %v1554_v61, %v1543_v62 }
 0xd86   : > { %v1556_v0 = vsel %vm1325_vm13, %v1555_v63, %v1549_v60  ;;  %v1975_v60 = vld [vmem:[%s2624_s21] ss:$0 sm:$0xff] }
 0xd87   : > { %v1557_v1 = vpack.c.bf16 %v1556_v0, %v1556_v0 }
 0xd89   : > { %2054 = vmatmul.mubr.msk.bf16.vlgmr.msra.gmra.mxu0 %vm1355_vm14, %v1557_v1 }
 0xe49   : > { %v1625_v7 = vpop.f32.mrf.mxu0 }
 0xe4a   : > { %v1626_v10 = vadd.f32 %v1961_v6, %v1625_v7 }
 0xe4b   : > { %v2055_v11 = vpop.f32.mrf.mxu0 }
 0xe4c   : > { %v1631_v12 = vmul.f32 %v1626_v10, %v1626_v10 }
 0xe4d   : > { %v1628_v13 = vpop.f32.mrf.mxu0 }
 0xe4e   : > { %v1632_v14 = vmul.f32 %v1631_v12, %v1626_v10 }
 0xe4f   : > { %v2056_v15 = vpop.f32.mrf.mxu0 }
 0xe50   : > { %v1633_v16 = vmul.f32 0.044715, %v1632_v14 }
 0xe52   : > { %v1634_v17 = vadd.f32 %v1633_v16, %v1626_v10 }
 0xe54   : > { %v1635_v18 = vmul.f32 0.7978846, %v1634_v17 }
 0xe56   : > { %2155 = vtanh.f32 %v1635_v18 }
 0xe63   : > { %v2156_v53 = vpop.eup %2155 }
 0xe64   : > { %v1637_v19 = vadd.f32 1.0, %v2156_v53 }
 0xe66   : > { %v1638_v20 = vmul.f32 0.5, %v1637_v19 }
 0xe68   : > { %v1639_v22 = vmul.f32 %v1638_v20, %v1626_v10 }
 0xe6a   : > { %v1642_v23 = vpack.c.bf16 %v1639_v22, %v1639_v22 }
 0xe6c   : > { %2060 = vmatmul.mubr.msk.bf16.vlgmr.msra.gmra.mxu1 %vm782_vm5, %v1642_v23 }
 0xe6d   : > { %2064 = vmatpush3.bf16.msra.mxu1 %v1728_v24  ;;  %2065 = vmatprep.mubr.msk.bf16.mxu1 %vm2168_vm2, %v2167_v2 }
 0xe74   : > { %2066 = vmatmul.mubr.msk.bf16.vlgmr.msra.gmra.mxu1 %vm782_vm5, %v1716_v25 }
 0xf2c   : > { %v1691_v26 = vpop.f32.mrf.mxu1 }
 0xf2d   : > { %v1692_v33 = vadd.f32 %v1969_v31, %v1691_v26 }
 0xf2e   : > { %v2061_v28 = vpop.f32.mrf.mxu1 }
 0xf2f   : > { %v1697_v39 = vadd.f32 %v1692_v33, %v2502_v9 }
 0xf30   : > { %v1694_v29 = vpop.f32.mrf.mxu1 }
 0xf31   : > { %v1706_v43 = vmul.f32 %v1704_v40, %v1697_v39 }
 0xf32   : > { %v2062_v2 = vpop.f32.mrf.mxu1 }
 0xf33   : > { %v1714_v45 = vadd.f32 %v1971_v44, %v1706_v43 }
 0xf34   : > { %v1764_v8 = vpop.f32.mrf.mxu1 }
 0xf35   : > { %v1765_v36 = vadd.f32 %v1972_v4, %v1764_v8 }
 0xf36   : > { %v2067_v37 = vpop.f32.mrf.mxu1 }
 0xf37   : > { %1771 = vst.msk [vmem:[#allocation2] sm:$0xff] %vm782_vm5, %v1765_v36 }
 0xf38   : > { %v1767_v38 = vpop.f32.mrf.mxu1 }
 0xf39   : > { %v1768_v41 = vadd.f32 %v1972_v4, %v1767_v38 }
 0xf3a   : > { %v2068_v42 = vpop.f32.mrf.mxu1 }
 0xf3b   : > { %1772 = vst.msk [vmem:[#allocation2 + $0x8] sm:$0xff] %vm782_vm5, %v1768_v41 }
 0xf42   : > { %v1773_v46 = vld [vmem:[#allocation2] ss:$2 sm:$0xff] }
 0xf43   : > { %v1774_v47 = vadd.f32 %v1773_v46, %v1714_v45 }
 0xf45   : > { %v1777_v48 = vsel %vm782_vm5, %v1774_v47, 0.0 }
 0xf46   : > { %1778 = vadd.xlane.f32.xlu0 %v1777_v48 }
 0xfcf   : > { %v1779_v49 = vpop.xlane.xlu0 %1778 }
 0xfd0   : > { %v1780_v50 = vmul.f32 0.125, %v1779_v49 }
 0xfd2   : > { %v1781_v9 = vsub.f32 %v1774_v47, %v1780_v50 }
 0xfd4   : > { %v1782_v51 = vmul.f32 %v1781_v9, %v1781_v9 }
 0xfd6   : > { %v1783_v52 = vsel %vm782_vm5, %v1782_v51, 0.0 }
 0xfd7   : > { %1784 = vadd.xlane.f32.xlu1 %v1783_v52 }
0x1060   : > { %v1785_v54 = vpop.xlane.xlu1 %1784 }
0x1061   : > { %v1786_v55 = vmul.f32 0.125, %v1785_v54 }
0x1063   : > { %v1787_v56 = vadd.f32 1e-05, %v1786_v55 }
0x1065   : > { %2157 = vrsqrt.f32 %v1787_v56 }
0x1072   : > { %v2158_v57 = vpop.eup %2157 }
0x1073   : > { %v1789_v59 = vmul.f32 %v2158_v57, %v1781_v9 }
0x1075   : > { %v1796_v61 = vmul.f32 %v1974_v58, %v1789_v59 }
0x1077   : > { %v1803_v62 = vadd.f32 %v1975_v60, %v1796_v61 }
0x1079   : > { %1804 = vxpose.xlu0.b32.start.end [1/1] (short) (narrow) %v1803_v62, 8 }
0x10f5   : > { %v1820_v63 = vpop.trf.xlu0 }
0x10f6   : > { %1836 = vst.msk [vmem:[%s706_s5] sm:$0xff] %vm782_vm5, %v1820_v63 }
0x10f7 PF: > { %s32_s3 = sadd.s32 1, %s2165_s3  }
0x10f8   : > { %p29_p4 = scmp.ge.s32.totalorder %s32_s3, 4  }
0x10fa   :  { %31 = sbr.rel (!%p29_p4) target bundleno = 8 (0x8), region = 154 }

// kernel: multi_scale_encoder_stack.5
= control target key start
LH: loop header
LB: loop body
LE: loop exit
PB: predicated region body
PF: predicated region fallthrough
CT: control target
= control target key end

     0   :  { %s2353_s0 = inlined_call_operand.vmem [shape: f32[2,8,8], index: 0, kind: input, shape index: {}]   ;;  %s2354_s1 = inlined_call_operand.vmem [shape: f32[2,1,16], index: 1, kind: input, shape index: {}]   ;;  %s2355_s2 = inlined_call_operand.vmem [shape: f32[2,1,16], index: 2, kind: input, shape index: {}]   ;;  %s2356_s3 = inlined_call_operand.vmem [shape: bf16[8,16], index: 3, kind: input, shape index: {}]   ;;  %s2357_s4 = inlined_call_operand.vmem [shape: f32[1,16], index: 4, kind: input, shape index: {}]   ;;  %s2358_s5 = inlined_call_operand.vmem [shape: bf16[2,48,16], index: 5, kind: input, shape index: {}]   ;;  %s2359_s6 = inlined_call_operand.vmem [shape: f32[2,1,16], index: 6, kind: input, shape index: {}]   ;;  %s2360_s7 = inlined_call_operand.vmem [shape: f32[2,1,16], index: 7, kind: input, shape index: {}]   ;;  %s2361_s8 = inlined_call_operand.vmem [shape: f32[2,1,16], index: 8, kind: input, shape index: {}]   ;;  %s2362_s9 = inlined_call_operand.vmem [shape: bf16[48,16], index: 9, kind: input, shape index: {}]   ;;  %s2363_s10 = inlined_call_operand.vmem [shape: f32[1,16], index: 10, kind: input, shape index: {}]   ;;  %s2364_s11 = inlined_call_operand.vmem [shape: f32[1,16], index: 11, kind: input, shape index: {}]   ;;  %s2365_s12 = inlined_call_operand.vmem [shape: f32[1,16], index: 12, kind: input, shape index: {}]   ;;  %s2366_s13 = inlined_call_operand.vmem [shape: f32[4,16], index: 13, kind: input, shape index: {}]   ;;  %s2367_s14 = inlined_call_operand.vmem [shape: f32[2,1,16], index: 14, kind: input, shape index: {}]   ;;  %s2368_s15 = inlined_call_operand.vmem [shape: f32[2,1,16], index: 15, kind: input, shape index: {}]   ;;  %s2369_s16 = inlined_call_operand.vmem [shape: bf16[2,48,16], index: 16, kind: input, shape index: {}]   ;;  %s2370_s17 = inlined_call_operand.vmem [shape: f32[2,1,16], index: 17, kind: input, shape index: {}]   ;;  %s2371_s18 = inlined_call_operand.vmem [shape: bf16[2,16,16], index: 18, kind: input, shape index: {}]   ;;  %s2372_s19 = inlined_call_operand.vmem [shape: f32[2,1,16], index: 19, kind: input, shape index: {}]   ;;  %s2373_s20 = inlined_call_operand.vmem [shape: f32[1,16], index: 20, kind: input, shape index: {}]   ;;  %s2374_s21 = inlined_call_operand.vmem [shape: f32[1,16], index: 21, kind: input, shape index: {}]   ;;  %s2375_s22 = inlined_call_operand.vmem [shape: f32[2,16,4], index: 22, kind: output, shape index: {}]  }
   0x1   :  { %2378 = sst [smem:[#allocation3_spill]] %s2353_s0 }
   0x2   :  { %2379 = sst [smem:[#allocation4_spill]] %s2354_s1 }
   0x3   :  { %2380 = sst [smem:[#allocation5_spill]] %s2355_s2 }
   0x4   :  { %2381 = sst [smem:[#allocation6_spill]] %s2356_s3  ;;  %s2107_s3 = smov 0  }
   0x5   :  { %2382 = sst [smem:[#allocation7_spill]] %s2357_s4 }
   0x6   :  { %2383 = sst [smem:[#allocation8_spill]] %s2358_s5 }
   0x7   :  { %2384 = sst [smem:[#allocation9_spill]] %s2359_s6 }
   0x8 LB: > { %s1757_s28 = sadd.s32 4294967295, %s1986_s3   ;;  %p1761_p0 = scmp.ge.s32.totalorder %s1986_s3, 1  ;;  %s1986_s3 = sphi %s2107_s3, %s32_s3  }
   0x9   : > { %p627_p1 = scmp.lt.s32.totalorder %s1986_s3, 3 }
   0xb   : > { %p628_p2 = pnand %p1761_p0, %p627_p1 }
   0xc   : > { %p694_p3 = scmp.lt.s32.totalorder (!%p628_p2), %s1757_s28, 1  ;;  %s2385_s4 = sld [smem:[#allocation6_spill]] (!%p628_p2) }
   0xd   : > { %631 = sbr.rel (%p628_p2) target bundleno = 4484 (0x1184), region = 108  ;;  %s2386_s5 = sld [smem:[#allocation3_spill]] (!%p628_p2) }
   0xe   : > { %s2387_s26 = sld [smem:[#allocation8_spill]] (!%p628_p2)  ;;  %s1990_s1 = smov (!%p628_p2), 32  }
   0xf   : > { %s2388_s23 = sld [smem:[#allocation7_spill]] (!%p628_p2) }
  0x10   : > { %s2389_s25 = sld [smem:[#allocation9_spill]] (!%p628_p2) }
  0x11   : > { %s2391_s30 = sld [smem:[#allocation5_spill]] (!%p628_p2) }
  0x12   : > { %v743_v0 = vld [vmem:[%s2385_s4] sm:$0xf]  ;;  %vm756_vm0 = vcmask 1043456   ;;  %v1988_v1 = vmov 0.0   ;;  %s2393_s28 = smov (!%p694_p3, %s1757_s28), 1  ;;  %vm1989_vm1 = vmmov 0  }
  0x13   : > { %1861 = vmatprep.subr.bf16.mxu0 %v1988_v1  ;;  %v758_v2 = vsel %vm756_vm0, %v743_v0, 0  ;;  %1867 = vmatprep.subr.bf16.mxu1 %v1988_v1  ;;  %s1762_s0 = sshll.u32 %s2393_s28, 3  ;;  %vm752_vm2 = vcmask 64512   ;;  %vm810_vm3 = vcmask 1040384   ;;  %vm822_vm4 = vcmask 1045504  }
  0x14   : > { %1862 = vmatpush3.bf16.msra.mxu0 %v758_v2  ;;  %s697_s24 = scalar_lea.vmem %s2386_s5, %s1762_s0  ;;  %1863 = vmatprep.mubr.msk.bf16.mxu0 %vm1989_vm1, %v1988_v1  ;;  %v1941_v6 = vld [vmem:[%s2387_s26 + $0x10] sm:$0xff]   ;;  %v1942_v7 = vld [vmem:[%s2387_s26 + $0x8] sm:$0xff]   ;;  %v1943_v8 = vld [vmem:[%s2387_s26] sm:$0xff]   ;;  %vm815_vm5 = vcmask 1046528   ;;  %s1991_s5 = smov 16   ;;  %vm829_vm6 = vcmask 130048  }
  0x15   : > { %1877 = vmatprep.subr.bf16.mxu0 %v1988_v1  ;;  %1873 = vmatprep.mubr.msk.bf16.mxu1 %vm1989_vm1, %v1988_v1  ;;  %v710_v3 = vld [vmem:[%s697_s24] sm:$0xff]  ;;  %vm831_vm7 = vcmask 261120   ;;  %vm858_vm8 = vcmask 392192   ;;  %v1944_v50 = vld [vmem:[%s2387_s26 + $0x28] sm:$0xff]   ;;  %v1946_v55 = vld [vmem:[%s2387_s26 + $0x18] sm:$0xff]   ;;  %vm1179_vm9 = vcmask 125952  }
  0x16   : > { %711 = vxpose.xlu0.b32.start.end [1/1] (short) (narrow) %v710_v3, 8  ;;  %1868 = vmatpush3.bf16.msra.mxu1 %v1941_v6  ;;  %v1765_v9 = vld [vmem:[%s2388_s23] ss:$0 sm:$0xff]  ;;  %vm1258_vm10 = vcmask 1044480   ;;  %s2390_s23 = sld [smem:[#allocation4_spill]]  ;;  %vm1681_vm11 = vcmask 31744  }
  0x17   : > { %1869 = vmatprep.subr.bf16.mxu1 %v1988_v1  ;;  %v1767_v29 = vld [vmem:[%s2389_s25] ss:$0 sm:$0xff]  ;;  %s703_s4 = scalar_lea.vmem %s2391_s30, %s2393_s28 }
  0x18   : > { %v1945_v51 = vld [vmem:[%s2387_s26 + $0x20] sm:$0xff]  }
  0x19   : > { %v1772_v57 = vld [vmem:[%s2360_s7] ss:$0 sm:$0xff] }
  0x1a   : > { %1870 = vmatpush3.bf16.msra.mxu1 %v1942_v7  ;;  %v1773_v59 = vld [vmem:[%s2361_s8] ss:$0 sm:$0xff] }
  0x1b   : > { %1871 = vmatprep.subr.bf16.mxu1 %v1988_v1 }
  0x1c   : > { %s700_s24 = scalar_lea.vmem %s2390_s23, %s2393_s28 }
  0x1e   : > { %1872 = vmatpush3.bf16.msra.mxu1 %v1943_v8 }
  0x1f   : > { %1887 = vmatprep.subr.bf16.mxu1 %v1988_v1 }
  0x92   : > { %v727_v4 = vpop.trf.xlu0 }
  0x93   : > { %v744_v5 = vpack.c.bf16 %v727_v4, %v727_v4 }
  0x95   : > { %1864 = vmatmul.mubr.msk.bf16.vlgmr.msra.gmra.mxu0 %vm752_vm2, %v744_v5 }
  0x96   : > { %1883 = vmatprep.mubr.msk.bf16.mxu0 %vm1989_vm1, %v1988_v1  ;;  %1878 = vmatpush3.bf16.msra.mxu0 %v1944_v50 }
  0x97   : > { %1879 = vmatprep.subr.bf16.mxu0 %v1988_v1 }
  0x9a   : > { %1880 = vmatpush3.bf16.msra.mxu0 %v1945_v51 }
  0x9b   : > { %1881 = vmatprep.subr.bf16.mxu0 %v1988_v1 }
  0x9e   : > { %1882 = vmatpush3.bf16.msra.mxu0 %v1946_v55 }
  0x9f   : > { %1897 = vmatprep.subr.bf16.mxu0 %v1988_v1 }
 0x155   : > { %v794_v10 = vpop.f32.mrf.mxu0 }
 0x156   : > { %v795_v11 = vadd.f32 %v1765_v9, %v794_v10 }
 0x157   : > { %v1865_v12 = vpop.f32.mrf.mxu0 }
 0x158   : > { %v808_v13 = vrot.slane %v795_v11, 7 }
 0x159   : > { %v797_v14 = vpop.f32.mrf.mxu0 }
 0x15a   : > { %v811_v15 = vsel %vm810_vm3, 0.0, %v808_v13  ;;  %v812_v16 = vsel %vm810_vm3, %v808_v13, 0.0  ;;  %v1781_v13 = vld [vmem:[%s2389_s25 + $0x1] ss:$0 sm:$0xff] }
 0x15b   : > { %v816_v17 = vrot.slane %v811_v15, 1  ;;  %v817_v18 = vrot.slane %v812_v16, 1  ;;  %v824_v19 = vrot.slane %v812_v16, 2  ;;  %v1866_v20 = vpop.f32.mrf.mxu0  ;;  %v823_v21 = vrot.slane %v811_v15, 2 }
 0x15d   : > { %v825_v22 = vsel %vm822_vm4, %v823_v21, %v824_v19  ;;  %v818_v23 = vsel %vm815_vm5, %v816_v17, %v817_v18 }
 0x15e   : > { %826 = vrot.lane.b32.xlu1 %v825_v22, %s1990_s1  ;;  %819 = vrot.lane.b32.xlu0 %v818_v23, %s1991_s5 }
 0x1d0   : > { %v827_v24 = vpop.permute.xlu1 %826  ;;  %v820_v25 = vpop.permute.xlu0 %819 }
 0x1d1   : > { %v830_v26 = vsel %vm829_vm6, %v811_v15, %v820_v25 }
 0x1d2   : > { %v832_v27 = vsel %vm831_vm7, %v830_v26, %v827_v24 }
 0x1d3   : > { %v833_v28 = vpack.c.bf16 %v832_v27, %v832_v27 }
 0x1d5   : > { %1874 = vmatmul.mubr.msk.bf16.vlgmr.msra.gmra.mxu1 %vm858_vm8, %v833_v28 }
 0x1d6   : > { %1893 = vmatprep.mubr.msk.bf16.mxu1 %vm1989_vm1, %v1988_v1 }
 0x295   : > { %v896_v30 = vpop.f32.mrf.mxu1 }
 0x296   : > { %v897_v31 = vadd.f32 %v1767_v29, %v896_v30 }
 0x297   : > { %v1875_v32 = vpop.f32.mrf.mxu1 }
 0x298   : > { %v902_v33 = vmul.f32 %v897_v31, %v897_v31 }
 0x299   : > { %v899_v34 = vpop.f32.mrf.mxu1 }
 0x29a   : > { %v903_v35 = vmul.f32 %v902_v33, %v897_v31  ;;  %v1947_v34 = vld [vmem:[%s2362_s9 + $0x10] sm:$0xff]  }
 0x29b   : > { %v1876_v36 = vpop.f32.mrf.mxu1  ;;  %1888 = vmatpush3.bf16.msra.mxu1 %v1947_v34 }
 0x29c   : > { %v904_v37 = vmul.f32 0.044715, %v903_v35  ;;  %v1948_v35 = vld [vmem:[%s2362_s9 + $0x8] sm:$0xff]   ;;  %1889 = vmatprep.subr.bf16.mxu1 %v1988_v1 }
 0x29e   : > { %v905_v38 = vadd.f32 %v904_v37, %v897_v31 }
 0x29f   : > { %1890 = vmatpush3.bf16.msra.mxu1 %v1948_v35 }
 0x2a0   : > { %v906_v39 = vmul.f32 0.7978846, %v905_v38  ;;  %1891 = vmatprep.subr.bf16.mxu1 %v1988_v1 }
 0x2a2   : > { %1958 = vtanh.f32 %v906_v39  ;;  %v1949_v39 = vld [vmem:[%s2362_s9] sm:$0xff]  }
 0x2a3   : > { %1892 = vmatpush3.bf16.msra.mxu1 %v1949_v39 }
 0x2a4   : > { %1907 = vmatprep.subr.bf16.mxu1 %v1988_v1 }
 0x2af   : > { %v1959_v40 = vpop.eup %1958 }
 0x2b0   : > { %v908_v41 = vadd.f32 1.0, %v1959_v40 }
 0x2b2   : > { %v909_v42 = vmul.f32 0.5, %v908_v41  ;;  %v1788_v41 = vld [vmem:[%s2360_s7 + $0x1] ss:$0 sm:$0xff] }
 0x2b4   : > { %v910_v43 = vmul.f32 %v909_v42, %v897_v31 }
 0x2b6   : > { %v913_v44 = vsel %vm829_vm6, %v910_v43, 0.0 }
 0x2b7   : > { %914 = vadd.xlane.f32.xlu1 %v913_v44 }
 0x340   : > { %v915_v45 = vpop.xlane.xlu1 %914 }
 0x341   : > { %v917_v46 = vmul.f32 0.0625, %v915_v45 }
 0x343   : > { %v918_v47 = vsub.f32 %v910_v43, %v917_v46  ;;  %v1789_v43 = vld [vmem:[%s2361_s8 + $0x1] ss:$0 sm:$0xff] }
 0x345   : > { %v919_v48 = vmul.f32 %v918_v47, %v918_v47 }
 0x347   : > { %v920_v49 = vsel %vm829_vm6, %v919_v48, 0.0 }
 0x348   : > { %921 = vadd.xlane.f32.xlu1 %v920_v49 }
 0x3d1   : > { %v922_v52 = vpop.xlane.xlu1 %921 }
 0x3d2   : > { %v923_v53 = vmul.f32 0.0625, %v922_v52 }
 0x3d4   : > { %v924_v54 = vadd.f32 1e-05, %v923_v53 }
 0x3d6   : > { %1960 = vrsqrt.f32 %v924_v54 }
 0x3e3   : > { %v1961_v56 = vpop.eup %1960 }
 0x3e4   : > { %v926_v58 = vmul.f32 %v1961_v56, %v918_v47 }
 0x3e6   : > { %v933_v60 = vmul.f32 %v1772_v57, %v926_v58 }
 0x3e8   : > { %v940_v61 = vadd.f32 %v1773_v59, %v933_v60  ;;  %v1790_v60 = vld [vmem:[%s2363_s10] ss:$0 sm:$0xff] }
 0x3ea   : > { %v951_v62 = vrot.slane %v940_v61, 7 }
 0x3ec   : > { %v953_v63 = vsel %vm810_vm3, 0.0, %v951_v62  ;;  %v954_v0 = vsel %vm810_vm3, %v951_v62, 0.0 }
 0x3ed   : > { %v963_v2 = vrot.slane %v953_v63, 2  ;;  %v964_v3 = vrot.slane %v954_v0, 2  ;;  %v957_v4 = vrot.slane %v953_v63, 1  ;;  %v958_v5 = vrot.slane %v954_v0, 1 }
 0x3ef   : > { %v965_v6 = vsel %vm822_vm4, %v963_v2, %v964_v3  ;;  %v959_v7 = vsel %vm815_vm5, %v957_v4, %v958_v5 }
 0x3f0   : > { %966 = vrot.lane.b32.xlu0 %v965_v6, %s1990_s1  ;;  %960 = vrot.lane.b32.xlu1 %v959_v7, %s1991_s5 }
 0x462   : > { %v967_v8 = vpop.permute.xlu0 %966  ;;  %v961_v9 = vpop.permute.xlu1 %960 }
 0x463   : > { %v969_v10 = vsel %vm829_vm6, %v953_v63, %v961_v9 }
 0x464   : > { %v970_v11 = vsel %vm831_vm7, %v969_v10, %v967_v8 }
 0x465   : > { %v971_v12 = vpack.c.bf16 %v970_v11, %v970_v11 }
 0x467   : > { %1884 = vmatmul.mubr.msk.bf16.vlgmr.msra.gmra.mxu0 %vm858_vm8, %v971_v12 }
 0x468   : > { %1903 = vmatprep.mubr.msk.bf16.mxu0 %vm1989_vm1, %v1988_v1 }
 0x527   : > { %v1033_v14 = vpop.f32.mrf.mxu0 }
 0x528   : > { %v1034_v15 = vadd.f32 %v1781_v13, %v1033_v14  ;;  %v1795_v14 = vld [vmem:[%s2364_s11] ss:$0 sm:$0xff] }
 0x529   : > { %v1885_v16 = vpop.f32.mrf.mxu0 }
 0x52a   : > { %v1039_v17 = vmul.f32 %v1034_v15, %v1034_v15  ;;  %v1796_v16 = vld [vmem:[%s2365_s12] ss:$0 sm:$0xff] }
 0x52b   : > { %v1036_v18 = vpop.f32.mrf.mxu0 }
 0x52c   : > { %v1040_v19 = vmul.f32 %v1039_v17, %v1034_v15 }
 0x52d   : > { %v1886_v20 = vpop.f32.mrf.mxu0 }
 0x52e   : > { %v1041_v21 = vmul.f32 0.044715, %v1040_v19 }
 0x530   : > { %v1042_v22 = vadd.f32 %v1041_v21, %v1034_v15 }
 0x532   : > { %v1043_v23 = vmul.f32 0.7978846, %v1042_v22 }
 0x534   : > { %1962 = vtanh.f32 %v1043_v23 }
 0x541   : > { %v1963_v24 = vpop.eup %1962 }
 0x542   : > { %v1045_v25 = vadd.f32 1.0, %v1963_v24 }
 0x544   : > { %v1046_v26 = vmul.f32 0.5, %v1045_v25 }
 0x546   : > { %v1047_v27 = vmul.f32 %v1046_v26, %v1034_v15 }
 0x548   : > { %v1052_v28 = vsel %vm829_vm6, %v1047_v27, 0.0 }
 0x549   : > { %1053 = vadd.xlane.f32.xlu0 %v1052_v28 }
 0x5d2   : > { %v1054_v29 = vpop.xlane.xlu0 %1053 }
 0x5d3   : > { %v1055_v30 = vmul.f32 0.0625, %v1054_v29 }
 0x5d5   : > { %v1056_v31 = vsub.f32 %v1047_v27, %v1055_v30  ;;  %v1216_v27 = vld [vmem:[%s2366_s13] sm:$0xf] }
 0x5d7   : > { %v1057_v32 = vmul.f32 %v1056_v31, %v1056_v31 }
 0x5d9   : > { %v1058_v33 = vsel %vm829_vm6, %v1057_v32, 0.0 }
 0x5da   : > { %1059 = vadd.xlane.f32.xlu1 %v1058_v33 }
 0x663   : > { %v1060_v36 = vpop.xlane.xlu1 %1059 }
 0x664   : > { %v1061_v37 = vmul.f32 0.0625, %v1060_v36  ;;  %v1950_v36 = vld [vmem:[%s2369_s16 + $0x10] sm:$0xff]  }
 0x665   : > { %1898 = vmatpush3.bf16.msra.mxu0 %v1950_v36 }
 0x666   : > { %v1062_v38 = vadd.f32 1e-05, %v1061_v37  ;;  %v1951_v37 = vld [vmem:[%s2369_s16 + $0x8] sm:$0xff]   ;;  %1899 = vmatprep.subr.bf16.mxu0 %v1988_v1 }
 0x668   : > { %1964 = vrsqrt.f32 %v1062_v38 }
 0x669   : > { %1900 = vmatpush3.bf16.msra.mxu0 %v1951_v37 }
 0x66a   : > { %1901 = vmatprep.subr.bf16.mxu0 %v1988_v1 }
 0x675   : > { %v1965_v40 = vpop.eup %1964 }
 0x676   : > { %v1064_v42 = vmul.f32 %v1965_v40, %v1056_v31 }
 0x678   : > { %v1071_v44 = vmul.f32 %v1788_v41, %v1064_v42  ;;  %v1952_v41 = vld [vmem:[%s2369_s16] sm:$0xff]  }
 0x679   : > { %1902 = vmatpush3.bf16.msra.mxu0 %v1952_v41 }
 0x67a   : > { %v1078_v45 = vadd.f32 %v1789_v43, %v1071_v44  ;;  %v1797_v43 = vld [vmem:[%s2367_s14] ss:$0 sm:$0xff]  ;;  %1913 = vmatprep.subr.bf16.mxu0 %v1988_v1 }
 0x67c   : > { %v1087_v46 = vrot.slane %v1078_v45, 7  ;;  %v1798_v45 = vld [vmem:[%s2368_s15] ss:$0 sm:$0xff] }
 0x67e   : > { %v1089_v47 = vsel %vm810_vm3, 0.0, %v1087_v46  ;;  %v1090_v48 = vsel %vm810_vm3, %v1087_v46, 0.0 }
 0x67f   : > { %v1099_v49 = vrot.slane %v1089_v47, 2  ;;  %v1100_v50 = vrot.slane %v1090_v48, 2  ;;  %v1093_v51 = vrot.slane %v1089_v47, 1  ;;  %v1094_v52 = vrot.slane %v1090_v48, 1 }
 0x681   : > { %v1101_v53 = vsel %vm822_vm4, %v1099_v49, %v1100_v50  ;;  %v1095_v54 = vsel %vm815_vm5, %v1093_v51, %v1094_v52 }
 0x682   : > { %1102 = vrot.lane.b32.xlu1 %v1101_v53, %s1990_s1  ;;  %1096 = vrot.lane.b32.xlu0 %v1095_v54, %s1991_s5 }
 0x6f4   : > { %v1103_v55 = vpop.permute.xlu1 %1102  ;;  %v1097_v56 = vpop.permute.xlu0 %1096 }
 0x6f5   : > { %v1105_v57 = vsel %vm829_vm6, %v1089_v47, %v1097_v56 }
 0x6f6   : > { %v1106_v58 = vsel %vm831_vm7, %v1105_v57, %v1103_v55 }
 0x6f7   : > { %v1107_v59 = vpack.c.bf16 %v1106_v58, %v1106_v58  ;;  %v1953_v58 = vld [vmem:[%s2371_s18] sm:$0xff]  }
 0x6f9   : > { %1894 = vmatmul.mubr.msk.bf16.vlgmr.msra.gmra.mxu1 %vm858_vm8, %v1107_v59  ;;  %v1799_v59 = vld [vmem:[%s2370_s17] ss:$0 sm:$0xff] }
 0x6fa   : > { %1909 = vmatprep.mubr.msk.bf16.mxu1 %vm1989_vm1, %v1988_v1  ;;  %1908 = vmatpush3.bf16.msra.mxu1 %v1953_v58 }
 0x6fb   : > { %1923 = vmatprep.subr.bf16.mxu1 %v1988_v1 }
 0x7b9   : > { %v1169_v61 = vpop.f32.mrf.mxu1 }
 0x7ba   : > { %v1170_v62 = vadd.f32 %v1790_v60, %v1169_v61 }
 0x7bb   : > { %v1895_v63 = vpop.f32.mrf.mxu1 }
 0x7bc   : > { %1175 = vst.msk [vmem:[#allocation2] sm:$0xff] %vm829_vm6, %v1170_v62 }
 0x7bd   : > { %v1172_v0 = vpop.f32.mrf.mxu1 }
 0x7bf   : > { %v1896_v2 = vpop.f32.mrf.mxu1 }
 0x7c3   : > { %v1176_v3 = vld [vmem:[#allocation2] ss:$2 sm:$0xf] }
 0x7c4   : > { %v1180_v4 = vsel %vm1179_vm9, %v1176_v3, 0.0 }
 0x7c5   : > { %1181 = vadd.xlane.f32.xlu0 %v1180_v4 }
 0x84e   : > { %v1182_v5 = vpop.xlane.xlu0 %1181 }
 0x84f   : > { %v1183_v6 = vmul.f32 0.0625, %v1182_v5 }
 0x851   : > { %v1184_v7 = vsub.f32 %v1176_v3, %v1183_v6 }
 0x853   : > { %v1185_v8 = vmul.f32 %v1184_v7, %v1184_v7 }
 0x855   : > { %v1186_v9 = vsel %vm1179_vm9, %v1185_v8, 0.0 }
 0x856   : > { %1187 = vadd.xlane.f32.xlu1 %v1186_v9 }
 0x8df   : > { %v1188_v10 = vpop.xlane.xlu1 %1187 }
 0x8e0   : > { %v1189_v11 = vmul.f32 0.0625, %v1188_v10 }
 0x8e2   : > { %v1190_v12 = vadd.f32 1e-05, %v1189_v11 }
 0x8e4   : > { %1966 = vrsqrt.f32 %v1190_v12  ;;  %v1804_v12 = vld [vmem:[%s2372_s19] ss:$0 sm:$0xff] }
 0x8f1   : > { %v1967_v13 = vpop.eup %1966 }
 0x8f2   : > { %v1192_v15 = vmul.f32 %v1967_v13, %v1184_v7 }
 0x8f4   : > { %v1199_v17 = vmul.f32 %v1795_v14, %v1192_v15 }
 0x8f6   : > { %v1206_v18 = vadd.f32 %v1796_v16, %v1199_v17 }
 0x8f8   : > { %v1207_v19 = vmul.f32 %v1206_v18, %v1206_v18 }
 0x8fa   : > { %v1208_v20 = vmul.f32 %v1207_v19, %v1206_v18 }
 0x8fc   : > { %v1209_v21 = vmul.f32 0.044715, %v1208_v20 }
 0x8fe   : > { %v1210_v22 = vadd.f32 %v1209_v21, %v1206_v18 }
 0x900   : > { %v1211_v23 = vmul.f32 0.7978846, %v1210_v22 }
 0x902   : > { %1968 = vtanh.f32 %v1211_v23 }
 0x90f   : > { %v1969_v24 = vpop.eup %1968 }
 0x910   : > { %v1213_v25 = vadd.f32 1.0, %v1969_v24 }
 0x912   : > { %v1214_v26 = vmul.f32 0.5, %v1213_v25  ;;  %v1954_v25 = vld [vmem:[%s2369_s16 + $0x28] sm:$0xff]  }
 0x914   : > { %v1215_v28 = vmul.f32 %v1214_v26, %v1206_v18  ;;  %v1955_v26 = vld [vmem:[%s2369_s16 + $0x20] sm:$0xff]  }
 0x916   : > { %v2242_v29 = vadd.f32 %v1216_v27, %v1215_v28 }
 0x918   : > { %v1220_v30 = vsel %vm1179_vm9, %v2242_v29, 0.0 }
 0x919   : > { %1221 = vadd.xlane.f32.xlu0 %v1220_v30  ;;  %v1956_v30 = vld [vmem:[%s2369_s16 + $0x18] sm:$0xff]  }
 0x9a2   : > { %v1222_v31 = vpop.xlane.xlu0 %1221 }
 0x9a3   : > { %v1223_v32 = vmul.f32 0.0625, %v1222_v31 }
 0x9a5   : > { %v1224_v33 = vsub.f32 %v2242_v29, %v1223_v32  ;;  %v1809_v32 = vld [vmem:[%s2367_s14 + $0x1] ss:$0 sm:$0xff] }
 0x9a7   : > { %v1225_v34 = vmul.f32 %v1224_v33, %v1224_v33 }
 0x9a9   : > { %v1226_v35 = vsel %vm1179_vm9, %v1225_v34, 0.0  ;;  %v1810_v34 = vld [vmem:[%s2368_s15 + $0x1] ss:$0 sm:$0xff] }
 0x9aa   : > { %1227 = vadd.xlane.f32.xlu0 %v1226_v35 }
 0xa33   : > { %v1228_v38 = vpop.xlane.xlu0 %1227 }
 0xa34   : > { %v1229_v39 = vmul.f32 0.0625, %v1228_v38 }
 0xa36   : > { %v1230_v40 = vadd.f32 1e-05, %v1229_v39 }
 0xa38   : > { %1970 = vrsqrt.f32 %v1230_v40 }
 0xa45   : > { %v1971_v42 = vpop.eup %1970 }
 0xa46   : > { %v1232_v44 = vmul.f32 %v1971_v42, %v1224_v33 }
 0xa48   : > { %v1239_v46 = vmul.f32 %v1797_v43, %v1232_v44 }
 0xa4a   : > { %v1246_v47 = vadd.f32 %v1798_v45, %v1239_v46  ;;  %v1957_v46 = vld [vmem:[%s2371_s18 + $0x8] sm:$0xff]  }
 0xa4c   : > { %v1255_v48 = vrot.slane %v1246_v47, 7  ;;  %v1818_v47 = vld [vmem:[%s2370_s17 + $0x1] ss:$0 sm:$0xff] }
 0xa4e   : > { %v1257_v49 = vsel %vm810_vm3, 0.0, %v1255_v48 }
 0xa4f   : > { %v1259_v50 = vsel %vm1258_vm10, %v1257_v49, 0.0 }
 0xa50   : > { %v1265_v51 = vrot.slane %v1259_v50, 2  ;;  %v1261_v52 = vrot.slane %v1259_v50, 1 }
 0xa52   : > { %1266 = vrot.lane.b32.xlu1 %v1265_v51, %s1990_s1  ;;  %1262 = vrot.lane.b32.xlu0 %v1261_v52, %s1991_s5 }
 0xac4   : > { %v1267_v53 = vpop.permute.xlu1 %1266  ;;  %v1263_v54 = vpop.permute.xlu0 %1262 }
 0xac5   : > { %v1269_v55 = vsel %vm829_vm6, %v1259_v50, %v1263_v54 }
 0xac6   : > { %v1270_v56 = vsel %vm831_vm7, %v1269_v55, %v1267_v53 }
 0xac7   : > { %v1271_v57 = vpack.c.bf16 %v1270_v56, %v1270_v56 }
 0xac9   : > { %1904 = vmatmul.mubr.msk.bf16.vlgmr.msra.gmra.mxu0 %vm858_vm8, %v1271_v57 }
 0xaca   : > { %1919 = vmatprep.mubr.msk.bf16.mxu0 %vm1989_vm1, %v1988_v1  ;;  %1914 = vmatpush3.bf16.msra.mxu0 %v1954_v25 }
 0xacb   : > { %1915 = vmatprep.subr.bf16.mxu0 %v1988_v1 }
 0xace   : > { %1916 = vmatpush3.bf16.msra.mxu0 %v1955_v26  ;;  %v1830_v26 = vld [vmem:[%s2373_s20] ss:$0 sm:$0xff] }
 0xacf   : > { %1917 = vmatprep.subr.bf16.mxu0 %v1988_v1 }
 0xad2   : > { %1918 = vmatpush3.bf16.msra.mxu0 %v1956_v30 }
 0xb89   : > { %v1333_v60 = vpop.f32.mrf.mxu0 }
 0xb8a   : > { %v1334_v61 = vadd.f32 %v1799_v59, %v1333_v60 }
 0xb8b   : > { %v1905_v62 = vpop.f32.mrf.mxu0 }
 0xb8c   : > { %v1339_v63 = vmul.f32 %v1334_v61, %v1334_v61 }
 0xb8d   : > { %v1336_v0 = vpop.f32.mrf.mxu0 }
 0xb8e   : > { %v1340_v2 = vmul.f32 %v1339_v63, %v1334_v61  ;;  %v1606_v63 = vlaneseq }
 0xb8f   : > { %v1906_v3 = vpop.f32.mrf.mxu0 }
 0xb90   : > { %v1341_v4 = vmul.f32 0.044715, %v1340_v2  ;;  %v1607_v0 = vshrl.u32 %v1606_v63, 7  ;;  %v1603_v2 = vld [vmem:[%s700_s24] sm:$0x1]  ;;  %s1834_s24 = sshll.u32 %s2393_s28, 4 }
 0xb91   : > { %v1604_v3 = vadd.f32 1.0, %v1603_v2  ;;  %s708_s27 = scalar_lea.vmem %s2375_s22, %s1834_s24 }
 0xb92   : > { %v1342_v5 = vadd.f32 %v1341_v4, %v1334_v61  ;;  %v1608_v4 = vsub.s32 0, %v1607_v0 }
 0xb94   : > { %v1343_v6 = vmul.f32 0.7978846, %v1342_v5  ;;  %v1826_v5 = vld [vmem:[%s2372_s19 + $0x1] ss:$0 sm:$0xff] }
 0xb96   : > { %1972 = vtanh.f32 %v1343_v6 }
 0xba3   : > { %v1973_v7 = vpop.eup %1972 }
 0xba4   : > { %v1345_v8 = vadd.f32 1.0, %v1973_v7 }
 0xba6   : > { %v1346_v9 = vmul.f32 0.5, %v1345_v8  ;;  %v1609_v8 = vrot.slane %v1604_v3, %v1608_v4 }
 0xba8   : > { %v1347_v10 = vmul.f32 %v1346_v9, %v1334_v61 }
 0xbaa   : > { %v1350_v11 = vpack.c.bf16 %v1347_v10, %v1347_v10 }
 0xbac   : > { %1910 = vmatmul.mubr.msk.bf16.vlgmr.msra.gmra.mxu1 %vm829_vm6, %v1350_v11 }
 0xbad   : > { %1925 = vmatprep.mubr.msk.bf16.mxu1 %vm1989_vm1, %v1988_v1  ;;  %1924 = vmatpush3.bf16.msra.mxu1 %v1957_v46 }
 0xc6c   : > { %v1401_v13 = vpop.f32.mrf.mxu1 }
 0xc6d   : > { %v1402_v14 = vadd.f32 %v1804_v12, %v1401_v13  ;;  %v1829_v12 = vld [vmem:[%s703_s4] ss:$0 sm:$0xff] }
 0xc6e   : > { %v1911_v15 = vpop.f32.mrf.mxu1 }
 0xc6f   : > { %v2289_v16 = vadd.f32 %v1402_v14, %v2242_v29 }
 0xc70   : > { %v1404_v17 = vpop.f32.mrf.mxu1 }
 0xc71   : > { %v1412_v18 = vsel %vm1179_vm9, %v2289_v16, 0.0 }
 0xc72   : > { %1413 = vadd.xlane.f32.xlu0 %v1412_v18  ;;  %v1912_v19 = vpop.f32.mrf.mxu1 }
 0xcfb   : > { %v1414_v20 = vpop.xlane.xlu0 %1413 }
 0xcfc   : > { %v1415_v21 = vmul.f32 0.0625, %v1414_v20 }
 0xcfe   : > { %v1416_v22 = vsub.f32 %v2289_v16, %v1415_v21 }
 0xd00   : > { %v1417_v23 = vmul.f32 %v1416_v22, %v1416_v22 }
 0xd02   : > { %v1418_v24 = vsel %vm1179_vm9, %v1417_v23, 0.0 }
 0xd03   : > { %1419 = vadd.xlane.f32.xlu1 %v1418_v24 }
 0xd8c   : > { %v1420_v27 = vpop.xlane.xlu1 %1419 }
 0xd8d   : > { %v1421_v28 = vmul.f32 0.0625, %v1420_v27 }
 0xd8f   : > { %v1422_v29 = vadd.f32 1e-05, %v1421_v28  ;;  %v1831_v28 = vld [vmem:[%s2374_s21] ss:$0 sm:$0xff] }
 0xd91   : > { %1974 = vrsqrt.f32 %v1422_v29 }
 0xd9e   : > { %v1975_v31 = vpop.eup %1974 }
 0xd9f   : > { %v1424_v33 = vmul.f32 %v1975_v31, %v1416_v22 }
 0xda1   : > { %v1431_v1 = vmul.f32 %v1809_v32, %v1424_v33 }
 0xda3   : > { %v1438_v35 = vadd.f32 %v1810_v34, %v1431_v1 }
 0xda5   : > { %v1449_v36 = vrot.slane %v1438_v35, 7 }
 0xda7   : > { %v1451_v37 = vsel %vm810_vm3, 0.0, %v1449_v36 }
 0xda8   : > { %v1452_v38 = vsel %vm1258_vm10, %v1451_v37, 0.0 }
 0xda9   : > { %v1458_v39 = vrot.slane %v1452_v38, 2  ;;  %v1454_v40 = vrot.slane %v1452_v38, 1 }
 0xdab   : > { %1459 = vrot.lane.b32.xlu1 %v1458_v39, %s1990_s1  ;;  %1455 = vrot.lane.b32.xlu0 %v1454_v40, %s1991_s5 }
 0xe1d   : > { %v1460_v41 = vpop.permute.xlu1 %1459  ;;  %v1456_v42 = vpop.permute.xlu0 %1455 }
 0xe1e   : > { %v1462_v43 = vsel %vm829_vm6, %v1452_v38, %v1456_v42 }
 0xe1f   : > { %v1463_v44 = vsel %vm831_vm7, %v1462_v43, %v1460_v41 }
 0xe20   : > { %v1464_v45 = vpack.c.bf16 %v1463_v44, %v1463_v44 }
 0xe22   : > { %1920 = vmatmul.mubr.msk.bf16.vlgmr.msra.gmra.mxu0 %vm858_vm8, %v1464_v45 }
 0xee2   : > { %v1526_v48 = vpop.f32.mrf.mxu0 }
 0xee3   : > { %v1527_v49 = vadd.f32 %v1818_v47, %v1526_v48 }
 0xee4   : > { %v1921_v50 = vpop.f32.mrf.mxu0 }
 0xee5   : > { %v1532_v51 = vmul.f32 %v1527_v49, %v1527_v49 }
 0xee6   : > { %v1529_v52 = vpop.f32.mrf.mxu0 }
 0xee7   : > { %v1533_v53 = vmul.f32 %v1532_v51, %v1527_v49 }
 0xee8   : > { %v1922_v54 = vpop.f32.mrf.mxu0 }
 0xee9   : > { %v1534_v55 = vmul.f32 0.044715, %v1533_v53 }
 0xeeb   : > { %v1535_v56 = vadd.f32 %v1534_v55, %v1527_v49 }
 0xeed   : > { %v1536_v57 = vmul.f32 0.7978846, %v1535_v56 }
 0xeef   : > { %1976 = vtanh.f32 %v1536_v57 }
 0xefc   : > { %v1977_v58 = vpop.eup %1976 }
 0xefd   : > { %v1538_v59 = vadd.f32 1.0, %v1977_v58 }
 0xeff   : > { %v1539_v60 = vmul.f32 0.5, %v1538_v59 }
 0xf01   : > { %v1540_v61 = vmul.f32 %v1539_v60, %v1527_v49 }
 0xf03   : > { %v1544_v62 = vpack.c.bf16 %v1540_v61, %v1540_v61 }
 0xf05   : > { %1926 = vmatmul.mubr.msk.bf16.vlgmr.msra.gmra.mxu1 %vm829_vm6, %v1544_v62 }
 0xfc5   : > { %v1596_v6 = vpop.f32.mrf.mxu1 }
 0xfc6   : > { %v1597_v7 = vadd.f32 %v1826_v5, %v1596_v6 }
 0xfc7   : > { %v1927_v9 = vpop.f32.mrf.mxu1 }
 0xfc8   : > { %v1602_v10 = vadd.f32 %v1597_v7, %v2289_v16 }
 0xfc9   : > { %v1599_v11 = vpop.f32.mrf.mxu1 }
 0xfca   : > { %v1611_v13 = vmul.f32 %v1609_v8, %v1602_v10 }
 0xfcb   : > { %v1928_v14 = vpop.f32.mrf.mxu1 }
 0xfcc   : > { %v1619_v15 = vadd.f32 %v1829_v12, %v1611_v13 }
 0xfce   : > { %v1622_v17 = vsel %vm1179_vm9, %v1619_v15, 0.0 }
 0xfcf   : > { %1623 = vadd.xlane.f32.xlu0 %v1622_v17 }
0x1058   : > { %v1624_v18 = vpop.xlane.xlu0 %1623 }
0x1059   : > { %v1625_v19 = vmul.f32 0.0625, %v1624_v18 }
0x105b   : > { %v1626_v20 = vsub.f32 %v1619_v15, %v1625_v19 }
0x105d   : > { %v1627_v21 = vmul.f32 %v1626_v20, %v1626_v20 }
0x105f   : > { %v1628_v22 = vsel %vm1179_vm9, %v1627_v21, 0.0 }
0x1060   : > { %1629 = vadd.xlane.f32.xlu1 %v1628_v22 }
0x10e9   : > { %v1630_v23 = vpop.xlane.xlu1 %1629 }
0x10ea   : > { %v1631_v24 = vmul.f32 0.0625, %v1630_v23 }
0x10ec   : > { %v1632_v25 = vadd.f32 1e-05, %v1631_v24 }
0x10ee   : > { %1978 = vrsqrt.f32 %v1632_v25 }
0x10fb   : > { %v1979_v16 = vpop.eup %1978 }
0x10fc   : > { %v1634_v27 = vmul.f32 %v1979_v16, %v1626_v20 }
0x10fe   : > { %v1641_v29 = vmul.f32 %v1830_v26, %v1634_v27 }
0x1100   : > { %v1648_v30 = vadd.f32 %v1831_v28, %v1641_v29 }
0x1102   : > { %1649 = vxpose.xlu0.b32.start.end [1/1] (short) (narrow) %v1648_v30, 16 }
0x117e   : > { %v1665_v31 = vpop.trf.xlu0 }
0x117f   : > { %1682 = vst.msk [vmem:[%s708_s27] sm:$0xff] %vm1681_vm11, %v1665_v31 }
0x1182   : > { %v1666_v32 = vpop.trf.xlu0 }
0x1183   : > { %1683 = vst.msk [vmem:[%s708_s27 + $0x8] sm:$0xff] %vm1681_vm11, %v1666_v32 }
0x1184 PF: > { %s32_s3 = sadd.s32 1, %s1986_s3  }
0x1185   : > { %p29_p4 = scmp.ge.s32.totalorder %s32_s3, 4  }
0x1187   :  { %31 = sbr.rel (!%p29_p4) target bundleno = 8 (0x8), region = 154 }

</bundles_post_ra>
